<compile_context>
chip_gen: v7x
topology: tpu7x:2x2x1
jax: 0.10.0
libtpu: 0.0.40
codegen_flags: <defaults>
</compile_context>

<pallas_src>
import math
import jax
import jax.numpy as jnp
from jax.experimental import pallas as pl
from jax.experimental.pallas import tpu as pltpu

B, T, H, O = 4, 16, 32, 1      # batch, seq_len, hidden_dim, output_dim; input_dim = 1
BP = 8                         # batch padded to a full sublane group
LP = 128                       # fused-gate width 3H = 96 padded to a full lane group

# Row layout of the packed parameter slab (one (N_ROWS, 128) f32 array).
R_WHH0 = 0            # rows [0,  32): Whh layer 0, (H, 3H) fused r|z|n, lane-padded
R_WIH1 = H            # rows [32, 64): Wih layer 1
R_WHH1 = 2 * H        # rows [64, 96): Whh layer 1
R_WROW0 = 3 * H       # row 96 : Wih layer 0 (input_dim == 1 -> a single row)
R_BGI0 = 3 * H + 1    # row 97 : input-side bias layer 0 (b_ih with b_hh folded for r,z)
R_BHN0 = 3 * H + 2    # row 98 : [0 | 0 | b_hn0 | 0]
R_BGI1 = 3 * H + 3    # row 99 : input-side bias layer 1
R_BHN1 = 3 * H + 4    # row 100: [0 | 0 | b_hn1 | 0]
R_WOUT = 3 * H + 5    # row 101: [W_lin (H) | b_lin (1) | 0]
N_ROWS = ((3 * H + 6 + 7) // 8) * 8   # 104


def gru_kernel(x_ref, p_ref, out_ref, h0s_ref):
    # ---- unpack the single parameter slab (static row slices, loaded once) ----
    whh0 = p_ref[R_WHH0:R_WHH0 + H, :]          # (H, LP)
    wih1 = p_ref[R_WIH1:R_WIH1 + H, :]          # (H, LP)
    whh1 = p_ref[R_WHH1:R_WHH1 + H, :]          # (H, LP)
    wrow0 = p_ref[R_WROW0:R_WROW0 + 1, :]       # (1, LP)
    bgi0 = p_ref[R_BGI0:R_BGI0 + 1, :]
    bhn0 = p_ref[R_BHN0:R_BHN0 + 1, :]
    bgi1 = p_ref[R_BGI1:R_BGI1 + 1, :]
    bhn1 = p_ref[R_BHN1:R_BHN1 + 1, :]
    wout = p_ref[R_WOUT:R_WOUT + 1, :]

    # Hoisted broadcasts (JAX does not CSE broadcast_in_dim inside the unrolled loops).
    wrow0_b = jnp.broadcast_to(wrow0, (BP, LP))
    bgi0_b = jnp.broadcast_to(bgi0, (BP, LP))
    bhn0_b = jnp.broadcast_to(bhn0, (BP, LP))
    bhn1_b = jnp.broadcast_to(bhn1, (BP, LP))

    # Pad batch 4 -> 8 once, in-kernel (wrapper does zero per-call prep on x).
    xp = jnp.concatenate(
        [x_ref[...], jnp.zeros((BP - B, T), jnp.float32)], axis=0)   # (BP, T)

    def cell(gi, gh, h_prev):
        # gi/gh: (BP, LP) fused r|z|n slabs; gh's n block already carries b_hn.
        rz = jax.nn.sigmoid(gi[:, :2 * H] + gh[:, :2 * H])           # fused r & z
        r = rz[:, :H]
        z = rz[:, H:2 * H]
        n = jnp.tanh(gi[:, 2 * H:3 * H] + r * gh[:, 2 * H:3 * H])
        return (1.0 - z) * n + z * h_prev

    # ---- layer 0: only the h-dependent matmul sits on the serial path ----
    h0 = jnp.zeros((BP, H), jnp.float32)
    for t in range(T):
        gi = xp[:, t:t + 1] * wrow0_b + bgi0_b      # input proj, not h-dependent
        gh = jnp.dot(h0, whh0, preferred_element_type=jnp.float32) + bhn0_b
        h0 = cell(gi, gh, h0)
        h0s_ref[t * BP:(t + 1) * BP, :] = h0        # buffer h0_t for the batched dot

    # ---- layer-1 input projections for ALL timesteps: one batched MXU dot ----
    gi1_all = (jnp.dot(h0s_ref[...], wih1, preferred_element_type=jnp.float32)
               + bgi1)                              # (T*BP, LP)

    # ---- layer 1 ----
    h1 = jnp.zeros((BP, H), jnp.float32)
    for t in range(T):
        gi = gi1_all[t * BP:(t + 1) * BP, :]
        gh = jnp.dot(h1, whh1, preferred_element_type=jnp.float32) + bhn1_b
        h1 = cell(gi, gh, h1)

    # ---- final Linear (O == 1): VPU multiply + lane reduction ----
    y = (jnp.sum(h1 * wout[:, :H], axis=-1, keepdims=True)
         + wout[:, H:H + 1])                        # (BP, 1)
    out_ref[...] = y[:B, :]


def gru_regression_forward(x, pslab):
    """x: (B, T) float32, pslab: (N_ROWS, 128) packed params -> (B, O) float32."""
    vmem = pl.BlockSpec(memory_space=pltpu.MemorySpace.VMEM)
    return pl.pallas_call(
        gru_kernel,
        out_shape=jax.ShapeDtypeStruct((B, O), jnp.float32),
        in_specs=[vmem, vmem],
        out_specs=vmem,
        scratch_shapes=[pltpu.VMEM((T * BP, H), jnp.float32)],   # h0_t history
    )(x, pslab)


def init_params(key):
    """Deterministic parameters in PyTorch shapes (gate order r, z, n)."""
    bound = 1.0 / math.sqrt(H)
    ks = jax.random.split(key, 11)
    u = lambda kk, shape: jax.random.uniform(kk, shape, jnp.float32, -bound, bound)
    pt = {
        'wih0': u(ks[0], (3 * H, 1)),   # weight_ih_l0
        'whh0': u(ks[1], (3 * H, H)),   # weight_hh_l0
        'bih0': u(ks[2], (3 * H,)),
        'bhh0': u(ks[3], (3 * H,)),
        'wih1': u(ks[4], (3 * H, H)),   # weight_ih_l1
        'whh1': u(ks[5], (3 * H, H)),   # weight_hh_l1
        'bih1': u(ks[6], (3 * H,)),
        'bhh1': u(ks[7], (3 * H,)),
        'wlin': u(ks[8], (O, H)),       # self.linear
        'blin': u(ks[9], (O,)),
    }
    return pt, ks[10]


def to_kernel_params(pt):
    """Pack all PyTorch-shaped params into one lane-padded (N_ROWS, 128) f32 slab."""
    def pad_lane(a2d):
        return jnp.pad(a2d, ((0, 0), (0, LP - a2d.shape[-1])))

    def fold_bias(bih, bhh):
        # r/z biases add on either side of the sigmoid -> fold into the input bias;
        # b_hn must stay inside r * (W_hn h + b_hn) -> its own gh-side slab row.
        bgi = jnp.concatenate([bih[:2 * H] + bhh[:2 * H], bih[2 * H:]])
        bhn_slab = jnp.concatenate([jnp.zeros((2 * H,), jnp.float32), bhh[2 * H:]])
        return bgi.reshape(1, 3 * H), bhn_slab.reshape(1, 3 * H)

    bgi0, bhn0 = fold_bias(pt['bih0'], pt['bhh0'])
    bgi1, bhn1 = fold_bias(pt['bih1'], pt['bhh1'])
    wout_row = jnp.concatenate(
        [pt['wlin'].reshape(H), pt['blin'].reshape(O),
         jnp.zeros((LP - H - O,), jnp.float32)]).reshape(1, LP)

    rows = [
        pad_lane(pt['whh0'].T),    # rows   0:32
        pad_lane(pt['wih1'].T),    # rows  32:64
        pad_lane(pt['whh1'].T),    # rows  64:96
        pad_lane(pt['wih0'].T),    # row   96
        pad_lane(bgi0),            # row   97
        pad_lane(bhn0),            # row   98
        pad_lane(bgi1),            # row   99
        pad_lane(bhn1),            # row  100
        wout_row,                  # row  101
    ]
    slab = jnp.concatenate(rows, axis=0)                       # (102, 128)
    slab = jnp.pad(slab, ((0, N_ROWS - slab.shape[0]), (0, 0)))
    return slab.astype(jnp.float32)


def reference_forward(x, pt):
    """Pure-JAX reference mirroring torch.nn.GRU(batch_first=True) eval semantics."""
    def run_layer(seq, wih, whh, bih, bhh):        # seq: (T, B, in)
        def step(h, xt):
            gi = xt @ wih.T + bih
            gh = h @ whh.T + bhh
            r = jax.nn.sigmoid(gi[:, :H] + gh[:, :H])
            z = jax.nn.sigmoid(gi[:, H:2 * H] + gh[:, H:2 * H])
            n = jnp.tanh(gi[:, 2 * H:] + r * gh[:, 2 * H:])
            h_new = (1.0 - z) * n + z * h
            return h_new, h_new
        h_init = jnp.zeros((x.shape[0], H), jnp.float32)
        _, outs = jax.lax.scan(step, h_init, seq)
        return outs                                 # (T, B, H)

    seq0 = jnp.transpose(x)[:, :, None]             # (T, B, 1)
    out0 = run_layer(seq0, pt['wih0'], pt['whh0'], pt['bih0'], pt['bhh0'])
    out1 = run_layer(out0, pt['wih1'], pt['whh1'], pt['bih1'], pt['bhh1'])
    last = out1[-1]                                  # (B, H) == out[:, -1, :]
    return last @ pt['wlin'].T + pt['blin']


if __name__ == "__main__":
    key = jax.random.PRNGKey(0)
    pt, kx = init_params(key)
    x = jax.random.normal(kx, (B, T), jnp.float32)   # model forward expects (B, T)

    pslab = to_kernel_params(pt)                     # one-time, offline repack
    out = gru_regression_forward(x, pslab)
    out = jax.block_until_ready(out)

    ref = reference_forward(x, pt)
    assert out.shape == (B, O)
    assert jnp.allclose(out, ref, rtol=1e-4, atol=1e-4), (out, ref)
    print("KERNEL_OK")
</pallas_src>

<mosaic_0001>
module attributes {stable_mosaic.version = 11 : i64} {
  func.func @gru_kernel(%arg0: memref<4x16xf32, #tpu.memory_space<vmem>>, %arg1: memref<104x128xf32, #tpu.memory_space<vmem>>, %arg2: memref<4x1xf32, #tpu.memory_space<vmem>>, %arg3: memref<128x32xf32, #tpu.memory_space<vmem>>) attributes {dimension_semantics = [], scalar_prefetch = 0 : i64, scratch_operands = 1 : i64, tpu.core_type = #tpu.core_type<tc>} {
    %c0 = arith.constant 0 : index
    %c0_0 = arith.constant 0 : index
    %0 = vector.load %arg1[%c0, %c0_0] : memref<104x128xf32, #tpu.memory_space<vmem>>, vector<32x128xf32>
    %c32 = arith.constant 32 : index
    %c0_1 = arith.constant 0 : index
    %1 = vector.load %arg1[%c32, %c0_1] : memref<104x128xf32, #tpu.memory_space<vmem>>, vector<32x128xf32>
    %c64 = arith.constant 64 : index
    %c0_2 = arith.constant 0 : index
    %2 = vector.load %arg1[%c64, %c0_2] : memref<104x128xf32, #tpu.memory_space<vmem>>, vector<32x128xf32>
    %c96 = arith.constant 96 : index
    %c0_3 = arith.constant 0 : index
    %3 = vector.load %arg1[%c96, %c0_3] : memref<104x128xf32, #tpu.memory_space<vmem>>, vector<1x128xf32>
    %c97 = arith.constant 97 : index
    %c0_4 = arith.constant 0 : index
    %4 = vector.load %arg1[%c97, %c0_4] : memref<104x128xf32, #tpu.memory_space<vmem>>, vector<1x128xf32>
    %c98 = arith.constant 98 : index
    %c0_5 = arith.constant 0 : index
    %5 = vector.load %arg1[%c98, %c0_5] : memref<104x128xf32, #tpu.memory_space<vmem>>, vector<1x128xf32>
    %c99 = arith.constant 99 : index
    %c0_6 = arith.constant 0 : index
    %6 = vector.load %arg1[%c99, %c0_6] : memref<104x128xf32, #tpu.memory_space<vmem>>, vector<1x128xf32>
    %c100 = arith.constant 100 : index
    %c0_7 = arith.constant 0 : index
    %7 = vector.load %arg1[%c100, %c0_7] : memref<104x128xf32, #tpu.memory_space<vmem>>, vector<1x128xf32>
    %c101 = arith.constant 101 : index
    %c0_8 = arith.constant 0 : index
    %8 = vector.load %arg1[%c101, %c0_8] : memref<104x128xf32, #tpu.memory_space<vmem>>, vector<1x128xf32>
    %9 = vector.shape_cast %3 : vector<1x128xf32> to vector<1x128xf32>
    %10 = vector.broadcast %9 : vector<1x128xf32> to vector<8x128xf32>
    %11 = vector.shape_cast %4 : vector<1x128xf32> to vector<1x128xf32>
    %12 = vector.broadcast %11 : vector<1x128xf32> to vector<8x128xf32>
    %13 = vector.shape_cast %5 : vector<1x128xf32> to vector<1x128xf32>
    %14 = vector.broadcast %13 : vector<1x128xf32> to vector<8x128xf32>
    %15 = vector.shape_cast %7 : vector<1x128xf32> to vector<1x128xf32>
    %16 = vector.broadcast %15 : vector<1x128xf32> to vector<8x128xf32>
    %c0_9 = arith.constant 0 : index
    %c0_10 = arith.constant 0 : index
    %17 = vector.load %arg0[%c0_9, %c0_10] : memref<4x16xf32, #tpu.memory_space<vmem>>, vector<4x16xf32>
    %cst = arith.constant 0.000000e+00 : f32
    %18 = vector.broadcast %cst : f32 to vector<4x16xf32>
    %19 = tpu.concatenate %17, %18 in 0 : vector<4x16xf32>, vector<4x16xf32> -> vector<8x16xf32>
    %cst_11 = arith.constant 0.000000e+00 : f32
    %20 = vector.broadcast %cst_11 : f32 to vector<8x32xf32>
    %21 = vector.extract_strided_slice %19 {offsets = [0, 0], sizes = [8, 1], strides = [1, 1]} : vector<8x16xf32> to vector<8x1xf32>
    %22 = vector.broadcast %21 : vector<8x1xf32> to vector<8x128xf32>
    %23 = arith.mulf %22, %10 : vector<8x128xf32>
    %24 = arith.addf %23, %12 : vector<8x128xf32>
    %cst_12 = arith.constant dense<0.000000e+00> : vector<8x128xf32>
    %25 = tpu.matmul %20, %0, %cst_12 {dimension_numbers = #tpu.dot_dimension_numbers<[1], [0], [0], [1], [0, 0, 1, 1], [], []>} : vector<8x32xf32>, vector<32x128xf32>, vector<8x128xf32> -> vector<8x128xf32>
    %26 = arith.addf %25, %14 : vector<8x128xf32>
    %27 = vector.extract_strided_slice %24 {offsets = [0, 0], sizes = [8, 64], strides = [1, 1]} : vector<8x128xf32> to vector<8x64xf32>
    %28 = vector.extract_strided_slice %26 {offsets = [0, 0], sizes = [8, 64], strides = [1, 1]} : vector<8x128xf32> to vector<8x64xf32>
    %29 = arith.addf %27, %28 : vector<8x64xf32>
    %30 = arith.negf %29 : vector<8x64xf32>
    %31 = math.exp %30 : vector<8x64xf32>
    %cst_13 = arith.constant 1.000000e+00 : f32
    %32 = vector.broadcast %cst_13 : f32 to vector<8x64xf32>
    %33 = arith.addf %32, %31 : vector<8x64xf32>
    %34 = arith.divf %32, %33 : vector<8x64xf32>
    %35 = vector.extract_strided_slice %34 {offsets = [0, 0], sizes = [8, 32], strides = [1, 1]} : vector<8x64xf32> to vector<8x32xf32>
    %36 = vector.extract_strided_slice %34 {offsets = [0, 32], sizes = [8, 32], strides = [1, 1]} : vector<8x64xf32> to vector<8x32xf32>
    %37 = vector.extract_strided_slice %24 {offsets = [0, 64], sizes = [8, 32], strides = [1, 1]} : vector<8x128xf32> to vector<8x32xf32>
    %38 = vector.extract_strided_slice %26 {offsets = [0, 64], sizes = [8, 32], strides = [1, 1]} : vector<8x128xf32> to vector<8x32xf32>
    %39 = arith.mulf %35, %38 : vector<8x32xf32>
    %40 = arith.addf %37, %39 : vector<8x32xf32>
    %41 = math.tanh %40 : vector<8x32xf32>
    %cst_14 = arith.constant 1.000000e+00 : f32
    %42 = vector.broadcast %cst_14 : f32 to vector<8x32xf32>
    %43 = arith.subf %42, %36 : vector<8x32xf32>
    %44 = arith.mulf %43, %41 : vector<8x32xf32>
    %45 = arith.mulf %36, %20 : vector<8x32xf32>
    %46 = arith.addf %44, %45 : vector<8x32xf32>
    %c0_15 = arith.constant 0 : index
    %c0_16 = arith.constant 0 : index
    %47 = vector.load %arg3[%c0_15, %c0_16] : memref<128x32xf32, #tpu.memory_space<vmem>>, vector<8x32xf32>
    tpu.vector_store %arg3[%c0_15, %c0_16], %46 {strides = array<i32>} : memref<128x32xf32, #tpu.memory_space<vmem>>, vector<8x32xf32>,
    %48 = vector.extract_strided_slice %19 {offsets = [0, 1], sizes = [8, 1], strides = [1, 1]} : vector<8x16xf32> to vector<8x1xf32>
    %49 = vector.broadcast %48 : vector<8x1xf32> to vector<8x128xf32>
    %50 = arith.mulf %49, %10 : vector<8x128xf32>
    %51 = arith.addf %50, %12 : vector<8x128xf32>
    %cst_17 = arith.constant dense<0.000000e+00> : vector<8x128xf32>
    %52 = tpu.matmul %46, %0, %cst_17 {dimension_numbers = #tpu.dot_dimension_numbers<[1], [0], [0], [1], [0, 0, 1, 1], [], []>} : vector<8x32xf32>, vector<32x128xf32>, vector<8x128xf32> -> vector<8x128xf32>
    %53 = arith.addf %52, %14 : vector<8x128xf32>
    %54 = vector.extract_strided_slice %51 {offsets = [0, 0], sizes = [8, 64], strides = [1, 1]} : vector<8x128xf32> to vector<8x64xf32>
    %55 = vector.extract_strided_slice %53 {offsets = [0, 0], sizes = [8, 64], strides = [1, 1]} : vector<8x128xf32> to vector<8x64xf32>
    %56 = arith.addf %54, %55 : vector<8x64xf32>
    %57 = arith.negf %56 : vector<8x64xf32>
    %58 = math.exp %57 : vector<8x64xf32>
    %cst_18 = arith.constant 1.000000e+00 : f32
    %59 = vector.broadcast %cst_18 : f32 to vector<8x64xf32>
    %60 = arith.addf %59, %58 : vector<8x64xf32>
    %61 = arith.divf %59, %60 : vector<8x64xf32>
    %62 = vector.extract_strided_slice %61 {offsets = [0, 0], sizes = [8, 32], strides = [1, 1]} : vector<8x64xf32> to vector<8x32xf32>
    %63 = vector.extract_strided_slice %61 {offsets = [0, 32], sizes = [8, 32], strides = [1, 1]} : vector<8x64xf32> to vector<8x32xf32>
    %64 = vector.extract_strided_slice %51 {offsets = [0, 64], sizes = [8, 32], strides = [1, 1]} : vector<8x128xf32> to vector<8x32xf32>
    %65 = vector.extract_strided_slice %53 {offsets = [0, 64], sizes = [8, 32], strides = [1, 1]} : vector<8x128xf32> to vector<8x32xf32>
    %66 = arith.mulf %62, %65 : vector<8x32xf32>
    %67 = arith.addf %64, %66 : vector<8x32xf32>
    %68 = math.tanh %67 : vector<8x32xf32>
    %cst_19 = arith.constant 1.000000e+00 : f32
    %69 = vector.broadcast %cst_19 : f32 to vector<8x32xf32>
    %70 = arith.subf %69, %63 : vector<8x32xf32>
    %71 = arith.mulf %70, %68 : vector<8x32xf32>
    %72 = arith.mulf %63, %46 : vector<8x32xf32>
    %73 = arith.addf %71, %72 : vector<8x32xf32>
    %c8 = arith.constant 8 : index
    %c0_20 = arith.constant 0 : index
    %74 = vector.load %arg3[%c8, %c0_20] : memref<128x32xf32, #tpu.memory_space<vmem>>, vector<8x32xf32>
    tpu.vector_store %arg3[%c8, %c0_20], %73 {strides = array<i32>} : memref<128x32xf32, #tpu.memory_space<vmem>>, vector<8x32xf32>,
    %75 = vector.extract_strided_slice %19 {offsets = [0, 2], sizes = [8, 1], strides = [1, 1]} : vector<8x16xf32> to vector<8x1xf32>
    %76 = vector.broadcast %75 : vector<8x1xf32> to vector<8x128xf32>
    %77 = arith.mulf %76, %10 : vector<8x128xf32>
    %78 = arith.addf %77, %12 : vector<8x128xf32>
    %cst_21 = arith.constant dense<0.000000e+00> : vector<8x128xf32>
    %79 = tpu.matmul %73, %0, %cst_21 {dimension_numbers = #tpu.dot_dimension_numbers<[1], [0], [0], [1], [0, 0, 1, 1], [], []>} : vector<8x32xf32>, vector<32x128xf32>, vector<8x128xf32> -> vector<8x128xf32>
    %80 = arith.addf %79, %14 : vector<8x128xf32>
    %81 = vector.extract_strided_slice %78 {offsets = [0, 0], sizes = [8, 64], strides = [1, 1]} : vector<8x128xf32> to vector<8x64xf32>
    %82 = vector.extract_strided_slice %80 {offsets = [0, 0], sizes = [8, 64], strides = [1, 1]} : vector<8x128xf32> to vector<8x64xf32>
    %83 = arith.addf %81, %82 : vector<8x64xf32>
    %84 = arith.negf %83 : vector<8x64xf32>
    %85 = math.exp %84 : vector<8x64xf32>
    %cst_22 = arith.constant 1.000000e+00 : f32
    %86 = vector.broadcast %cst_22 : f32 to vector<8x64xf32>
    %87 = arith.addf %86, %85 : vector<8x64xf32>
    %88 = arith.divf %86, %87 : vector<8x64xf32>
    %89 = vector.extract_strided_slice %88 {offsets = [0, 0], sizes = [8, 32], strides = [1, 1]} : vector<8x64xf32> to vector<8x32xf32>
    %90 = vector.extract_strided_slice %88 {offsets = [0, 32], sizes = [8, 32], strides = [1, 1]} : vector<8x64xf32> to vector<8x32xf32>
    %91 = vector.extract_strided_slice %78 {offsets = [0, 64], sizes = [8, 32], strides = [1, 1]} : vector<8x128xf32> to vector<8x32xf32>
    %92 = vector.extract_strided_slice %80 {offsets = [0, 64], sizes = [8, 32], strides = [1, 1]} : vector<8x128xf32> to vector<8x32xf32>
    %93 = arith.mulf %89, %92 : vector<8x32xf32>
    %94 = arith.addf %91, %93 : vector<8x32xf32>
    %95 = math.tanh %94 : vector<8x32xf32>
    %cst_23 = arith.constant 1.000000e+00 : f32
    %96 = vector.broadcast %cst_23 : f32 to vector<8x32xf32>
    %97 = arith.subf %96, %90 : vector<8x32xf32>
    %98 = arith.mulf %97, %95 : vector<8x32xf32>
    %99 = arith.mulf %90, %73 : vector<8x32xf32>
    %100 = arith.addf %98, %99 : vector<8x32xf32>
    %c16 = arith.constant 16 : index
    %c0_24 = arith.constant 0 : index
    %101 = vector.load %arg3[%c16, %c0_24] : memref<128x32xf32, #tpu.memory_space<vmem>>, vector<8x32xf32>
    tpu.vector_store %arg3[%c16, %c0_24], %100 {strides = array<i32>} : memref<128x32xf32, #tpu.memory_space<vmem>>, vector<8x32xf32>,
    %102 = vector.extract_strided_slice %19 {offsets = [0, 3], sizes = [8, 1], strides = [1, 1]} : vector<8x16xf32> to vector<8x1xf32>
    %103 = vector.broadcast %102 : vector<8x1xf32> to vector<8x128xf32>
    %104 = arith.mulf %103, %10 : vector<8x128xf32>
    %105 = arith.addf %104, %12 : vector<8x128xf32>
    %cst_25 = arith.constant dense<0.000000e+00> : vector<8x128xf32>
    %106 = tpu.matmul %100, %0, %cst_25 {dimension_numbers = #tpu.dot_dimension_numbers<[1], [0], [0], [1], [0, 0, 1, 1], [], []>} : vector<8x32xf32>, vector<32x128xf32>, vector<8x128xf32> -> vector<8x128xf32>
    %107 = arith.addf %106, %14 : vector<8x128xf32>
    %108 = vector.extract_strided_slice %105 {offsets = [0, 0], sizes = [8, 64], strides = [1, 1]} : vector<8x128xf32> to vector<8x64xf32>
    %109 = vector.extract_strided_slice %107 {offsets = [0, 0], sizes = [8, 64], strides = [1, 1]} : vector<8x128xf32> to vector<8x64xf32>
    %110 = arith.addf %108, %109 : vector<8x64xf32>
    %111 = arith.negf %110 : vector<8x64xf32>
    %112 = math.exp %111 : vector<8x64xf32>
    %cst_26 = arith.constant 1.000000e+00 : f32
    %113 = vector.broadcast %cst_26 : f32 to vector<8x64xf32>
    %114 = arith.addf %113, %112 : vector<8x64xf32>
    %115 = arith.divf %113, %114 : vector<8x64xf32>
    %116 = vector.extract_strided_slice %115 {offsets = [0, 0], sizes = [8, 32], strides = [1, 1]} : vector<8x64xf32> to vector<8x32xf32>
    %117 = vector.extract_strided_slice %115 {offsets = [0, 32], sizes = [8, 32], strides = [1, 1]} : vector<8x64xf32> to vector<8x32xf32>
    %118 = vector.extract_strided_slice %105 {offsets = [0, 64], sizes = [8, 32], strides = [1, 1]} : vector<8x128xf32> to vector<8x32xf32>
    %119 = vector.extract_strided_slice %107 {offsets = [0, 64], sizes = [8, 32], strides = [1, 1]} : vector<8x128xf32> to vector<8x32xf32>
    %120 = arith.mulf %116, %119 : vector<8x32xf32>
    %121 = arith.addf %118, %120 : vector<8x32xf32>
    %122 = math.tanh %121 : vector<8x32xf32>
    %cst_27 = arith.constant 1.000000e+00 : f32
    %123 = vector.broadcast %cst_27 : f32 to vector<8x32xf32>
    %124 = arith.subf %123, %117 : vector<8x32xf32>
    %125 = arith.mulf %124, %122 : vector<8x32xf32>
    %126 = arith.mulf %117, %100 : vector<8x32xf32>
    %127 = arith.addf %125, %126 : vector<8x32xf32>
    %c24 = arith.constant 24 : index
    %c0_28 = arith.constant 0 : index
    %128 = vector.load %arg3[%c24, %c0_28] : memref<128x32xf32, #tpu.memory_space<vmem>>, vector<8x32xf32>
    tpu.vector_store %arg3[%c24, %c0_28], %127 {strides = array<i32>} : memref<128x32xf32, #tpu.memory_space<vmem>>, vector<8x32xf32>,
    %129 = vector.extract_strided_slice %19 {offsets = [0, 4], sizes = [8, 1], strides = [1, 1]} : vector<8x16xf32> to vector<8x1xf32>
    %130 = vector.broadcast %129 : vector<8x1xf32> to vector<8x128xf32>
    %131 = arith.mulf %130, %10 : vector<8x128xf32>
    %132 = arith.addf %131, %12 : vector<8x128xf32>
    %cst_29 = arith.constant dense<0.000000e+00> : vector<8x128xf32>
    %133 = tpu.matmul %127, %0, %cst_29 {dimension_numbers = #tpu.dot_dimension_numbers<[1], [0], [0], [1], [0, 0, 1, 1], [], []>} : vector<8x32xf32>, vector<32x128xf32>, vector<8x128xf32> -> vector<8x128xf32>
    %134 = arith.addf %133, %14 : vector<8x128xf32>
    %135 = vector.extract_strided_slice %132 {offsets = [0, 0], sizes = [8, 64], strides = [1, 1]} : vector<8x128xf32> to vector<8x64xf32>
    %136 = vector.extract_strided_slice %134 {offsets = [0, 0], sizes = [8, 64], strides = [1, 1]} : vector<8x128xf32> to vector<8x64xf32>
    %137 = arith.addf %135, %136 : vector<8x64xf32>
    %138 = arith.negf %137 : vector<8x64xf32>
    %139 = math.exp %138 : vector<8x64xf32>
    %cst_30 = arith.constant 1.000000e+00 : f32
    %140 = vector.broadcast %cst_30 : f32 to vector<8x64xf32>
    %141 = arith.addf %140, %139 : vector<8x64xf32>
    %142 = arith.divf %140, %141 : vector<8x64xf32>
    %143 = vector.extract_strided_slice %142 {offsets = [0, 0], sizes = [8, 32], strides = [1, 1]} : vector<8x64xf32> to vector<8x32xf32>
    %144 = vector.extract_strided_slice %142 {offsets = [0, 32], sizes = [8, 32], strides = [1, 1]} : vector<8x64xf32> to vector<8x32xf32>
    %145 = vector.extract_strided_slice %132 {offsets = [0, 64], sizes = [8, 32], strides = [1, 1]} : vector<8x128xf32> to vector<8x32xf32>
    %146 = vector.extract_strided_slice %134 {offsets = [0, 64], sizes = [8, 32], strides = [1, 1]} : vector<8x128xf32> to vector<8x32xf32>
    %147 = arith.mulf %143, %146 : vector<8x32xf32>
    %148 = arith.addf %145, %147 : vector<8x32xf32>
    %149 = math.tanh %148 : vector<8x32xf32>
    %cst_31 = arith.constant 1.000000e+00 : f32
    %150 = vector.broadcast %cst_31 : f32 to vector<8x32xf32>
    %151 = arith.subf %150, %144 : vector<8x32xf32>
    %152 = arith.mulf %151, %149 : vector<8x32xf32>
    %153 = arith.mulf %144, %127 : vector<8x32xf32>
    %154 = arith.addf %152, %153 : vector<8x32xf32>
    %c32_32 = arith.constant 32 : index
    %c0_33 = arith.constant 0 : index
    %155 = vector.load %arg3[%c32_32, %c0_33] : memref<128x32xf32, #tpu.memory_space<vmem>>, vector<8x32xf32>
    tpu.vector_store %arg3[%c32_32, %c0_33], %154 {strides = array<i32>} : memref<128x32xf32, #tpu.memory_space<vmem>>, vector<8x32xf32>,
    %156 = vector.extract_strided_slice %19 {offsets = [0, 5], sizes = [8, 1], strides = [1, 1]} : vector<8x16xf32> to vector<8x1xf32>
    %157 = vector.broadcast %156 : vector<8x1xf32> to vector<8x128xf32>
    %158 = arith.mulf %157, %10 : vector<8x128xf32>
    %159 = arith.addf %158, %12 : vector<8x128xf32>
    %cst_34 = arith.constant dense<0.000000e+00> : vector<8x128xf32>
    %160 = tpu.matmul %154, %0, %cst_34 {dimension_numbers = #tpu.dot_dimension_numbers<[1], [0], [0], [1], [0, 0, 1, 1], [], []>} : vector<8x32xf32>, vector<32x128xf32>, vector<8x128xf32> -> vector<8x128xf32>
    %161 = arith.addf %160, %14 : vector<8x128xf32>
    %162 = vector.extract_strided_slice %159 {offsets = [0, 0], sizes = [8, 64], strides = [1, 1]} : vector<8x128xf32> to vector<8x64xf32>
    %163 = vector.extract_strided_slice %161 {offsets = [0, 0], sizes = [8, 64], strides = [1, 1]} : vector<8x128xf32> to vector<8x64xf32>
    %164 = arith.addf %162, %163 : vector<8x64xf32>
    %165 = arith.negf %164 : vector<8x64xf32>
    %166 = math.exp %165 : vector<8x64xf32>
    %cst_35 = arith.constant 1.000000e+00 : f32
    %167 = vector.broadcast %cst_35 : f32 to vector<8x64xf32>
    %168 = arith.addf %167, %166 : vector<8x64xf32>
    %169 = arith.divf %167, %168 : vector<8x64xf32>
    %170 = vector.extract_strided_slice %169 {offsets = [0, 0], sizes = [8, 32], strides = [1, 1]} : vector<8x64xf32> to vector<8x32xf32>
    %171 = vector.extract_strided_slice %169 {offsets = [0, 32], sizes = [8, 32], strides = [1, 1]} : vector<8x64xf32> to vector<8x32xf32>
    %172 = vector.extract_strided_slice %159 {offsets = [0, 64], sizes = [8, 32], strides = [1, 1]} : vector<8x128xf32> to vector<8x32xf32>
    %173 = vector.extract_strided_slice %161 {offsets = [0, 64], sizes = [8, 32], strides = [1, 1]} : vector<8x128xf32> to vector<8x32xf32>
    %174 = arith.mulf %170, %173 : vector<8x32xf32>
    %175 = arith.addf %172, %174 : vector<8x32xf32>
    %176 = math.tanh %175 : vector<8x32xf32>
    %cst_36 = arith.constant 1.000000e+00 : f32
    %177 = vector.broadcast %cst_36 : f32 to vector<8x32xf32>
    %178 = arith.subf %177, %171 : vector<8x32xf32>
    %179 = arith.mulf %178, %176 : vector<8x32xf32>
    %180 = arith.mulf %171, %154 : vector<8x32xf32>
    %181 = arith.addf %179, %180 : vector<8x32xf32>
    %c40 = arith.constant 40 : index
    %c0_37 = arith.constant 0 : index
    %182 = vector.load %arg3[%c40, %c0_37] : memref<128x32xf32, #tpu.memory_space<vmem>>, vector<8x32xf32>
    tpu.vector_store %arg3[%c40, %c0_37], %181 {strides = array<i32>} : memref<128x32xf32, #tpu.memory_space<vmem>>, vector<8x32xf32>,
    %183 = vector.extract_strided_slice %19 {offsets = [0, 6], sizes = [8, 1], strides = [1, 1]} : vector<8x16xf32> to vector<8x1xf32>
    %184 = vector.broadcast %183 : vector<8x1xf32> to vector<8x128xf32>
    %185 = arith.mulf %184, %10 : vector<8x128xf32>
    %186 = arith.addf %185, %12 : vector<8x128xf32>
    %cst_38 = arith.constant dense<0.000000e+00> : vector<8x128xf32>
    %187 = tpu.matmul %181, %0, %cst_38 {dimension_numbers = #tpu.dot_dimension_numbers<[1], [0], [0], [1], [0, 0, 1, 1], [], []>} : vector<8x32xf32>, vector<32x128xf32>, vector<8x128xf32> -> vector<8x128xf32>
    %188 = arith.addf %187, %14 : vector<8x128xf32>
    %189 = vector.extract_strided_slice %186 {offsets = [0, 0], sizes = [8, 64], strides = [1, 1]} : vector<8x128xf32> to vector<8x64xf32>
    %190 = vector.extract_strided_slice %188 {offsets = [0, 0], sizes = [8, 64], strides = [1, 1]} : vector<8x128xf32> to vector<8x64xf32>
    %191 = arith.addf %189, %190 : vector<8x64xf32>
    %192 = arith.negf %191 : vector<8x64xf32>
    %193 = math.exp %192 : vector<8x64xf32>
    %cst_39 = arith.constant 1.000000e+00 : f32
    %194 = vector.broadcast %cst_39 : f32 to vector<8x64xf32>
    %195 = arith.addf %194, %193 : vector<8x64xf32>
    %196 = arith.divf %194, %195 : vector<8x64xf32>
    %197 = vector.extract_strided_slice %196 {offsets = [0, 0], sizes = [8, 32], strides = [1, 1]} : vector<8x64xf32> to vector<8x32xf32>
    %198 = vector.extract_strided_slice %196 {offsets = [0, 32], sizes = [8, 32], strides = [1, 1]} : vector<8x64xf32> to vector<8x32xf32>
    %199 = vector.extract_strided_slice %186 {offsets = [0, 64], sizes = [8, 32], strides = [1, 1]} : vector<8x128xf32> to vector<8x32xf32>
    %200 = vector.extract_strided_slice %188 {offsets = [0, 64], sizes = [8, 32], strides = [1, 1]} : vector<8x128xf32> to vector<8x32xf32>
    %201 = arith.mulf %197, %200 : vector<8x32xf32>
    %202 = arith.addf %199, %201 : vector<8x32xf32>
    %203 = math.tanh %202 : vector<8x32xf32>
    %cst_40 = arith.constant 1.000000e+00 : f32
    %204 = vector.broadcast %cst_40 : f32 to vector<8x32xf32>
    %205 = arith.subf %204, %198 : vector<8x32xf32>
    %206 = arith.mulf %205, %203 : vector<8x32xf32>
    %207 = arith.mulf %198, %181 : vector<8x32xf32>
    %208 = arith.addf %206, %207 : vector<8x32xf32>
    %c48 = arith.constant 48 : index
    %c0_41 = arith.constant 0 : index
    %209 = vector.load %arg3[%c48, %c0_41] : memref<128x32xf32, #tpu.memory_space<vmem>>, vector<8x32xf32>
    tpu.vector_store %arg3[%c48, %c0_41], %208 {strides = array<i32>} : memref<128x32xf32, #tpu.memory_space<vmem>>, vector<8x32xf32>,
    %210 = vector.extract_strided_slice %19 {offsets = [0, 7], sizes = [8, 1], strides = [1, 1]} : vector<8x16xf32> to vector<8x1xf32>
    %211 = vector.broadcast %210 : vector<8x1xf32> to vector<8x128xf32>
    %212 = arith.mulf %211, %10 : vector<8x128xf32>
    %213 = arith.addf %212, %12 : vector<8x128xf32>
    %cst_42 = arith.constant dense<0.000000e+00> : vector<8x128xf32>
    %214 = tpu.matmul %208, %0, %cst_42 {dimension_numbers = #tpu.dot_dimension_numbers<[1], [0], [0], [1], [0, 0, 1, 1], [], []>} : vector<8x32xf32>, vector<32x128xf32>, vector<8x128xf32> -> vector<8x128xf32>
    %215 = arith.addf %214, %14 : vector<8x128xf32>
    %216 = vector.extract_strided_slice %213 {offsets = [0, 0], sizes = [8, 64], strides = [1, 1]} : vector<8x128xf32> to vector<8x64xf32>
    %217 = vector.extract_strided_slice %215 {offsets = [0, 0], sizes = [8, 64], strides = [1, 1]} : vector<8x128xf32> to vector<8x64xf32>
    %218 = arith.addf %216, %217 : vector<8x64xf32>
    %219 = arith.negf %218 : vector<8x64xf32>
    %220 = math.exp %219 : vector<8x64xf32>
    %cst_43 = arith.constant 1.000000e+00 : f32
    %221 = vector.broadcast %cst_43 : f32 to vector<8x64xf32>
    %222 = arith.addf %221, %220 : vector<8x64xf32>
    %223 = arith.divf %221, %222 : vector<8x64xf32>
    %224 = vector.extract_strided_slice %223 {offsets = [0, 0], sizes = [8, 32], strides = [1, 1]} : vector<8x64xf32> to vector<8x32xf32>
    %225 = vector.extract_strided_slice %223 {offsets = [0, 32], sizes = [8, 32], strides = [1, 1]} : vector<8x64xf32> to vector<8x32xf32>
    %226 = vector.extract_strided_slice %213 {offsets = [0, 64], sizes = [8, 32], strides = [1, 1]} : vector<8x128xf32> to vector<8x32xf32>
    %227 = vector.extract_strided_slice %215 {offsets = [0, 64], sizes = [8, 32], strides = [1, 1]} : vector<8x128xf32> to vector<8x32xf32>
    %228 = arith.mulf %224, %227 : vector<8x32xf32>
    %229 = arith.addf %226, %228 : vector<8x32xf32>
    %230 = math.tanh %229 : vector<8x32xf32>
    %cst_44 = arith.constant 1.000000e+00 : f32
    %231 = vector.broadcast %cst_44 : f32 to vector<8x32xf32>
    %232 = arith.subf %231, %225 : vector<8x32xf32>
    %233 = arith.mulf %232, %230 : vector<8x32xf32>
    %234 = arith.mulf %225, %208 : vector<8x32xf32>
    %235 = arith.addf %233, %234 : vector<8x32xf32>
    %c56 = arith.constant 56 : index
    %c0_45 = arith.constant 0 : index
    %236 = vector.load %arg3[%c56, %c0_45] : memref<128x32xf32, #tpu.memory_space<vmem>>, vector<8x32xf32>
    tpu.vector_store %arg3[%c56, %c0_45], %235 {strides = array<i32>} : memref<128x32xf32, #tpu.memory_space<vmem>>, vector<8x32xf32>,
    %237 = vector.extract_strided_slice %19 {offsets = [0, 8], sizes = [8, 1], strides = [1, 1]} : vector<8x16xf32> to vector<8x1xf32>
    %238 = vector.broadcast %237 : vector<8x1xf32> to vector<8x128xf32>
    %239 = arith.mulf %238, %10 : vector<8x128xf32>
    %240 = arith.addf %239, %12 : vector<8x128xf32>
    %cst_46 = arith.constant dense<0.000000e+00> : vector<8x128xf32>
    %241 = tpu.matmul %235, %0, %cst_46 {dimension_numbers = #tpu.dot_dimension_numbers<[1], [0], [0], [1], [0, 0, 1, 1], [], []>} : vector<8x32xf32>, vector<32x128xf32>, vector<8x128xf32> -> vector<8x128xf32>
    %242 = arith.addf %241, %14 : vector<8x128xf32>
    %243 = vector.extract_strided_slice %240 {offsets = [0, 0], sizes = [8, 64], strides = [1, 1]} : vector<8x128xf32> to vector<8x64xf32>
    %244 = vector.extract_strided_slice %242 {offsets = [0, 0], sizes = [8, 64], strides = [1, 1]} : vector<8x128xf32> to vector<8x64xf32>
    %245 = arith.addf %243, %244 : vector<8x64xf32>
    %246 = arith.negf %245 : vector<8x64xf32>
    %247 = math.exp %246 : vector<8x64xf32>
    %cst_47 = arith.constant 1.000000e+00 : f32
    %248 = vector.broadcast %cst_47 : f32 to vector<8x64xf32>
    %249 = arith.addf %248, %247 : vector<8x64xf32>
    %250 = arith.divf %248, %249 : vector<8x64xf32>
    %251 = vector.extract_strided_slice %250 {offsets = [0, 0], sizes = [8, 32], strides = [1, 1]} : vector<8x64xf32> to vector<8x32xf32>
    %252 = vector.extract_strided_slice %250 {offsets = [0, 32], sizes = [8, 32], strides = [1, 1]} : vector<8x64xf32> to vector<8x32xf32>
    %253 = vector.extract_strided_slice %240 {offsets = [0, 64], sizes = [8, 32], strides = [1, 1]} : vector<8x128xf32> to vector<8x32xf32>
    %254 = vector.extract_strided_slice %242 {offsets = [0, 64], sizes = [8, 32], strides = [1, 1]} : vector<8x128xf32> to vector<8x32xf32>
    %255 = arith.mulf %251, %254 : vector<8x32xf32>
    %256 = arith.addf %253, %255 : vector<8x32xf32>
    %257 = math.tanh %256 : vector<8x32xf32>
    %cst_48 = arith.constant 1.000000e+00 : f32
    %258 = vector.broadcast %cst_48 : f32 to vector<8x32xf32>
    %259 = arith.subf %258, %252 : vector<8x32xf32>
    %260 = arith.mulf %259, %257 : vector<8x32xf32>
    %261 = arith.mulf %252, %235 : vector<8x32xf32>
    %262 = arith.addf %260, %261 : vector<8x32xf32>
    %c64_49 = arith.constant 64 : index
    %c0_50 = arith.constant 0 : index
    %263 = vector.load %arg3[%c64_49, %c0_50] : memref<128x32xf32, #tpu.memory_space<vmem>>, vector<8x32xf32>
    tpu.vector_store %arg3[%c64_49, %c0_50], %262 {strides = array<i32>} : memref<128x32xf32, #tpu.memory_space<vmem>>, vector<8x32xf32>,
    %264 = vector.extract_strided_slice %19 {offsets = [0, 9], sizes = [8, 1], strides = [1, 1]} : vector<8x16xf32> to vector<8x1xf32>
    %265 = vector.broadcast %264 : vector<8x1xf32> to vector<8x128xf32>
    %266 = arith.mulf %265, %10 : vector<8x128xf32>
    %267 = arith.addf %266, %12 : vector<8x128xf32>
    %cst_51 = arith.constant dense<0.000000e+00> : vector<8x128xf32>
    %268 = tpu.matmul %262, %0, %cst_51 {dimension_numbers = #tpu.dot_dimension_numbers<[1], [0], [0], [1], [0, 0, 1, 1], [], []>} : vector<8x32xf32>, vector<32x128xf32>, vector<8x128xf32> -> vector<8x128xf32>
    %269 = arith.addf %268, %14 : vector<8x128xf32>
    %270 = vector.extract_strided_slice %267 {offsets = [0, 0], sizes = [8, 64], strides = [1, 1]} : vector<8x128xf32> to vector<8x64xf32>
    %271 = vector.extract_strided_slice %269 {offsets = [0, 0], sizes = [8, 64], strides = [1, 1]} : vector<8x128xf32> to vector<8x64xf32>
    %272 = arith.addf %270, %271 : vector<8x64xf32>
    %273 = arith.negf %272 : vector<8x64xf32>
    %274 = math.exp %273 : vector<8x64xf32>
    %cst_52 = arith.constant 1.000000e+00 : f32
    %275 = vector.broadcast %cst_52 : f32 to vector<8x64xf32>
    %276 = arith.addf %275, %274 : vector<8x64xf32>
    %277 = arith.divf %275, %276 : vector<8x64xf32>
    %278 = vector.extract_strided_slice %277 {offsets = [0, 0], sizes = [8, 32], strides = [1, 1]} : vector<8x64xf32> to vector<8x32xf32>
    %279 = vector.extract_strided_slice %277 {offsets = [0, 32], sizes = [8, 32], strides = [1, 1]} : vector<8x64xf32> to vector<8x32xf32>
    %280 = vector.extract_strided_slice %267 {offsets = [0, 64], sizes = [8, 32], strides = [1, 1]} : vector<8x128xf32> to vector<8x32xf32>
    %281 = vector.extract_strided_slice %269 {offsets = [0, 64], sizes = [8, 32], strides = [1, 1]} : vector<8x128xf32> to vector<8x32xf32>
    %282 = arith.mulf %278, %281 : vector<8x32xf32>
    %283 = arith.addf %280, %282 : vector<8x32xf32>
    %284 = math.tanh %283 : vector<8x32xf32>
    %cst_53 = arith.constant 1.000000e+00 : f32
    %285 = vector.broadcast %cst_53 : f32 to vector<8x32xf32>
    %286 = arith.subf %285, %279 : vector<8x32xf32>
    %287 = arith.mulf %286, %284 : vector<8x32xf32>
    %288 = arith.mulf %279, %262 : vector<8x32xf32>
    %289 = arith.addf %287, %288 : vector<8x32xf32>
    %c72 = arith.constant 72 : index
    %c0_54 = arith.constant 0 : index
    %290 = vector.load %arg3[%c72, %c0_54] : memref<128x32xf32, #tpu.memory_space<vmem>>, vector<8x32xf32>
    tpu.vector_store %arg3[%c72, %c0_54], %289 {strides = array<i32>} : memref<128x32xf32, #tpu.memory_space<vmem>>, vector<8x32xf32>,
    %291 = vector.extract_strided_slice %19 {offsets = [0, 10], sizes = [8, 1], strides = [1, 1]} : vector<8x16xf32> to vector<8x1xf32>
    %292 = vector.broadcast %291 : vector<8x1xf32> to vector<8x128xf32>
    %293 = arith.mulf %292, %10 : vector<8x128xf32>
    %294 = arith.addf %293, %12 : vector<8x128xf32>
    %cst_55 = arith.constant dense<0.000000e+00> : vector<8x128xf32>
    %295 = tpu.matmul %289, %0, %cst_55 {dimension_numbers = #tpu.dot_dimension_numbers<[1], [0], [0], [1], [0, 0, 1, 1], [], []>} : vector<8x32xf32>, vector<32x128xf32>, vector<8x128xf32> -> vector<8x128xf32>
    %296 = arith.addf %295, %14 : vector<8x128xf32>
    %297 = vector.extract_strided_slice %294 {offsets = [0, 0], sizes = [8, 64], strides = [1, 1]} : vector<8x128xf32> to vector<8x64xf32>
    %298 = vector.extract_strided_slice %296 {offsets = [0, 0], sizes = [8, 64], strides = [1, 1]} : vector<8x128xf32> to vector<8x64xf32>
    %299 = arith.addf %297, %298 : vector<8x64xf32>
    %300 = arith.negf %299 : vector<8x64xf32>
    %301 = math.exp %300 : vector<8x64xf32>
    %cst_56 = arith.constant 1.000000e+00 : f32
    %302 = vector.broadcast %cst_56 : f32 to vector<8x64xf32>
    %303 = arith.addf %302, %301 : vector<8x64xf32>
    %304 = arith.divf %302, %303 : vector<8x64xf32>
    %305 = vector.extract_strided_slice %304 {offsets = [0, 0], sizes = [8, 32], strides = [1, 1]} : vector<8x64xf32> to vector<8x32xf32>
    %306 = vector.extract_strided_slice %304 {offsets = [0, 32], sizes = [8, 32], strides = [1, 1]} : vector<8x64xf32> to vector<8x32xf32>
    %307 = vector.extract_strided_slice %294 {offsets = [0, 64], sizes = [8, 32], strides = [1, 1]} : vector<8x128xf32> to vector<8x32xf32>
    %308 = vector.extract_strided_slice %296 {offsets = [0, 64], sizes = [8, 32], strides = [1, 1]} : vector<8x128xf32> to vector<8x32xf32>
    %309 = arith.mulf %305, %308 : vector<8x32xf32>
    %310 = arith.addf %307, %309 : vector<8x32xf32>
    %311 = math.tanh %310 : vector<8x32xf32>
    %cst_57 = arith.constant 1.000000e+00 : f32
    %312 = vector.broadcast %cst_57 : f32 to vector<8x32xf32>
    %313 = arith.subf %312, %306 : vector<8x32xf32>
    %314 = arith.mulf %313, %311 : vector<8x32xf32>
    %315 = arith.mulf %306, %289 : vector<8x32xf32>
    %316 = arith.addf %314, %315 : vector<8x32xf32>
    %c80 = arith.constant 80 : index
    %c0_58 = arith.constant 0 : index
    %317 = vector.load %arg3[%c80, %c0_58] : memref<128x32xf32, #tpu.memory_space<vmem>>, vector<8x32xf32>
    tpu.vector_store %arg3[%c80, %c0_58], %316 {strides = array<i32>} : memref<128x32xf32, #tpu.memory_space<vmem>>, vector<8x32xf32>,
    %318 = vector.extract_strided_slice %19 {offsets = [0, 11], sizes = [8, 1], strides = [1, 1]} : vector<8x16xf32> to vector<8x1xf32>
    %319 = vector.broadcast %318 : vector<8x1xf32> to vector<8x128xf32>
    %320 = arith.mulf %319, %10 : vector<8x128xf32>
    %321 = arith.addf %320, %12 : vector<8x128xf32>
    %cst_59 = arith.constant dense<0.000000e+00> : vector<8x128xf32>
    %322 = tpu.matmul %316, %0, %cst_59 {dimension_numbers = #tpu.dot_dimension_numbers<[1], [0], [0], [1], [0, 0, 1, 1], [], []>} : vector<8x32xf32>, vector<32x128xf32>, vector<8x128xf32> -> vector<8x128xf32>
    %323 = arith.addf %322, %14 : vector<8x128xf32>
    %324 = vector.extract_strided_slice %321 {offsets = [0, 0], sizes = [8, 64], strides = [1, 1]} : vector<8x128xf32> to vector<8x64xf32>
    %325 = vector.extract_strided_slice %323 {offsets = [0, 0], sizes = [8, 64], strides = [1, 1]} : vector<8x128xf32> to vector<8x64xf32>
    %326 = arith.addf %324, %325 : vector<8x64xf32>
    %327 = arith.negf %326 : vector<8x64xf32>
    %328 = math.exp %327 : vector<8x64xf32>
    %cst_60 = arith.constant 1.000000e+00 : f32
    %329 = vector.broadcast %cst_60 : f32 to vector<8x64xf32>
    %330 = arith.addf %329, %328 : vector<8x64xf32>
    %331 = arith.divf %329, %330 : vector<8x64xf32>
    %332 = vector.extract_strided_slice %331 {offsets = [0, 0], sizes = [8, 32], strides = [1, 1]} : vector<8x64xf32> to vector<8x32xf32>
    %333 = vector.extract_strided_slice %331 {offsets = [0, 32], sizes = [8, 32], strides = [1, 1]} : vector<8x64xf32> to vector<8x32xf32>
    %334 = vector.extract_strided_slice %321 {offsets = [0, 64], sizes = [8, 32], strides = [1, 1]} : vector<8x128xf32> to vector<8x32xf32>
    %335 = vector.extract_strided_slice %323 {offsets = [0, 64], sizes = [8, 32], strides = [1, 1]} : vector<8x128xf32> to vector<8x32xf32>
    %336 = arith.mulf %332, %335 : vector<8x32xf32>
    %337 = arith.addf %334, %336 : vector<8x32xf32>
    %338 = math.tanh %337 : vector<8x32xf32>
    %cst_61 = arith.constant 1.000000e+00 : f32
    %339 = vector.broadcast %cst_61 : f32 to vector<8x32xf32>
    %340 = arith.subf %339, %333 : vector<8x32xf32>
    %341 = arith.mulf %340, %338 : vector<8x32xf32>
    %342 = arith.mulf %333, %316 : vector<8x32xf32>
    %343 = arith.addf %341, %342 : vector<8x32xf32>
    %c88 = arith.constant 88 : index
    %c0_62 = arith.constant 0 : index
    %344 = vector.load %arg3[%c88, %c0_62] : memref<128x32xf32, #tpu.memory_space<vmem>>, vector<8x32xf32>
    tpu.vector_store %arg3[%c88, %c0_62], %343 {strides = array<i32>} : memref<128x32xf32, #tpu.memory_space<vmem>>, vector<8x32xf32>,
    %345 = vector.extract_strided_slice %19 {offsets = [0, 12], sizes = [8, 1], strides = [1, 1]} : vector<8x16xf32> to vector<8x1xf32>
    %346 = vector.broadcast %345 : vector<8x1xf32> to vector<8x128xf32>
    %347 = arith.mulf %346, %10 : vector<8x128xf32>
    %348 = arith.addf %347, %12 : vector<8x128xf32>
    %cst_63 = arith.constant dense<0.000000e+00> : vector<8x128xf32>
    %349 = tpu.matmul %343, %0, %cst_63 {dimension_numbers = #tpu.dot_dimension_numbers<[1], [0], [0], [1], [0, 0, 1, 1], [], []>} : vector<8x32xf32>, vector<32x128xf32>, vector<8x128xf32> -> vector<8x128xf32>
    %350 = arith.addf %349, %14 : vector<8x128xf32>
    %351 = vector.extract_strided_slice %348 {offsets = [0, 0], sizes = [8, 64], strides = [1, 1]} : vector<8x128xf32> to vector<8x64xf32>
    %352 = vector.extract_strided_slice %350 {offsets = [0, 0], sizes = [8, 64], strides = [1, 1]} : vector<8x128xf32> to vector<8x64xf32>
    %353 = arith.addf %351, %352 : vector<8x64xf32>
    %354 = arith.negf %353 : vector<8x64xf32>
    %355 = math.exp %354 : vector<8x64xf32>
    %cst_64 = arith.constant 1.000000e+00 : f32
    %356 = vector.broadcast %cst_64 : f32 to vector<8x64xf32>
    %357 = arith.addf %356, %355 : vector<8x64xf32>
    %358 = arith.divf %356, %357 : vector<8x64xf32>
    %359 = vector.extract_strided_slice %358 {offsets = [0, 0], sizes = [8, 32], strides = [1, 1]} : vector<8x64xf32> to vector<8x32xf32>
    %360 = vector.extract_strided_slice %358 {offsets = [0, 32], sizes = [8, 32], strides = [1, 1]} : vector<8x64xf32> to vector<8x32xf32>
    %361 = vector.extract_strided_slice %348 {offsets = [0, 64], sizes = [8, 32], strides = [1, 1]} : vector<8x128xf32> to vector<8x32xf32>
    %362 = vector.extract_strided_slice %350 {offsets = [0, 64], sizes = [8, 32], strides = [1, 1]} : vector<8x128xf32> to vector<8x32xf32>
    %363 = arith.mulf %359, %362 : vector<8x32xf32>
    %364 = arith.addf %361, %363 : vector<8x32xf32>
    %365 = math.tanh %364 : vector<8x32xf32>
    %cst_65 = arith.constant 1.000000e+00 : f32
    %366 = vector.broadcast %cst_65 : f32 to vector<8x32xf32>
    %367 = arith.subf %366, %360 : vector<8x32xf32>
    %368 = arith.mulf %367, %365 : vector<8x32xf32>
    %369 = arith.mulf %360, %343 : vector<8x32xf32>
    %370 = arith.addf %368, %369 : vector<8x32xf32>
    %c96_66 = arith.constant 96 : index
    %c0_67 = arith.constant 0 : index
    %371 = vector.load %arg3[%c96_66, %c0_67] : memref<128x32xf32, #tpu.memory_space<vmem>>, vector<8x32xf32>
    tpu.vector_store %arg3[%c96_66, %c0_67], %370 {strides = array<i32>} : memref<128x32xf32, #tpu.memory_space<vmem>>, vector<8x32xf32>,
    %372 = vector.extract_strided_slice %19 {offsets = [0, 13], sizes = [8, 1], strides = [1, 1]} : vector<8x16xf32> to vector<8x1xf32>
    %373 = vector.broadcast %372 : vector<8x1xf32> to vector<8x128xf32>
    %374 = arith.mulf %373, %10 : vector<8x128xf32>
    %375 = arith.addf %374, %12 : vector<8x128xf32>
    %cst_68 = arith.constant dense<0.000000e+00> : vector<8x128xf32>
    %376 = tpu.matmul %370, %0, %cst_68 {dimension_numbers = #tpu.dot_dimension_numbers<[1], [0], [0], [1], [0, 0, 1, 1], [], []>} : vector<8x32xf32>, vector<32x128xf32>, vector<8x128xf32> -> vector<8x128xf32>
    %377 = arith.addf %376, %14 : vector<8x128xf32>
    %378 = vector.extract_strided_slice %375 {offsets = [0, 0], sizes = [8, 64], strides = [1, 1]} : vector<8x128xf32> to vector<8x64xf32>
    %379 = vector.extract_strided_slice %377 {offsets = [0, 0], sizes = [8, 64], strides = [1, 1]} : vector<8x128xf32> to vector<8x64xf32>
    %380 = arith.addf %378, %379 : vector<8x64xf32>
    %381 = arith.negf %380 : vector<8x64xf32>
    %382 = math.exp %381 : vector<8x64xf32>
    %cst_69 = arith.constant 1.000000e+00 : f32
    %383 = vector.broadcast %cst_69 : f32 to vector<8x64xf32>
    %384 = arith.addf %383, %382 : vector<8x64xf32>
    %385 = arith.divf %383, %384 : vector<8x64xf32>
    %386 = vector.extract_strided_slice %385 {offsets = [0, 0], sizes = [8, 32], strides = [1, 1]} : vector<8x64xf32> to vector<8x32xf32>
    %387 = vector.extract_strided_slice %385 {offsets = [0, 32], sizes = [8, 32], strides = [1, 1]} : vector<8x64xf32> to vector<8x32xf32>
    %388 = vector.extract_strided_slice %375 {offsets = [0, 64], sizes = [8, 32], strides = [1, 1]} : vector<8x128xf32> to vector<8x32xf32>
    %389 = vector.extract_strided_slice %377 {offsets = [0, 64], sizes = [8, 32], strides = [1, 1]} : vector<8x128xf32> to vector<8x32xf32>
    %390 = arith.mulf %386, %389 : vector<8x32xf32>
    %391 = arith.addf %388, %390 : vector<8x32xf32>
    %392 = math.tanh %391 : vector<8x32xf32>
    %cst_70 = arith.constant 1.000000e+00 : f32
    %393 = vector.broadcast %cst_70 : f32 to vector<8x32xf32>
    %394 = arith.subf %393, %387 : vector<8x32xf32>
    %395 = arith.mulf %394, %392 : vector<8x32xf32>
    %396 = arith.mulf %387, %370 : vector<8x32xf32>
    %397 = arith.addf %395, %396 : vector<8x32xf32>
    %c104 = arith.constant 104 : index
    %c0_71 = arith.constant 0 : index
    %398 = vector.load %arg3[%c104, %c0_71] : memref<128x32xf32, #tpu.memory_space<vmem>>, vector<8x32xf32>
    tpu.vector_store %arg3[%c104, %c0_71], %397 {strides = array<i32>} : memref<128x32xf32, #tpu.memory_space<vmem>>, vector<8x32xf32>,
    %399 = vector.extract_strided_slice %19 {offsets = [0, 14], sizes = [8, 1], strides = [1, 1]} : vector<8x16xf32> to vector<8x1xf32>
    %400 = vector.broadcast %399 : vector<8x1xf32> to vector<8x128xf32>
    %401 = arith.mulf %400, %10 : vector<8x128xf32>
    %402 = arith.addf %401, %12 : vector<8x128xf32>
    %cst_72 = arith.constant dense<0.000000e+00> : vector<8x128xf32>
    %403 = tpu.matmul %397, %0, %cst_72 {dimension_numbers = #tpu.dot_dimension_numbers<[1], [0], [0], [1], [0, 0, 1, 1], [], []>} : vector<8x32xf32>, vector<32x128xf32>, vector<8x128xf32> -> vector<8x128xf32>
    %404 = arith.addf %403, %14 : vector<8x128xf32>
    %405 = vector.extract_strided_slice %402 {offsets = [0, 0], sizes = [8, 64], strides = [1, 1]} : vector<8x128xf32> to vector<8x64xf32>
    %406 = vector.extract_strided_slice %404 {offsets = [0, 0], sizes = [8, 64], strides = [1, 1]} : vector<8x128xf32> to vector<8x64xf32>
    %407 = arith.addf %405, %406 : vector<8x64xf32>
    %408 = arith.negf %407 : vector<8x64xf32>
    %409 = math.exp %408 : vector<8x64xf32>
    %cst_73 = arith.constant 1.000000e+00 : f32
    %410 = vector.broadcast %cst_73 : f32 to vector<8x64xf32>
    %411 = arith.addf %410, %409 : vector<8x64xf32>
    %412 = arith.divf %410, %411 : vector<8x64xf32>
    %413 = vector.extract_strided_slice %412 {offsets = [0, 0], sizes = [8, 32], strides = [1, 1]} : vector<8x64xf32> to vector<8x32xf32>
    %414 = vector.extract_strided_slice %412 {offsets = [0, 32], sizes = [8, 32], strides = [1, 1]} : vector<8x64xf32> to vector<8x32xf32>
    %415 = vector.extract_strided_slice %402 {offsets = [0, 64], sizes = [8, 32], strides = [1, 1]} : vector<8x128xf32> to vector<8x32xf32>
    %416 = vector.extract_strided_slice %404 {offsets = [0, 64], sizes = [8, 32], strides = [1, 1]} : vector<8x128xf32> to vector<8x32xf32>
    %417 = arith.mulf %413, %416 : vector<8x32xf32>
    %418 = arith.addf %415, %417 : vector<8x32xf32>
    %419 = math.tanh %418 : vector<8x32xf32>
    %cst_74 = arith.constant 1.000000e+00 : f32
    %420 = vector.broadcast %cst_74 : f32 to vector<8x32xf32>
    %421 = arith.subf %420, %414 : vector<8x32xf32>
    %422 = arith.mulf %421, %419 : vector<8x32xf32>
    %423 = arith.mulf %414, %397 : vector<8x32xf32>
    %424 = arith.addf %422, %423 : vector<8x32xf32>
    %c112 = arith.constant 112 : index
    %c0_75 = arith.constant 0 : index
    %425 = vector.load %arg3[%c112, %c0_75] : memref<128x32xf32, #tpu.memory_space<vmem>>, vector<8x32xf32>
    tpu.vector_store %arg3[%c112, %c0_75], %424 {strides = array<i32>} : memref<128x32xf32, #tpu.memory_space<vmem>>, vector<8x32xf32>,
    %426 = vector.extract_strided_slice %19 {offsets = [0, 15], sizes = [8, 1], strides = [1, 1]} : vector<8x16xf32> to vector<8x1xf32>
    %427 = vector.broadcast %426 : vector<8x1xf32> to vector<8x128xf32>
    %428 = arith.mulf %427, %10 : vector<8x128xf32>
    %429 = arith.addf %428, %12 : vector<8x128xf32>
    %cst_76 = arith.constant dense<0.000000e+00> : vector<8x128xf32>
    %430 = tpu.matmul %424, %0, %cst_76 {dimension_numbers = #tpu.dot_dimension_numbers<[1], [0], [0], [1], [0, 0, 1, 1], [], []>} : vector<8x32xf32>, vector<32x128xf32>, vector<8x128xf32> -> vector<8x128xf32>
    %431 = arith.addf %430, %14 : vector<8x128xf32>
    %432 = vector.extract_strided_slice %429 {offsets = [0, 0], sizes = [8, 64], strides = [1, 1]} : vector<8x128xf32> to vector<8x64xf32>
    %433 = vector.extract_strided_slice %431 {offsets = [0, 0], sizes = [8, 64], strides = [1, 1]} : vector<8x128xf32> to vector<8x64xf32>
    %434 = arith.addf %432, %433 : vector<8x64xf32>
    %435 = arith.negf %434 : vector<8x64xf32>
    %436 = math.exp %435 : vector<8x64xf32>
    %cst_77 = arith.constant 1.000000e+00 : f32
    %437 = vector.broadcast %cst_77 : f32 to vector<8x64xf32>
    %438 = arith.addf %437, %436 : vector<8x64xf32>
    %439 = arith.divf %437, %438 : vector<8x64xf32>
    %440 = vector.extract_strided_slice %439 {offsets = [0, 0], sizes = [8, 32], strides = [1, 1]} : vector<8x64xf32> to vector<8x32xf32>
    %441 = vector.extract_strided_slice %439 {offsets = [0, 32], sizes = [8, 32], strides = [1, 1]} : vector<8x64xf32> to vector<8x32xf32>
    %442 = vector.extract_strided_slice %429 {offsets = [0, 64], sizes = [8, 32], strides = [1, 1]} : vector<8x128xf32> to vector<8x32xf32>
    %443 = vector.extract_strided_slice %431 {offsets = [0, 64], sizes = [8, 32], strides = [1, 1]} : vector<8x128xf32> to vector<8x32xf32>
    %444 = arith.mulf %440, %443 : vector<8x32xf32>
    %445 = arith.addf %442, %444 : vector<8x32xf32>
    %446 = math.tanh %445 : vector<8x32xf32>
    %cst_78 = arith.constant 1.000000e+00 : f32
    %447 = vector.broadcast %cst_78 : f32 to vector<8x32xf32>
    %448 = arith.subf %447, %441 : vector<8x32xf32>
    %449 = arith.mulf %448, %446 : vector<8x32xf32>
    %450 = arith.mulf %441, %424 : vector<8x32xf32>
    %451 = arith.addf %449, %450 : vector<8x32xf32>
    %c120 = arith.constant 120 : index
    %c0_79 = arith.constant 0 : index
    %452 = vector.load %arg3[%c120, %c0_79] : memref<128x32xf32, #tpu.memory_space<vmem>>, vector<8x32xf32>
    tpu.vector_store %arg3[%c120, %c0_79], %451 {strides = array<i32>} : memref<128x32xf32, #tpu.memory_space<vmem>>, vector<8x32xf32>,
    %c0_80 = arith.constant 0 : index
    %c0_81 = arith.constant 0 : index
    %453 = vector.load %arg3[%c0_80, %c0_81] : memref<128x32xf32, #tpu.memory_space<vmem>>, vector<128x32xf32>
    %cst_82 = arith.constant dense<0.000000e+00> : vector<128x128xf32>
    %454 = tpu.matmul %453, %1, %cst_82 {dimension_numbers = #tpu.dot_dimension_numbers<[1], [0], [0], [1], [0, 0, 1, 1], [], []>} : vector<128x32xf32>, vector<32x128xf32>, vector<128x128xf32> -> vector<128x128xf32>
    %455 = vector.broadcast %6 : vector<1x128xf32> to vector<128x128xf32>
    %456 = arith.addf %454, %455 : vector<128x128xf32>
    %cst_83 = arith.constant 0.000000e+00 : f32
    %457 = vector.broadcast %cst_83 : f32 to vector<8x32xf32>
    %458 = vector.extract_strided_slice %456 {offsets = [0, 0], sizes = [8, 128], strides = [1, 1]} : vector<128x128xf32> to vector<8x128xf32>
    %cst_84 = arith.constant dense<0.000000e+00> : vector<8x128xf32>
    %459 = tpu.matmul %457, %2, %cst_84 {dimension_numbers = #tpu.dot_dimension_numbers<[1], [0], [0], [1], [0, 0, 1, 1], [], []>} : vector<8x32xf32>, vector<32x128xf32>, vector<8x128xf32> -> vector<8x128xf32>
    %460 = arith.addf %459, %16 : vector<8x128xf32>
    %461 = vector.extract_strided_slice %458 {offsets = [0, 0], sizes = [8, 64], strides = [1, 1]} : vector<8x128xf32> to vector<8x64xf32>
    %462 = vector.extract_strided_slice %460 {offsets = [0, 0], sizes = [8, 64], strides = [1, 1]} : vector<8x128xf32> to vector<8x64xf32>
    %463 = arith.addf %461, %462 : vector<8x64xf32>
    %464 = arith.negf %463 : vector<8x64xf32>
    %465 = math.exp %464 : vector<8x64xf32>
    %cst_85 = arith.constant 1.000000e+00 : f32
    %466 = vector.broadcast %cst_85 : f32 to vector<8x64xf32>
    %467 = arith.addf %466, %465 : vector<8x64xf32>
    %468 = arith.divf %466, %467 : vector<8x64xf32>
    %469 = vector.extract_strided_slice %468 {offsets = [0, 0], sizes = [8, 32], strides = [1, 1]} : vector<8x64xf32> to vector<8x32xf32>
    %470 = vector.extract_strided_slice %468 {offsets = [0, 32], sizes = [8, 32], strides = [1, 1]} : vector<8x64xf32> to vector<8x32xf32>
    %471 = vector.extract_strided_slice %458 {offsets = [0, 64], sizes = [8, 32], strides = [1, 1]} : vector<8x128xf32> to vector<8x32xf32>
    %472 = vector.extract_strided_slice %460 {offsets = [0, 64], sizes = [8, 32], strides = [1, 1]} : vector<8x128xf32> to vector<8x32xf32>
    %473 = arith.mulf %469, %472 : vector<8x32xf32>
    %474 = arith.addf %471, %473 : vector<8x32xf32>
    %475 = math.tanh %474 : vector<8x32xf32>
    %cst_86 = arith.constant 1.000000e+00 : f32
    %476 = vector.broadcast %cst_86 : f32 to vector<8x32xf32>
    %477 = arith.subf %476, %470 : vector<8x32xf32>
    %478 = arith.mulf %477, %475 : vector<8x32xf32>
    %479 = arith.mulf %470, %457 : vector<8x32xf32>
    %480 = arith.addf %478, %479 : vector<8x32xf32>
    %481 = vector.extract_strided_slice %456 {offsets = [8, 0], sizes = [8, 128], strides = [1, 1]} : vector<128x128xf32> to vector<8x128xf32>
    %cst_87 = arith.constant dense<0.000000e+00> : vector<8x128xf32>
    %482 = tpu.matmul %480, %2, %cst_87 {dimension_numbers = #tpu.dot_dimension_numbers<[1], [0], [0], [1], [0, 0, 1, 1], [], []>} : vector<8x32xf32>, vector<32x128xf32>, vector<8x128xf32> -> vector<8x128xf32>
    %483 = arith.addf %482, %16 : vector<8x128xf32>
    %484 = vector.extract_strided_slice %481 {offsets = [0, 0], sizes = [8, 64], strides = [1, 1]} : vector<8x128xf32> to vector<8x64xf32>
    %485 = vector.extract_strided_slice %483 {offsets = [0, 0], sizes = [8, 64], strides = [1, 1]} : vector<8x128xf32> to vector<8x64xf32>
    %486 = arith.addf %484, %485 : vector<8x64xf32>
    %487 = arith.negf %486 : vector<8x64xf32>
    %488 = math.exp %487 : vector<8x64xf32>
    %cst_88 = arith.constant 1.000000e+00 : f32
    %489 = vector.broadcast %cst_88 : f32 to vector<8x64xf32>
    %490 = arith.addf %489, %488 : vector<8x64xf32>
    %491 = arith.divf %489, %490 : vector<8x64xf32>
    %492 = vector.extract_strided_slice %491 {offsets = [0, 0], sizes = [8, 32], strides = [1, 1]} : vector<8x64xf32> to vector<8x32xf32>
    %493 = vector.extract_strided_slice %491 {offsets = [0, 32], sizes = [8, 32], strides = [1, 1]} : vector<8x64xf32> to vector<8x32xf32>
    %494 = vector.extract_strided_slice %481 {offsets = [0, 64], sizes = [8, 32], strides = [1, 1]} : vector<8x128xf32> to vector<8x32xf32>
    %495 = vector.extract_strided_slice %483 {offsets = [0, 64], sizes = [8, 32], strides = [1, 1]} : vector<8x128xf32> to vector<8x32xf32>
    %496 = arith.mulf %492, %495 : vector<8x32xf32>
    %497 = arith.addf %494, %496 : vector<8x32xf32>
    %498 = math.tanh %497 : vector<8x32xf32>
    %cst_89 = arith.constant 1.000000e+00 : f32
    %499 = vector.broadcast %cst_89 : f32 to vector<8x32xf32>
    %500 = arith.subf %499, %493 : vector<8x32xf32>
    %501 = arith.mulf %500, %498 : vector<8x32xf32>
    %502 = arith.mulf %493, %480 : vector<8x32xf32>
    %503 = arith.addf %501, %502 : vector<8x32xf32>
    %504 = vector.extract_strided_slice %456 {offsets = [16, 0], sizes = [8, 128], strides = [1, 1]} : vector<128x128xf32> to vector<8x128xf32>
    %cst_90 = arith.constant dense<0.000000e+00> : vector<8x128xf32>
    %505 = tpu.matmul %503, %2, %cst_90 {dimension_numbers = #tpu.dot_dimension_numbers<[1], [0], [0], [1], [0, 0, 1, 1], [], []>} : vector<8x32xf32>, vector<32x128xf32>, vector<8x128xf32> -> vector<8x128xf32>
    %506 = arith.addf %505, %16 : vector<8x128xf32>
    %507 = vector.extract_strided_slice %504 {offsets = [0, 0], sizes = [8, 64], strides = [1, 1]} : vector<8x128xf32> to vector<8x64xf32>
    %508 = vector.extract_strided_slice %506 {offsets = [0, 0], sizes = [8, 64], strides = [1, 1]} : vector<8x128xf32> to vector<8x64xf32>
    %509 = arith.addf %507, %508 : vector<8x64xf32>
    %510 = arith.negf %509 : vector<8x64xf32>
    %511 = math.exp %510 : vector<8x64xf32>
    %cst_91 = arith.constant 1.000000e+00 : f32
    %512 = vector.broadcast %cst_91 : f32 to vector<8x64xf32>
    %513 = arith.addf %512, %511 : vector<8x64xf32>
    %514 = arith.divf %512, %513 : vector<8x64xf32>
    %515 = vector.extract_strided_slice %514 {offsets = [0, 0], sizes = [8, 32], strides = [1, 1]} : vector<8x64xf32> to vector<8x32xf32>
    %516 = vector.extract_strided_slice %514 {offsets = [0, 32], sizes = [8, 32], strides = [1, 1]} : vector<8x64xf32> to vector<8x32xf32>
    %517 = vector.extract_strided_slice %504 {offsets = [0, 64], sizes = [8, 32], strides = [1, 1]} : vector<8x128xf32> to vector<8x32xf32>
    %518 = vector.extract_strided_slice %506 {offsets = [0, 64], sizes = [8, 32], strides = [1, 1]} : vector<8x128xf32> to vector<8x32xf32>
    %519 = arith.mulf %515, %518 : vector<8x32xf32>
    %520 = arith.addf %517, %519 : vector<8x32xf32>
    %521 = math.tanh %520 : vector<8x32xf32>
    %cst_92 = arith.constant 1.000000e+00 : f32
    %522 = vector.broadcast %cst_92 : f32 to vector<8x32xf32>
    %523 = arith.subf %522, %516 : vector<8x32xf32>
    %524 = arith.mulf %523, %521 : vector<8x32xf32>
    %525 = arith.mulf %516, %503 : vector<8x32xf32>
    %526 = arith.addf %524, %525 : vector<8x32xf32>
    %527 = vector.extract_strided_slice %456 {offsets = [24, 0], sizes = [8, 128], strides = [1, 1]} : vector<128x128xf32> to vector<8x128xf32>
    %cst_93 = arith.constant dense<0.000000e+00> : vector<8x128xf32>
    %528 = tpu.matmul %526, %2, %cst_93 {dimension_numbers = #tpu.dot_dimension_numbers<[1], [0], [0], [1], [0, 0, 1, 1], [], []>} : vector<8x32xf32>, vector<32x128xf32>, vector<8x128xf32> -> vector<8x128xf32>
    %529 = arith.addf %528, %16 : vector<8x128xf32>
    %530 = vector.extract_strided_slice %527 {offsets = [0, 0], sizes = [8, 64], strides = [1, 1]} : vector<8x128xf32> to vector<8x64xf32>
    %531 = vector.extract_strided_slice %529 {offsets = [0, 0], sizes = [8, 64], strides = [1, 1]} : vector<8x128xf32> to vector<8x64xf32>
    %532 = arith.addf %530, %531 : vector<8x64xf32>
    %533 = arith.negf %532 : vector<8x64xf32>
    %534 = math.exp %533 : vector<8x64xf32>
    %cst_94 = arith.constant 1.000000e+00 : f32
    %535 = vector.broadcast %cst_94 : f32 to vector<8x64xf32>
    %536 = arith.addf %535, %534 : vector<8x64xf32>
    %537 = arith.divf %535, %536 : vector<8x64xf32>
    %538 = vector.extract_strided_slice %537 {offsets = [0, 0], sizes = [8, 32], strides = [1, 1]} : vector<8x64xf32> to vector<8x32xf32>
    %539 = vector.extract_strided_slice %537 {offsets = [0, 32], sizes = [8, 32], strides = [1, 1]} : vector<8x64xf32> to vector<8x32xf32>
    %540 = vector.extract_strided_slice %527 {offsets = [0, 64], sizes = [8, 32], strides = [1, 1]} : vector<8x128xf32> to vector<8x32xf32>
    %541 = vector.extract_strided_slice %529 {offsets = [0, 64], sizes = [8, 32], strides = [1, 1]} : vector<8x128xf32> to vector<8x32xf32>
    %542 = arith.mulf %538, %541 : vector<8x32xf32>
    %543 = arith.addf %540, %542 : vector<8x32xf32>
    %544 = math.tanh %543 : vector<8x32xf32>
    %cst_95 = arith.constant 1.000000e+00 : f32
    %545 = vector.broadcast %cst_95 : f32 to vector<8x32xf32>
    %546 = arith.subf %545, %539 : vector<8x32xf32>
    %547 = arith.mulf %546, %544 : vector<8x32xf32>
    %548 = arith.mulf %539, %526 : vector<8x32xf32>
    %549 = arith.addf %547, %548 : vector<8x32xf32>
    %550 = vector.extract_strided_slice %456 {offsets = [32, 0], sizes = [8, 128], strides = [1, 1]} : vector<128x128xf32> to vector<8x128xf32>
    %cst_96 = arith.constant dense<0.000000e+00> : vector<8x128xf32>
    %551 = tpu.matmul %549, %2, %cst_96 {dimension_numbers = #tpu.dot_dimension_numbers<[1], [0], [0], [1], [0, 0, 1, 1], [], []>} : vector<8x32xf32>, vector<32x128xf32>, vector<8x128xf32> -> vector<8x128xf32>
    %552 = arith.addf %551, %16 : vector<8x128xf32>
    %553 = vector.extract_strided_slice %550 {offsets = [0, 0], sizes = [8, 64], strides = [1, 1]} : vector<8x128xf32> to vector<8x64xf32>
    %554 = vector.extract_strided_slice %552 {offsets = [0, 0], sizes = [8, 64], strides = [1, 1]} : vector<8x128xf32> to vector<8x64xf32>
    %555 = arith.addf %553, %554 : vector<8x64xf32>
    %556 = arith.negf %555 : vector<8x64xf32>
    %557 = math.exp %556 : vector<8x64xf32>
    %cst_97 = arith.constant 1.000000e+00 : f32
    %558 = vector.broadcast %cst_97 : f32 to vector<8x64xf32>
    %559 = arith.addf %558, %557 : vector<8x64xf32>
    %560 = arith.divf %558, %559 : vector<8x64xf32>
    %561 = vector.extract_strided_slice %560 {offsets = [0, 0], sizes = [8, 32], strides = [1, 1]} : vector<8x64xf32> to vector<8x32xf32>
    %562 = vector.extract_strided_slice %560 {offsets = [0, 32], sizes = [8, 32], strides = [1, 1]} : vector<8x64xf32> to vector<8x32xf32>
    %563 = vector.extract_strided_slice %550 {offsets = [0, 64], sizes = [8, 32], strides = [1, 1]} : vector<8x128xf32> to vector<8x32xf32>
    %564 = vector.extract_strided_slice %552 {offsets = [0, 64], sizes = [8, 32], strides = [1, 1]} : vector<8x128xf32> to vector<8x32xf32>
    %565 = arith.mulf %561, %564 : vector<8x32xf32>
    %566 = arith.addf %563, %565 : vector<8x32xf32>
    %567 = math.tanh %566 : vector<8x32xf32>
    %cst_98 = arith.constant 1.000000e+00 : f32
    %568 = vector.broadcast %cst_98 : f32 to vector<8x32xf32>
    %569 = arith.subf %568, %562 : vector<8x32xf32>
    %570 = arith.mulf %569, %567 : vector<8x32xf32>
    %571 = arith.mulf %562, %549 : vector<8x32xf32>
    %572 = arith.addf %570, %571 : vector<8x32xf32>
    %573 = vector.extract_strided_slice %456 {offsets = [40, 0], sizes = [8, 128], strides = [1, 1]} : vector<128x128xf32> to vector<8x128xf32>
    %cst_99 = arith.constant dense<0.000000e+00> : vector<8x128xf32>
    %574 = tpu.matmul %572, %2, %cst_99 {dimension_numbers = #tpu.dot_dimension_numbers<[1], [0], [0], [1], [0, 0, 1, 1], [], []>} : vector<8x32xf32>, vector<32x128xf32>, vector<8x128xf32> -> vector<8x128xf32>
    %575 = arith.addf %574, %16 : vector<8x128xf32>
    %576 = vector.extract_strided_slice %573 {offsets = [0, 0], sizes = [8, 64], strides = [1, 1]} : vector<8x128xf32> to vector<8x64xf32>
    %577 = vector.extract_strided_slice %575 {offsets = [0, 0], sizes = [8, 64], strides = [1, 1]} : vector<8x128xf32> to vector<8x64xf32>
    %578 = arith.addf %576, %577 : vector<8x64xf32>
    %579 = arith.negf %578 : vector<8x64xf32>
    %580 = math.exp %579 : vector<8x64xf32>
    %cst_100 = arith.constant 1.000000e+00 : f32
    %581 = vector.broadcast %cst_100 : f32 to vector<8x64xf32>
    %582 = arith.addf %581, %580 : vector<8x64xf32>
    %583 = arith.divf %581, %582 : vector<8x64xf32>
    %584 = vector.extract_strided_slice %583 {offsets = [0, 0], sizes = [8, 32], strides = [1, 1]} : vector<8x64xf32> to vector<8x32xf32>
    %585 = vector.extract_strided_slice %583 {offsets = [0, 32], sizes = [8, 32], strides = [1, 1]} : vector<8x64xf32> to vector<8x32xf32>
    %586 = vector.extract_strided_slice %573 {offsets = [0, 64], sizes = [8, 32], strides = [1, 1]} : vector<8x128xf32> to vector<8x32xf32>
    %587 = vector.extract_strided_slice %575 {offsets = [0, 64], sizes = [8, 32], strides = [1, 1]} : vector<8x128xf32> to vector<8x32xf32>
    %588 = arith.mulf %584, %587 : vector<8x32xf32>
    %589 = arith.addf %586, %588 : vector<8x32xf32>
    %590 = math.tanh %589 : vector<8x32xf32>
    %cst_101 = arith.constant 1.000000e+00 : f32
    %591 = vector.broadcast %cst_101 : f32 to vector<8x32xf32>
    %592 = arith.subf %591, %585 : vector<8x32xf32>
    %593 = arith.mulf %592, %590 : vector<8x32xf32>
    %594 = arith.mulf %585, %572 : vector<8x32xf32>
    %595 = arith.addf %593, %594 : vector<8x32xf32>
    %596 = vector.extract_strided_slice %456 {offsets = [48, 0], sizes = [8, 128], strides = [1, 1]} : vector<128x128xf32> to vector<8x128xf32>
    %cst_102 = arith.constant dense<0.000000e+00> : vector<8x128xf32>
    %597 = tpu.matmul %595, %2, %cst_102 {dimension_numbers = #tpu.dot_dimension_numbers<[1], [0], [0], [1], [0, 0, 1, 1], [], []>} : vector<8x32xf32>, vector<32x128xf32>, vector<8x128xf32> -> vector<8x128xf32>
    %598 = arith.addf %597, %16 : vector<8x128xf32>
    %599 = vector.extract_strided_slice %596 {offsets = [0, 0], sizes = [8, 64], strides = [1, 1]} : vector<8x128xf32> to vector<8x64xf32>
    %600 = vector.extract_strided_slice %598 {offsets = [0, 0], sizes = [8, 64], strides = [1, 1]} : vector<8x128xf32> to vector<8x64xf32>
    %601 = arith.addf %599, %600 : vector<8x64xf32>
    %602 = arith.negf %601 : vector<8x64xf32>
    %603 = math.exp %602 : vector<8x64xf32>
    %cst_103 = arith.constant 1.000000e+00 : f32
    %604 = vector.broadcast %cst_103 : f32 to vector<8x64xf32>
    %605 = arith.addf %604, %603 : vector<8x64xf32>
    %606 = arith.divf %604, %605 : vector<8x64xf32>
    %607 = vector.extract_strided_slice %606 {offsets = [0, 0], sizes = [8, 32], strides = [1, 1]} : vector<8x64xf32> to vector<8x32xf32>
    %608 = vector.extract_strided_slice %606 {offsets = [0, 32], sizes = [8, 32], strides = [1, 1]} : vector<8x64xf32> to vector<8x32xf32>
    %609 = vector.extract_strided_slice %596 {offsets = [0, 64], sizes = [8, 32], strides = [1, 1]} : vector<8x128xf32> to vector<8x32xf32>
    %610 = vector.extract_strided_slice %598 {offsets = [0, 64], sizes = [8, 32], strides = [1, 1]} : vector<8x128xf32> to vector<8x32xf32>
    %611 = arith.mulf %607, %610 : vector<8x32xf32>
    %612 = arith.addf %609, %611 : vector<8x32xf32>
    %613 = math.tanh %612 : vector<8x32xf32>
    %cst_104 = arith.constant 1.000000e+00 : f32
    %614 = vector.broadcast %cst_104 : f32 to vector<8x32xf32>
    %615 = arith.subf %614, %608 : vector<8x32xf32>
    %616 = arith.mulf %615, %613 : vector<8x32xf32>
    %617 = arith.mulf %608, %595 : vector<8x32xf32>
    %618 = arith.addf %616, %617 : vector<8x32xf32>
    %619 = vector.extract_strided_slice %456 {offsets = [56, 0], sizes = [8, 128], strides = [1, 1]} : vector<128x128xf32> to vector<8x128xf32>
    %cst_105 = arith.constant dense<0.000000e+00> : vector<8x128xf32>
    %620 = tpu.matmul %618, %2, %cst_105 {dimension_numbers = #tpu.dot_dimension_numbers<[1], [0], [0], [1], [0, 0, 1, 1], [], []>} : vector<8x32xf32>, vector<32x128xf32>, vector<8x128xf32> -> vector<8x128xf32>
    %621 = arith.addf %620, %16 : vector<8x128xf32>
    %622 = vector.extract_strided_slice %619 {offsets = [0, 0], sizes = [8, 64], strides = [1, 1]} : vector<8x128xf32> to vector<8x64xf32>
    %623 = vector.extract_strided_slice %621 {offsets = [0, 0], sizes = [8, 64], strides = [1, 1]} : vector<8x128xf32> to vector<8x64xf32>
    %624 = arith.addf %622, %623 : vector<8x64xf32>
    %625 = arith.negf %624 : vector<8x64xf32>
    %626 = math.exp %625 : vector<8x64xf32>
    %cst_106 = arith.constant 1.000000e+00 : f32
    %627 = vector.broadcast %cst_106 : f32 to vector<8x64xf32>
    %628 = arith.addf %627, %626 : vector<8x64xf32>
    %629 = arith.divf %627, %628 : vector<8x64xf32>
    %630 = vector.extract_strided_slice %629 {offsets = [0, 0], sizes = [8, 32], strides = [1, 1]} : vector<8x64xf32> to vector<8x32xf32>
    %631 = vector.extract_strided_slice %629 {offsets = [0, 32], sizes = [8, 32], strides = [1, 1]} : vector<8x64xf32> to vector<8x32xf32>
    %632 = vector.extract_strided_slice %619 {offsets = [0, 64], sizes = [8, 32], strides = [1, 1]} : vector<8x128xf32> to vector<8x32xf32>
    %633 = vector.extract_strided_slice %621 {offsets = [0, 64], sizes = [8, 32], strides = [1, 1]} : vector<8x128xf32> to vector<8x32xf32>
    %634 = arith.mulf %630, %633 : vector<8x32xf32>
    %635 = arith.addf %632, %634 : vector<8x32xf32>
    %636 = math.tanh %635 : vector<8x32xf32>
    %cst_107 = arith.constant 1.000000e+00 : f32
    %637 = vector.broadcast %cst_107 : f32 to vector<8x32xf32>
    %638 = arith.subf %637, %631 : vector<8x32xf32>
    %639 = arith.mulf %638, %636 : vector<8x32xf32>
    %640 = arith.mulf %631, %618 : vector<8x32xf32>
    %641 = arith.addf %639, %640 : vector<8x32xf32>
    %642 = vector.extract_strided_slice %456 {offsets = [64, 0], sizes = [8, 128], strides = [1, 1]} : vector<128x128xf32> to vector<8x128xf32>
    %cst_108 = arith.constant dense<0.000000e+00> : vector<8x128xf32>
    %643 = tpu.matmul %641, %2, %cst_108 {dimension_numbers = #tpu.dot_dimension_numbers<[1], [0], [0], [1], [0, 0, 1, 1], [], []>} : vector<8x32xf32>, vector<32x128xf32>, vector<8x128xf32> -> vector<8x128xf32>
    %644 = arith.addf %643, %16 : vector<8x128xf32>
    %645 = vector.extract_strided_slice %642 {offsets = [0, 0], sizes = [8, 64], strides = [1, 1]} : vector<8x128xf32> to vector<8x64xf32>
    %646 = vector.extract_strided_slice %644 {offsets = [0, 0], sizes = [8, 64], strides = [1, 1]} : vector<8x128xf32> to vector<8x64xf32>
    %647 = arith.addf %645, %646 : vector<8x64xf32>
    %648 = arith.negf %647 : vector<8x64xf32>
    %649 = math.exp %648 : vector<8x64xf32>
    %cst_109 = arith.constant 1.000000e+00 : f32
    %650 = vector.broadcast %cst_109 : f32 to vector<8x64xf32>
    %651 = arith.addf %650, %649 : vector<8x64xf32>
    %652 = arith.divf %650, %651 : vector<8x64xf32>
    %653 = vector.extract_strided_slice %652 {offsets = [0, 0], sizes = [8, 32], strides = [1, 1]} : vector<8x64xf32> to vector<8x32xf32>
    %654 = vector.extract_strided_slice %652 {offsets = [0, 32], sizes = [8, 32], strides = [1, 1]} : vector<8x64xf32> to vector<8x32xf32>
    %655 = vector.extract_strided_slice %642 {offsets = [0, 64], sizes = [8, 32], strides = [1, 1]} : vector<8x128xf32> to vector<8x32xf32>
    %656 = vector.extract_strided_slice %644 {offsets = [0, 64], sizes = [8, 32], strides = [1, 1]} : vector<8x128xf32> to vector<8x32xf32>
    %657 = arith.mulf %653, %656 : vector<8x32xf32>
    %658 = arith.addf %655, %657 : vector<8x32xf32>
    %659 = math.tanh %658 : vector<8x32xf32>
    %cst_110 = arith.constant 1.000000e+00 : f32
    %660 = vector.broadcast %cst_110 : f32 to vector<8x32xf32>
    %661 = arith.subf %660, %654 : vector<8x32xf32>
    %662 = arith.mulf %661, %659 : vector<8x32xf32>
    %663 = arith.mulf %654, %641 : vector<8x32xf32>
    %664 = arith.addf %662, %663 : vector<8x32xf32>
    %665 = vector.extract_strided_slice %456 {offsets = [72, 0], sizes = [8, 128], strides = [1, 1]} : vector<128x128xf32> to vector<8x128xf32>
    %cst_111 = arith.constant dense<0.000000e+00> : vector<8x128xf32>
    %666 = tpu.matmul %664, %2, %cst_111 {dimension_numbers = #tpu.dot_dimension_numbers<[1], [0], [0], [1], [0, 0, 1, 1], [], []>} : vector<8x32xf32>, vector<32x128xf32>, vector<8x128xf32> -> vector<8x128xf32>
    %667 = arith.addf %666, %16 : vector<8x128xf32>
    %668 = vector.extract_strided_slice %665 {offsets = [0, 0], sizes = [8, 64], strides = [1, 1]} : vector<8x128xf32> to vector<8x64xf32>
    %669 = vector.extract_strided_slice %667 {offsets = [0, 0], sizes = [8, 64], strides = [1, 1]} : vector<8x128xf32> to vector<8x64xf32>
    %670 = arith.addf %668, %669 : vector<8x64xf32>
    %671 = arith.negf %670 : vector<8x64xf32>
    %672 = math.exp %671 : vector<8x64xf32>
    %cst_112 = arith.constant 1.000000e+00 : f32
    %673 = vector.broadcast %cst_112 : f32 to vector<8x64xf32>
    %674 = arith.addf %673, %672 : vector<8x64xf32>
    %675 = arith.divf %673, %674 : vector<8x64xf32>
    %676 = vector.extract_strided_slice %675 {offsets = [0, 0], sizes = [8, 32], strides = [1, 1]} : vector<8x64xf32> to vector<8x32xf32>
    %677 = vector.extract_strided_slice %675 {offsets = [0, 32], sizes = [8, 32], strides = [1, 1]} : vector<8x64xf32> to vector<8x32xf32>
    %678 = vector.extract_strided_slice %665 {offsets = [0, 64], sizes = [8, 32], strides = [1, 1]} : vector<8x128xf32> to vector<8x32xf32>
    %679 = vector.extract_strided_slice %667 {offsets = [0, 64], sizes = [8, 32], strides = [1, 1]} : vector<8x128xf32> to vector<8x32xf32>
    %680 = arith.mulf %676, %679 : vector<8x32xf32>
    %681 = arith.addf %678, %680 : vector<8x32xf32>
    %682 = math.tanh %681 : vector<8x32xf32>
    %cst_113 = arith.constant 1.000000e+00 : f32
    %683 = vector.broadcast %cst_113 : f32 to vector<8x32xf32>
    %684 = arith.subf %683, %677 : vector<8x32xf32>
    %685 = arith.mulf %684, %682 : vector<8x32xf32>
    %686 = arith.mulf %677, %664 : vector<8x32xf32>
    %687 = arith.addf %685, %686 : vector<8x32xf32>
    %688 = vector.extract_strided_slice %456 {offsets = [80, 0], sizes = [8, 128], strides = [1, 1]} : vector<128x128xf32> to vector<8x128xf32>
    %cst_114 = arith.constant dense<0.000000e+00> : vector<8x128xf32>
    %689 = tpu.matmul %687, %2, %cst_114 {dimension_numbers = #tpu.dot_dimension_numbers<[1], [0], [0], [1], [0, 0, 1, 1], [], []>} : vector<8x32xf32>, vector<32x128xf32>, vector<8x128xf32> -> vector<8x128xf32>
    %690 = arith.addf %689, %16 : vector<8x128xf32>
    %691 = vector.extract_strided_slice %688 {offsets = [0, 0], sizes = [8, 64], strides = [1, 1]} : vector<8x128xf32> to vector<8x64xf32>
    %692 = vector.extract_strided_slice %690 {offsets = [0, 0], sizes = [8, 64], strides = [1, 1]} : vector<8x128xf32> to vector<8x64xf32>
    %693 = arith.addf %691, %692 : vector<8x64xf32>
    %694 = arith.negf %693 : vector<8x64xf32>
    %695 = math.exp %694 : vector<8x64xf32>
    %cst_115 = arith.constant 1.000000e+00 : f32
    %696 = vector.broadcast %cst_115 : f32 to vector<8x64xf32>
    %697 = arith.addf %696, %695 : vector<8x64xf32>
    %698 = arith.divf %696, %697 : vector<8x64xf32>
    %699 = vector.extract_strided_slice %698 {offsets = [0, 0], sizes = [8, 32], strides = [1, 1]} : vector<8x64xf32> to vector<8x32xf32>
    %700 = vector.extract_strided_slice %698 {offsets = [0, 32], sizes = [8, 32], strides = [1, 1]} : vector<8x64xf32> to vector<8x32xf32>
    %701 = vector.extract_strided_slice %688 {offsets = [0, 64], sizes = [8, 32], strides = [1, 1]} : vector<8x128xf32> to vector<8x32xf32>
    %702 = vector.extract_strided_slice %690 {offsets = [0, 64], sizes = [8, 32], strides = [1, 1]} : vector<8x128xf32> to vector<8x32xf32>
    %703 = arith.mulf %699, %702 : vector<8x32xf32>
    %704 = arith.addf %701, %703 : vector<8x32xf32>
    %705 = math.tanh %704 : vector<8x32xf32>
    %cst_116 = arith.constant 1.000000e+00 : f32
    %706 = vector.broadcast %cst_116 : f32 to vector<8x32xf32>
    %707 = arith.subf %706, %700 : vector<8x32xf32>
    %708 = arith.mulf %707, %705 : vector<8x32xf32>
    %709 = arith.mulf %700, %687 : vector<8x32xf32>
    %710 = arith.addf %708, %709 : vector<8x32xf32>
    %711 = vector.extract_strided_slice %456 {offsets = [88, 0], sizes = [8, 128], strides = [1, 1]} : vector<128x128xf32> to vector<8x128xf32>
    %cst_117 = arith.constant dense<0.000000e+00> : vector<8x128xf32>
    %712 = tpu.matmul %710, %2, %cst_117 {dimension_numbers = #tpu.dot_dimension_numbers<[1], [0], [0], [1], [0, 0, 1, 1], [], []>} : vector<8x32xf32>, vector<32x128xf32>, vector<8x128xf32> -> vector<8x128xf32>
    %713 = arith.addf %712, %16 : vector<8x128xf32>
    %714 = vector.extract_strided_slice %711 {offsets = [0, 0], sizes = [8, 64], strides = [1, 1]} : vector<8x128xf32> to vector<8x64xf32>
    %715 = vector.extract_strided_slice %713 {offsets = [0, 0], sizes = [8, 64], strides = [1, 1]} : vector<8x128xf32> to vector<8x64xf32>
    %716 = arith.addf %714, %715 : vector<8x64xf32>
    %717 = arith.negf %716 : vector<8x64xf32>
    %718 = math.exp %717 : vector<8x64xf32>
    %cst_118 = arith.constant 1.000000e+00 : f32
    %719 = vector.broadcast %cst_118 : f32 to vector<8x64xf32>
    %720 = arith.addf %719, %718 : vector<8x64xf32>
    %721 = arith.divf %719, %720 : vector<8x64xf32>
    %722 = vector.extract_strided_slice %721 {offsets = [0, 0], sizes = [8, 32], strides = [1, 1]} : vector<8x64xf32> to vector<8x32xf32>
    %723 = vector.extract_strided_slice %721 {offsets = [0, 32], sizes = [8, 32], strides = [1, 1]} : vector<8x64xf32> to vector<8x32xf32>
    %724 = vector.extract_strided_slice %711 {offsets = [0, 64], sizes = [8, 32], strides = [1, 1]} : vector<8x128xf32> to vector<8x32xf32>
    %725 = vector.extract_strided_slice %713 {offsets = [0, 64], sizes = [8, 32], strides = [1, 1]} : vector<8x128xf32> to vector<8x32xf32>
    %726 = arith.mulf %722, %725 : vector<8x32xf32>
    %727 = arith.addf %724, %726 : vector<8x32xf32>
    %728 = math.tanh %727 : vector<8x32xf32>
    %cst_119 = arith.constant 1.000000e+00 : f32
    %729 = vector.broadcast %cst_119 : f32 to vector<8x32xf32>
    %730 = arith.subf %729, %723 : vector<8x32xf32>
    %731 = arith.mulf %730, %728 : vector<8x32xf32>
    %732 = arith.mulf %723, %710 : vector<8x32xf32>
    %733 = arith.addf %731, %732 : vector<8x32xf32>
    %734 = vector.extract_strided_slice %456 {offsets = [96, 0], sizes = [8, 128], strides = [1, 1]} : vector<128x128xf32> to vector<8x128xf32>
    %cst_120 = arith.constant dense<0.000000e+00> : vector<8x128xf32>
    %735 = tpu.matmul %733, %2, %cst_120 {dimension_numbers = #tpu.dot_dimension_numbers<[1], [0], [0], [1], [0, 0, 1, 1], [], []>} : vector<8x32xf32>, vector<32x128xf32>, vector<8x128xf32> -> vector<8x128xf32>
    %736 = arith.addf %735, %16 : vector<8x128xf32>
    %737 = vector.extract_strided_slice %734 {offsets = [0, 0], sizes = [8, 64], strides = [1, 1]} : vector<8x128xf32> to vector<8x64xf32>
    %738 = vector.extract_strided_slice %736 {offsets = [0, 0], sizes = [8, 64], strides = [1, 1]} : vector<8x128xf32> to vector<8x64xf32>
    %739 = arith.addf %737, %738 : vector<8x64xf32>
    %740 = arith.negf %739 : vector<8x64xf32>
    %741 = math.exp %740 : vector<8x64xf32>
    %cst_121 = arith.constant 1.000000e+00 : f32
    %742 = vector.broadcast %cst_121 : f32 to vector<8x64xf32>
    %743 = arith.addf %742, %741 : vector<8x64xf32>
    %744 = arith.divf %742, %743 : vector<8x64xf32>
    %745 = vector.extract_strided_slice %744 {offsets = [0, 0], sizes = [8, 32], strides = [1, 1]} : vector<8x64xf32> to vector<8x32xf32>
    %746 = vector.extract_strided_slice %744 {offsets = [0, 32], sizes = [8, 32], strides = [1, 1]} : vector<8x64xf32> to vector<8x32xf32>
    %747 = vector.extract_strided_slice %734 {offsets = [0, 64], sizes = [8, 32], strides = [1, 1]} : vector<8x128xf32> to vector<8x32xf32>
    %748 = vector.extract_strided_slice %736 {offsets = [0, 64], sizes = [8, 32], strides = [1, 1]} : vector<8x128xf32> to vector<8x32xf32>
    %749 = arith.mulf %745, %748 : vector<8x32xf32>
    %750 = arith.addf %747, %749 : vector<8x32xf32>
    %751 = math.tanh %750 : vector<8x32xf32>
    %cst_122 = arith.constant 1.000000e+00 : f32
    %752 = vector.broadcast %cst_122 : f32 to vector<8x32xf32>
    %753 = arith.subf %752, %746 : vector<8x32xf32>
    %754 = arith.mulf %753, %751 : vector<8x32xf32>
    %755 = arith.mulf %746, %733 : vector<8x32xf32>
    %756 = arith.addf %754, %755 : vector<8x32xf32>
    %757 = vector.extract_strided_slice %456 {offsets = [104, 0], sizes = [8, 128], strides = [1, 1]} : vector<128x128xf32> to vector<8x128xf32>
    %cst_123 = arith.constant dense<0.000000e+00> : vector<8x128xf32>
    %758 = tpu.matmul %756, %2, %cst_123 {dimension_numbers = #tpu.dot_dimension_numbers<[1], [0], [0], [1], [0, 0, 1, 1], [], []>} : vector<8x32xf32>, vector<32x128xf32>, vector<8x128xf32> -> vector<8x128xf32>
    %759 = arith.addf %758, %16 : vector<8x128xf32>
    %760 = vector.extract_strided_slice %757 {offsets = [0, 0], sizes = [8, 64], strides = [1, 1]} : vector<8x128xf32> to vector<8x64xf32>
    %761 = vector.extract_strided_slice %759 {offsets = [0, 0], sizes = [8, 64], strides = [1, 1]} : vector<8x128xf32> to vector<8x64xf32>
    %762 = arith.addf %760, %761 : vector<8x64xf32>
    %763 = arith.negf %762 : vector<8x64xf32>
    %764 = math.exp %763 : vector<8x64xf32>
    %cst_124 = arith.constant 1.000000e+00 : f32
    %765 = vector.broadcast %cst_124 : f32 to vector<8x64xf32>
    %766 = arith.addf %765, %764 : vector<8x64xf32>
    %767 = arith.divf %765, %766 : vector<8x64xf32>
    %768 = vector.extract_strided_slice %767 {offsets = [0, 0], sizes = [8, 32], strides = [1, 1]} : vector<8x64xf32> to vector<8x32xf32>
    %769 = vector.extract_strided_slice %767 {offsets = [0, 32], sizes = [8, 32], strides = [1, 1]} : vector<8x64xf32> to vector<8x32xf32>
    %770 = vector.extract_strided_slice %757 {offsets = [0, 64], sizes = [8, 32], strides = [1, 1]} : vector<8x128xf32> to vector<8x32xf32>
    %771 = vector.extract_strided_slice %759 {offsets = [0, 64], sizes = [8, 32], strides = [1, 1]} : vector<8x128xf32> to vector<8x32xf32>
    %772 = arith.mulf %768, %771 : vector<8x32xf32>
    %773 = arith.addf %770, %772 : vector<8x32xf32>
    %774 = math.tanh %773 : vector<8x32xf32>
    %cst_125 = arith.constant 1.000000e+00 : f32
    %775 = vector.broadcast %cst_125 : f32 to vector<8x32xf32>
    %776 = arith.subf %775, %769 : vector<8x32xf32>
    %777 = arith.mulf %776, %774 : vector<8x32xf32>
    %778 = arith.mulf %769, %756 : vector<8x32xf32>
    %779 = arith.addf %777, %778 : vector<8x32xf32>
    %780 = vector.extract_strided_slice %456 {offsets = [112, 0], sizes = [8, 128], strides = [1, 1]} : vector<128x128xf32> to vector<8x128xf32>
    %cst_126 = arith.constant dense<0.000000e+00> : vector<8x128xf32>
    %781 = tpu.matmul %779, %2, %cst_126 {dimension_numbers = #tpu.dot_dimension_numbers<[1], [0], [0], [1], [0, 0, 1, 1], [], []>} : vector<8x32xf32>, vector<32x128xf32>, vector<8x128xf32> -> vector<8x128xf32>
    %782 = arith.addf %781, %16 : vector<8x128xf32>
    %783 = vector.extract_strided_slice %780 {offsets = [0, 0], sizes = [8, 64], strides = [1, 1]} : vector<8x128xf32> to vector<8x64xf32>
    %784 = vector.extract_strided_slice %782 {offsets = [0, 0], sizes = [8, 64], strides = [1, 1]} : vector<8x128xf32> to vector<8x64xf32>
    %785 = arith.addf %783, %784 : vector<8x64xf32>
    %786 = arith.negf %785 : vector<8x64xf32>
    %787 = math.exp %786 : vector<8x64xf32>
    %cst_127 = arith.constant 1.000000e+00 : f32
    %788 = vector.broadcast %cst_127 : f32 to vector<8x64xf32>
    %789 = arith.addf %788, %787 : vector<8x64xf32>
    %790 = arith.divf %788, %789 : vector<8x64xf32>
    %791 = vector.extract_strided_slice %790 {offsets = [0, 0], sizes = [8, 32], strides = [1, 1]} : vector<8x64xf32> to vector<8x32xf32>
    %792 = vector.extract_strided_slice %790 {offsets = [0, 32], sizes = [8, 32], strides = [1, 1]} : vector<8x64xf32> to vector<8x32xf32>
    %793 = vector.extract_strided_slice %780 {offsets = [0, 64], sizes = [8, 32], strides = [1, 1]} : vector<8x128xf32> to vector<8x32xf32>
    %794 = vector.extract_strided_slice %782 {offsets = [0, 64], sizes = [8, 32], strides = [1, 1]} : vector<8x128xf32> to vector<8x32xf32>
    %795 = arith.mulf %791, %794 : vector<8x32xf32>
    %796 = arith.addf %793, %795 : vector<8x32xf32>
    %797 = math.tanh %796 : vector<8x32xf32>
    %cst_128 = arith.constant 1.000000e+00 : f32
    %798 = vector.broadcast %cst_128 : f32 to vector<8x32xf32>
    %799 = arith.subf %798, %792 : vector<8x32xf32>
    %800 = arith.mulf %799, %797 : vector<8x32xf32>
    %801 = arith.mulf %792, %779 : vector<8x32xf32>
    %802 = arith.addf %800, %801 : vector<8x32xf32>
    %803 = vector.extract_strided_slice %456 {offsets = [120, 0], sizes = [8, 128], strides = [1, 1]} : vector<128x128xf32> to vector<8x128xf32>
    %cst_129 = arith.constant dense<0.000000e+00> : vector<8x128xf32>
    %804 = tpu.matmul %802, %2, %cst_129 {dimension_numbers = #tpu.dot_dimension_numbers<[1], [0], [0], [1], [0, 0, 1, 1], [], []>} : vector<8x32xf32>, vector<32x128xf32>, vector<8x128xf32> -> vector<8x128xf32>
    %805 = arith.addf %804, %16 : vector<8x128xf32>
    %806 = vector.extract_strided_slice %803 {offsets = [0, 0], sizes = [8, 64], strides = [1, 1]} : vector<8x128xf32> to vector<8x64xf32>
    %807 = vector.extract_strided_slice %805 {offsets = [0, 0], sizes = [8, 64], strides = [1, 1]} : vector<8x128xf32> to vector<8x64xf32>
    %808 = arith.addf %806, %807 : vector<8x64xf32>
    %809 = arith.negf %808 : vector<8x64xf32>
    %810 = math.exp %809 : vector<8x64xf32>
    %cst_130 = arith.constant 1.000000e+00 : f32
    %811 = vector.broadcast %cst_130 : f32 to vector<8x64xf32>
    %812 = arith.addf %811, %810 : vector<8x64xf32>
    %813 = arith.divf %811, %812 : vector<8x64xf32>
    %814 = vector.extract_strided_slice %813 {offsets = [0, 0], sizes = [8, 32], strides = [1, 1]} : vector<8x64xf32> to vector<8x32xf32>
    %815 = vector.extract_strided_slice %813 {offsets = [0, 32], sizes = [8, 32], strides = [1, 1]} : vector<8x64xf32> to vector<8x32xf32>
    %816 = vector.extract_strided_slice %803 {offsets = [0, 64], sizes = [8, 32], strides = [1, 1]} : vector<8x128xf32> to vector<8x32xf32>
    %817 = vector.extract_strided_slice %805 {offsets = [0, 64], sizes = [8, 32], strides = [1, 1]} : vector<8x128xf32> to vector<8x32xf32>
    %818 = arith.mulf %814, %817 : vector<8x32xf32>
    %819 = arith.addf %816, %818 : vector<8x32xf32>
    %820 = math.tanh %819 : vector<8x32xf32>
    %cst_131 = arith.constant 1.000000e+00 : f32
    %821 = vector.broadcast %cst_131 : f32 to vector<8x32xf32>
    %822 = arith.subf %821, %815 : vector<8x32xf32>
    %823 = arith.mulf %822, %820 : vector<8x32xf32>
    %824 = arith.mulf %815, %802 : vector<8x32xf32>
    %825 = arith.addf %823, %824 : vector<8x32xf32>
    %826 = vector.extract_strided_slice %8 {offsets = [0, 0], sizes = [1, 32], strides = [1, 1]} : vector<1x128xf32> to vector<1x32xf32>
    %827 = vector.broadcast %826 : vector<1x32xf32> to vector<8x32xf32>
    %828 = arith.mulf %825, %827 : vector<8x32xf32>
    %cst_132 = arith.constant dense<0.000000e+00> : vector<8xf32>
    %829 = vector.multi_reduction <add>, %828, %cst_132 [1] : vector<8x32xf32> to vector<8xf32>
    %830 = vector.shape_cast %829 : vector<8xf32> to vector<8x1xf32>
    %831 = vector.extract_strided_slice %8 {offsets = [0, 32], sizes = [1, 1], strides = [1, 1]} : vector<1x128xf32> to vector<1x1xf32>
    %832 = vector.broadcast %831 : vector<1x1xf32> to vector<8x1xf32>
    %833 = arith.addf %830, %832 : vector<8x1xf32>
    %834 = vector.extract_strided_slice %833 {offsets = [0, 0], sizes = [4, 1], strides = [1, 1]} : vector<8x1xf32> to vector<4x1xf32>
    %c0_133 = arith.constant 0 : index
    %c0_134 = arith.constant 0 : index
    %835 = vector.load %arg2[%c0_133, %c0_134] : memref<4x1xf32, #tpu.memory_space<vmem>>, vector<4x1xf32>
    tpu.vector_store %arg2[%c0_133, %c0_134], %834 {strides = array<i32>} : memref<4x1xf32, #tpu.memory_space<vmem>>, vector<4x1xf32>,
    return
  }
}

</mosaic_0001>

<bundles_post_ra>
// kernel: tpu_custom_call.1
= control target key start
LH: loop header
LB: loop body
LE: loop exit
PB: predicated region body
PF: predicated region fallthrough
CT: control target
= control target key end

     0   :  { %7 = vsyncpa [#allocation4], 0  ;;  %s5449_s0 = inlined_call_operand.hbm [shape: f32[4,16], index: 0, kind: input, shape index: {}]   ;;  %s5450_s1 = inlined_call_operand.hbm [shape: f32[104,128], index: 1, kind: input, shape index: {}]   ;;  %s5451_s2 = inlined_call_operand.vmem [shape: f32[4,1], index: 2, kind: output, shape index: {}]  }
   0x1   :  { %8 = vsyncpa [#allocation6], 0  ;;  %s4809_s9 = smov [#allocation3]   ;;  %s4810_s11 = smov [#allocation5]  }
   0x2   :  { %s15_s10 = sshll.u32 %s4809_s9, 4  ;;  %s24_s12 = sshll.u32 %s4810_s11, 4  ;;  %s16_s10 = int_to_ptr.vmem [resolvable:$true] %s15_s10  ;;  %s4850_s12 = int_to_ptr.vmem [resolvable:$true] %s24_s12 }
   0x3   :  { %s4761_s15 = scalar_lea.hbm %s5449_s0, 64 }
   0x4   :  { %p4762_p0 = scmp.ne.s32.totalorder %s5449_s0, %s4761_s15  ;;  %p4765_p1 = scmp.lt.u32.totalorder %s4761_s15, %s5449_s0 }
   0x6   :  { %p4767_p2 = pnand %p4765_p1, %p4762_p0 }
   0x8   :  { %4770 = shalt.err (!%p4767_p2)
}
   0x9   :  { %s4771_s20 = scalar_lea.vmem %s16_s10, 64  ;;  %p4776_p4 = scmp.lt.s32.totalorder %s16_s10, %s16_s10 }
   0xa   :  { %p4772_p3 = scmp.ne.s32.totalorder %s16_s10, %s4771_s20  ;;  %p4777_p5 = scmp.lt.s32.totalorder %s4771_s20, %s4771_s20 }
   0xc   :  { %p4778_p6 = por %p4777_p5, %p4776_p4 }
   0xe   :  { %p4779_p7 = pnand %p4778_p6, %p4772_p3 }
  0x10   :  { %4782 = shalt.err (!%p4779_p7)
}
  0x11   :  { %18 = dma.hbm_to_vmem [thread:$0]  %s5449_s0, 64, %s16_s10, [#allocation4]  }
  0x12   :  { %s4783_s25 = scalar_lea.hbm %s5450_s1, 1664 }
  0x13   :  { %p4784_p8 = scmp.ne.s32.totalorder %s5450_s1, %s4783_s25  ;;  %p4787_p9 = scmp.lt.u32.totalorder %s4783_s25, %s5450_s1 }
  0x15   :  { %p4789_p10 = pnand %p4787_p9, %p4784_p8 }
  0x17   :  { %4792 = shalt.err (!%p4789_p10)
}
  0x18   :  { %s4793_s30 = scalar_lea.vmem %s4850_s12, 1664  ;;  %p4798_p12 = scmp.lt.s32.totalorder %s4850_s12, %s4850_s12 }
  0x19   :  { %p4794_p11 = scmp.ne.s32.totalorder %s4850_s12, %s4793_s30  ;;  %p4799_p13 = scmp.lt.s32.totalorder %s4793_s30, %s4793_s30 }
  0x1b   :  { %p4800_p0 = por %p4799_p13, %p4798_p12 }
  0x1d   :  { %p4801_p1 = pnand %p4800_p0, %p4794_p11 }
  0x1f   :  { %4804 = shalt.err (!%p4801_p1)
}
  0x20   :  { %s4811_s0 = smov 128   ;;  %s4812_s3 = smov 8  }
  0x21   :  { %30 = dma.hbm_to_vmem [thread:$0]  %s5450_s1, 1664, %s4850_s12, [#allocation6], %s4811_s0, %s4811_s0, %s4812_s3  }
  0x22   :  { %4805 = dma.done.wait [#allocation4], 64  }
  0x23   :  { %4806 = vsyncadd [#allocation4], 4294967232 }
  0x24   :  { %4807 = dma.done.wait [#allocation6], 1664  }
  0x25   :  { %4808 = vsyncadd [#allocation6], 4294965632  ;;  %v4813_v0 = vmov 0.0|0.0   ;;  %vm4814_vm0 = vmmov 0   ;;  %v4815_v1 = vmov 0.0   ;;  %v4816_v2 = vmov 0  }
  0x26   :  { %4322 = vmatprep.subr.bf16.mxu0 %v4813_v0  ;;  %3946 = vmatprep.mubr.msk.f32.mxu0 %vm4814_vm0, %v4815_v1  ;;  %vm72_vm1 = vcmask 1043456   ;;  %v37_v3 = vld [vmem:[#allocation5] sm:$0xff]  ;;  %v38_v4 = vld [vmem:[#allocation5 + $0x8] sm:$0xff]  ;;  %v39_v5 = vld [vmem:[#allocation5 + $0x10] sm:$0xff]  ;;  %s4817_s1 = smov 64   ;;  %s4818_s6 = smov 96  }
  0x27   :  { %4548 = vset.pattern.permute.xlu0 %v4816_v2  ;;  %4328 = vmatprep.subr.bf16.mxu1 %v4813_v0  ;;  %v4887_v6 = vpack.c.bf16 %v38_v4, %v37_v3  ;;  %v40_v7 = vld [vmem:[#allocation5 + $0x18] sm:$0xff]  ;;  %v4909_v11 = vld [vmem:[#allocation5 + $0x62] ss:$0 sm:$0xff]  ;;  %v4913_v16 = vld [vmem:[#allocation5 + $0x60] ss:$0 sm:$0xff]  ;;  %v4819_v30 = vmov 1  }
  0x28   :  { %3957 = vmatprep.mubr.msk.f32.mxu1 %vm4814_vm0, %v4815_v1  ;;  %v71_v8 = vld [vmem:[#allocation3] sm:$0xf]  ;;  %v4892_v10 = vpack.c.bf16 %v40_v7, %v39_v5  ;;  %v4916_v18 = vld [vmem:[#allocation5 + $0x61] ss:$0 sm:$0xff]  ;;  %4549 = vset.pattern.permute.xlu1 %v4819_v30  ;;  %vm81_vm2 = vcmask 261120   ;;  %v4820_v53 = vmov 2  }
  0x29   :  { %v4889_v9 = vsel %vm72_vm1, %v71_v8, 0.0  ;;  %4324 = vmatpush3.bf16.msra.mxu0 %v4887_v6  ;;  %4330 = vmatpush3.bf16.msra.mxu1 %v4887_v6  ;;  %s4834_s7 = smov 32   ;;  %vm3666_vm3 = vcmask 3072  }
  0x2a   :  { %76 = vperm.xlu0 %4548, %v4889_v9   ;;  %4325 = vmatprep.subr.bf16.mxu0 %v4813_v0 }
  0x2b   :  { %4331 = vmatprep.subr.bf16.mxu1 %v4813_v0 }
  0x2d   :  { %4327 = vmatpush3.bf16.msra.mxu0 %v4892_v10  ;;  %4333 = vmatpush3.bf16.msra.mxu1 %v4892_v10 }
  0x2e   :  { %4334 = vmatprep.subr.bf16.mxu0 %v4813_v0  ;;  %4340 = vmatprep.subr.bf16.mxu1 %v4813_v0 }
  0x2f   :  { %4550 = vset.pattern.permute.xlu0 %v4820_v53 }
  0x30   :  { %3947 = vmatmul.mubr.f32.vlgmr.msra.gmra.mrb[0].mxu0 %v4815_v1 }
  0x31   :  { %4336 = vmatpush3.bf16.msra.mxu0 %v4887_v6  ;;  %3968 = vmatprep.mubr.msk.f32.mxu0 %vm4814_vm0, %v4815_v1 }
  0x32   :  { %4337 = vmatprep.subr.bf16.mxu0 %v4813_v0 }
  0x35   :  { %4339 = vmatpush3.bf16.msra.mxu0 %v4892_v10 }
  0x36   :  { %4346 = vmatprep.subr.bf16.mxu0 %v4813_v0 }
  0xa9   :  { %v77_v15 = vpop.permute.xlu0 %76 }
  0xaa   :  { %v79_v17 = vmul.f32 %v4913_v16, %v77_v15 }
  0xac   :  { %v80_v19 = vadd.f32 %v4916_v18, %v79_v17 }
 0x103   :  { %v151_v12 = vpop.f32.mrb[0].mxu0 }
 0x104   :  { %v152_v13 = vadd.f32 %v4909_v11, %v151_v12  ;;  %v3948_v14 = vpop.f32.mrb[1].mxu0 }
 0x106   :  { %163 = vrot.lane.b32.xlu0 %v152_v13, %s4817_s1  ;;  %v155_v20 = vadd.f32 %v152_v13, %v80_v19 }
 0x108   :  { %v3678_v21 = vmul.f32 -1.442695, %v155_v20  ;;  %v4821_v20 = vmov 3  }
 0x10a   :  { %4564 = vpow2.f32 %v3678_v21 }
 0x114   :  { %v4565_v22 = vpop.eup %4564 }
 0x115   :  { %v159_v23 = vadd.f32 1.0, %v4565_v22 }
 0x117   :  { %4566 = vrcp.f32 %v159_v23 }
 0x121   :  { %v4567_v24 = vpop.eup %4566 }
 0x122   :  { %v173_v31 = vsub.f32 1.0, %v4567_v24  ;;  %v179_v33 = vmul.f32 0.0, %v4567_v24 }
 0x178   :  { %v164_v25 = vpop.permute.xlu0 %163 }
 0x179   :  { %v166_v26 = vmul.f32 %v4567_v24, %v164_v25 }
 0x17b   :  { %168 = vrot.lane.b32.xlu1 %v166_v26, %s4817_s1 }
 0x1ed   :  { %v169_v27 = vpop.permute.xlu1 %168 }
 0x1ee   :  { %v171_v28 = vadd.f32 %v169_v27, %v80_v19 }
 0x1f0   :  { %4568 = vtanh.f32 %v171_v28 }
 0x1fa   :  { %v4569_v29 = vpop.eup %4568 }
 0x1fb   :  { %175 = vrot.lane.b32.xlu1 %v4569_v29, %s4818_s6 }
 0x1ff   :  { %187 = vperm.xlu1 %4549, %v4889_v9  }
 0x26d   :  { %v176_v32 = vpop.permute.xlu1 %175 }
 0x26e   :  { %v178_v34 = vmul.f32 %v176_v32, %v173_v31 }
 0x270   :  { %v180_v35 = vadd.f32 %v179_v33, %v178_v34 }
 0x272   :  { %182 = vrot.lane.b32.xlu0 %v180_v35, %s4818_s6 }
 0x27e   :  { %v188_v40 = vpop.permute.xlu1 %187 }
 0x27f   :  { %v190_v41 = vmul.f32 %v4913_v16, %v188_v40 }
 0x281   :  { %v191_v42 = vadd.f32 %v4916_v18, %v190_v41 }
 0x2e4   :  { %v183_v36 = vpop.permute.xlu0 %182 }
 0x2e5   :  { %185 = vst.msk [vmem:[#allocation2] sm:$0xff] %vm81_vm2, %v183_v36  ;;  %3958 = vmatmul.mubr.msk.f32.vlgmr.msra.gmra.mrb[0].mxu1 %vm81_vm2, %v183_v36 }
 0x2e6   :  { %4342 = vmatpush3.bf16.msra.mxu1 %v4887_v6  ;;  %3979 = vmatprep.mubr.msk.f32.mxu1 %vm4814_vm0, %v4815_v1 }
 0x2e7   :  { %4343 = vmatprep.subr.bf16.mxu1 %v4813_v0 }
 0x2ea   :  { %4345 = vmatpush3.bf16.msra.mxu1 %v4892_v10 }
 0x2eb   :  { %4352 = vmatprep.subr.bf16.mxu1 %v4813_v0 }
 0x3b8   :  { %v260_v37 = vpop.f32.mrb[0].mxu1 }
 0x3b9   :  { %v261_v38 = vadd.f32 %v4909_v11, %v260_v37  ;;  %v3959_v39 = vpop.f32.mrb[1].mxu1 }
 0x3bb   :  { %272 = vrot.lane.b32.xlu0 %v261_v38, %s4817_s1  ;;  %v264_v43 = vadd.f32 %v261_v38, %v191_v42 }
 0x3bd   :  { %v3680_v44 = vmul.f32 -1.442695, %v264_v43  ;;  %v4822_v43 = vmov 4  }
 0x3bf   :  { %4570 = vpow2.f32 %v3680_v44 }
 0x3c9   :  { %v4571_v45 = vpop.eup %4570 }
 0x3ca   :  { %v268_v46 = vadd.f32 1.0, %v4571_v45 }
 0x3cc   :  { %4572 = vrcp.f32 %v268_v46 }
 0x3d6   :  { %v4573_v47 = vpop.eup %4572 }
 0x3d7   :  { %v282_v54 = vsub.f32 1.0, %v4573_v47  ;;  %v288_v56 = vmul.f32 %v4573_v47, %v180_v35 }
 0x42d   :  { %v273_v48 = vpop.permute.xlu0 %272 }
 0x42e   :  { %v275_v49 = vmul.f32 %v4573_v47, %v273_v48 }
 0x430   :  { %277 = vrot.lane.b32.xlu1 %v275_v49, %s4817_s1 }
 0x4a2   :  { %v278_v50 = vpop.permute.xlu1 %277 }
 0x4a3   :  { %v280_v51 = vadd.f32 %v278_v50, %v191_v42 }
 0x4a5   :  { %4574 = vtanh.f32 %v280_v51 }
 0x4af   :  { %v4575_v52 = vpop.eup %4574 }
 0x4b0   :  { %284 = vrot.lane.b32.xlu0 %v4575_v52, %s4818_s6 }
 0x4b4   :  { %296 = vperm.xlu0 %4550, %v4889_v9  }
 0x4b8   :  { %4551 = vset.pattern.permute.xlu0 %v4821_v20 }
 0x522   :  { %v285_v55 = vpop.permute.xlu0 %284 }
 0x523   :  { %v287_v57 = vmul.f32 %v285_v55, %v282_v54 }
 0x525   :  { %v289_v58 = vadd.f32 %v288_v56, %v287_v57 }
 0x527   :  { %291 = vrot.lane.b32.xlu1 %v289_v58, %s4818_s6 }
 0x533   :  { %v297_v63 = vpop.permute.xlu0 %296 }
 0x534   :  { %v299_v2 = vmul.f32 %v4913_v16, %v297_v63 }
 0x536   :  { %v300_v3 = vadd.f32 %v4916_v18, %v299_v2 }
 0x599   :  { %v292_v59 = vpop.permute.xlu1 %291 }
 0x59a   :  { %294 = vst.msk [vmem:[#allocation2 + $0x8] sm:$0xff] %vm81_vm2, %v292_v59  ;;  %3969 = vmatmul.mubr.msk.f32.vlgmr.msra.gmra.mrb[2].mxu0 %vm81_vm2, %v292_v59 }
 0x59b   :  { %4348 = vmatpush3.bf16.msra.mxu0 %v4887_v6  ;;  %3990 = vmatprep.mubr.msk.f32.mxu0 %vm4814_vm0, %v4815_v1 }
 0x59c   :  { %4349 = vmatprep.subr.bf16.mxu0 %v4813_v0 }
 0x59f   :  { %4351 = vmatpush3.bf16.msra.mxu0 %v4892_v10 }
 0x5a0   :  { %4358 = vmatprep.subr.bf16.mxu0 %v4813_v0 }
 0x66d   :  { %v369_v60 = vpop.f32.mrb[2].mxu0 }
 0x66e   :  { %v370_v61 = vadd.f32 %v4909_v11, %v369_v60  ;;  %v3970_v62 = vpop.f32.mrb[3].mxu0 }
 0x670   :  { %381 = vrot.lane.b32.xlu1 %v370_v61, %s4817_s1  ;;  %v373_v4 = vadd.f32 %v370_v61, %v300_v3 }
 0x672   :  { %v3682_v5 = vmul.f32 -1.442695, %v373_v4  ;;  %v4823_v4 = vmov 5  }
 0x674   :  { %4576 = vpow2.f32 %v3682_v5 }
 0x67e   :  { %v4577_v7 = vpop.eup %4576 }
 0x67f   :  { %v377_v8 = vadd.f32 1.0, %v4577_v7 }
 0x681   :  { %4578 = vrcp.f32 %v377_v8 }
 0x68b   :  { %v4579_v12 = vpop.eup %4578 }
 0x68c   :  { %v391_v21 = vsub.f32 1.0, %v4579_v12  ;;  %v397_v23 = vmul.f32 %v4579_v12, %v289_v58 }
 0x6e2   :  { %v382_v13 = vpop.permute.xlu1 %381 }
 0x6e3   :  { %v384_v14 = vmul.f32 %v4579_v12, %v382_v13 }
 0x6e5   :  { %386 = vrot.lane.b32.xlu1 %v384_v14, %s4817_s1 }
 0x757   :  { %v387_v15 = vpop.permute.xlu1 %386 }
 0x758   :  { %v389_v17 = vadd.f32 %v387_v15, %v300_v3 }
 0x75a   :  { %4580 = vtanh.f32 %v389_v17 }
 0x764   :  { %v4581_v19 = vpop.eup %4580 }
 0x765   :  { %393 = vrot.lane.b32.xlu0 %v4581_v19, %s4818_s6 }
 0x769   :  { %405 = vperm.xlu0 %4551, %v4889_v9  }
 0x76d   :  { %4552 = vset.pattern.permute.xlu0 %v4822_v43 }
 0x7d7   :  { %v394_v22 = vpop.permute.xlu0 %393 }
 0x7d8   :  { %v396_v24 = vmul.f32 %v394_v22, %v391_v21 }
 0x7da   :  { %v398_v25 = vadd.f32 %v397_v23, %v396_v24 }
 0x7dc   :  { %400 = vrot.lane.b32.xlu1 %v398_v25, %s4818_s6 }
 0x7e8   :  { %v406_v30 = vpop.permute.xlu0 %405 }
 0x7e9   :  { %v408_v31 = vmul.f32 %v4913_v16, %v406_v30 }
 0x7eb   :  { %v409_v32 = vadd.f32 %v4916_v18, %v408_v31 }
 0x84e   :  { %v401_v26 = vpop.permute.xlu1 %400 }
 0x84f   :  { %403 = vst.msk [vmem:[#allocation2 + $0x10] sm:$0xff] %vm81_vm2, %v401_v26  ;;  %3980 = vmatmul.mubr.msk.f32.vlgmr.msra.gmra.mrb[2].mxu1 %vm81_vm2, %v401_v26 }
 0x850   :  { %4354 = vmatpush3.bf16.msra.mxu1 %v4887_v6  ;;  %4001 = vmatprep.mubr.msk.f32.mxu1 %vm4814_vm0, %v4815_v1 }
 0x851   :  { %4355 = vmatprep.subr.bf16.mxu1 %v4813_v0 }
 0x854   :  { %4357 = vmatpush3.bf16.msra.mxu1 %v4892_v10 }
 0x855   :  { %4364 = vmatprep.subr.bf16.mxu1 %v4813_v0 }
 0x922   :  { %v478_v27 = vpop.f32.mrb[2].mxu1 }
 0x923   :  { %v479_v28 = vadd.f32 %v4909_v11, %v478_v27  ;;  %v3981_v29 = vpop.f32.mrb[3].mxu1 }
 0x925   :  { %490 = vrot.lane.b32.xlu1 %v479_v28, %s4817_s1  ;;  %v482_v33 = vadd.f32 %v479_v28, %v409_v32 }
 0x927   :  { %v3684_v34 = vmul.f32 -1.442695, %v482_v33  ;;  %v4824_v33 = vmov 6  }
 0x929   :  { %4582 = vpow2.f32 %v3684_v34 }
 0x933   :  { %v4583_v35 = vpop.eup %4582 }
 0x934   :  { %v486_v36 = vadd.f32 1.0, %v4583_v35 }
 0x936   :  { %4584 = vrcp.f32 %v486_v36 }
 0x940   :  { %v4585_v37 = vpop.eup %4584 }
 0x941   :  { %v500_v44 = vsub.f32 1.0, %v4585_v37  ;;  %v506_v46 = vmul.f32 %v4585_v37, %v398_v25 }
 0x997   :  { %v491_v38 = vpop.permute.xlu1 %490 }
 0x998   :  { %v493_v39 = vmul.f32 %v4585_v37, %v491_v38 }
 0x99a   :  { %495 = vrot.lane.b32.xlu1 %v493_v39, %s4817_s1 }
 0xa0c   :  { %v496_v40 = vpop.permute.xlu1 %495 }
 0xa0d   :  { %v498_v41 = vadd.f32 %v496_v40, %v409_v32 }
 0xa0f   :  { %4586 = vtanh.f32 %v498_v41 }
 0xa19   :  { %v4587_v42 = vpop.eup %4586 }
 0xa1a   :  { %502 = vrot.lane.b32.xlu0 %v4587_v42, %s4818_s6 }
 0xa1e   :  { %514 = vperm.xlu0 %4552, %v4889_v9  }
 0xa22   :  { %4553 = vset.pattern.permute.xlu0 %v4823_v4 }
 0xa8c   :  { %v503_v45 = vpop.permute.xlu0 %502 }
 0xa8d   :  { %v505_v47 = vmul.f32 %v503_v45, %v500_v44 }
 0xa8f   :  { %v507_v48 = vadd.f32 %v506_v46, %v505_v47 }
 0xa91   :  { %509 = vrot.lane.b32.xlu1 %v507_v48, %s4818_s6 }
 0xa9d   :  { %v515_v53 = vpop.permute.xlu0 %514 }
 0xa9e   :  { %v517_v54 = vmul.f32 %v4913_v16, %v515_v53 }
 0xaa0   :  { %v518_v55 = vadd.f32 %v4916_v18, %v517_v54 }
 0xb03   :  { %v510_v49 = vpop.permute.xlu1 %509 }
 0xb04   :  { %512 = vst.msk [vmem:[#allocation2 + $0x18] sm:$0xff] %vm81_vm2, %v510_v49  ;;  %3991 = vmatmul.mubr.msk.f32.vlgmr.msra.gmra.mrb[4].mxu0 %vm81_vm2, %v510_v49 }
 0xb05   :  { %4360 = vmatpush3.bf16.msra.mxu0 %v4887_v6  ;;  %4012 = vmatprep.mubr.msk.f32.mxu0 %vm4814_vm0, %v4815_v1 }
 0xb06   :  { %4361 = vmatprep.subr.bf16.mxu0 %v4813_v0 }
 0xb09   :  { %4363 = vmatpush3.bf16.msra.mxu0 %v4892_v10 }
 0xb0a   :  { %4370 = vmatprep.subr.bf16.mxu0 %v4813_v0 }
 0xbd7   :  { %v587_v50 = vpop.f32.mrb[4].mxu0 }
 0xbd8   :  { %v588_v51 = vadd.f32 %v4909_v11, %v587_v50  ;;  %v3992_v52 = vpop.f32.mrb[5].mxu0 }
 0xbda   :  { %599 = vrot.lane.b32.xlu1 %v588_v51, %s4817_s1  ;;  %v591_v56 = vadd.f32 %v588_v51, %v518_v55 }
 0xbdc   :  { %v3686_v57 = vmul.f32 -1.442695, %v591_v56  ;;  %v4825_v56 = vmov 7  }
 0xbde   :  { %4588 = vpow2.f32 %v3686_v57 }
 0xbe8   :  { %v4589_v58 = vpop.eup %4588 }
 0xbe9   :  { %v595_v59 = vadd.f32 1.0, %v4589_v58 }
 0xbeb   :  { %4590 = vrcp.f32 %v595_v59 }
 0xbf5   :  { %v4591_v60 = vpop.eup %4590 }
 0xbf6   :  { %v609_v5 = vsub.f32 1.0, %v4591_v60  ;;  %v615_v8 = vmul.f32 %v4591_v60, %v507_v48 }
 0xc4c   :  { %v600_v61 = vpop.permute.xlu1 %599 }
 0xc4d   :  { %v602_v62 = vmul.f32 %v4591_v60, %v600_v61 }
 0xc4f   :  { %604 = vrot.lane.b32.xlu1 %v602_v62, %s4817_s1 }
 0xcc1   :  { %v605_v63 = vpop.permute.xlu1 %604 }
 0xcc2   :  { %v607_v2 = vadd.f32 %v605_v63, %v518_v55 }
 0xcc4   :  { %4592 = vtanh.f32 %v607_v2 }
 0xcce   :  { %v4593_v3 = vpop.eup %4592 }
 0xccf   :  { %611 = vrot.lane.b32.xlu0 %v4593_v3, %s4818_s6 }
 0xcd3   :  { %623 = vperm.xlu0 %4553, %v4889_v9  }
 0xcd7   :  { %4554 = vset.pattern.permute.xlu0 %v4824_v33 }
 0xd41   :  { %v612_v7 = vpop.permute.xlu0 %611 }
 0xd42   :  { %v614_v12 = vmul.f32 %v612_v7, %v609_v5 }
 0xd44   :  { %v616_v13 = vadd.f32 %v615_v8, %v614_v12 }
 0xd46   :  { %618 = vrot.lane.b32.xlu1 %v616_v13, %s4818_s6 }
 0xd52   :  { %v624_v20 = vpop.permute.xlu0 %623 }
 0xd53   :  { %v626_v21 = vmul.f32 %v4913_v16, %v624_v20 }
 0xd55   :  { %v627_v22 = vadd.f32 %v4916_v18, %v626_v21 }
 0xdb8   :  { %v619_v14 = vpop.permute.xlu1 %618 }
 0xdb9   :  { %621 = vst.msk [vmem:[#allocation2 + $0x20] sm:$0xff] %vm81_vm2, %v619_v14  ;;  %4002 = vmatmul.mubr.msk.f32.vlgmr.msra.gmra.mrb[4].mxu1 %vm81_vm2, %v619_v14 }
 0xdba   :  { %4366 = vmatpush3.bf16.msra.mxu1 %v4887_v6  ;;  %4023 = vmatprep.mubr.msk.f32.mxu1 %vm4814_vm0, %v4815_v1 }
 0xdbb   :  { %4367 = vmatprep.subr.bf16.mxu1 %v4813_v0 }
 0xdbe   :  { %4369 = vmatpush3.bf16.msra.mxu1 %v4892_v10 }
 0xdbf   :  { %4376 = vmatprep.subr.bf16.mxu1 %v4813_v0 }
 0xe8c   :  { %v696_v15 = vpop.f32.mrb[4].mxu1 }
 0xe8d   :  { %v697_v17 = vadd.f32 %v4909_v11, %v696_v15  ;;  %v4003_v19 = vpop.f32.mrb[5].mxu1 }
 0xe8f   :  { %708 = vrot.lane.b32.xlu1 %v697_v17, %s4817_s1  ;;  %v700_v23 = vadd.f32 %v697_v17, %v627_v22 }
 0xe91   :  { %v3688_v24 = vmul.f32 -1.442695, %v700_v23  ;;  %v4826_v23 = vmov 8  }
 0xe93   :  { %4594 = vpow2.f32 %v3688_v24 }
 0xe9d   :  { %v4595_v25 = vpop.eup %4594 }
 0xe9e   :  { %v704_v26 = vadd.f32 1.0, %v4595_v25 }
 0xea0   :  { %4596 = vrcp.f32 %v704_v26 }
 0xeaa   :  { %v4597_v27 = vpop.eup %4596 }
 0xeab   :  { %v718_v34 = vsub.f32 1.0, %v4597_v27  ;;  %v724_v36 = vmul.f32 %v4597_v27, %v616_v13 }
 0xf01   :  { %v709_v28 = vpop.permute.xlu1 %708 }
 0xf02   :  { %v711_v29 = vmul.f32 %v4597_v27, %v709_v28 }
 0xf04   :  { %713 = vrot.lane.b32.xlu1 %v711_v29, %s4817_s1 }
 0xf76   :  { %v714_v30 = vpop.permute.xlu1 %713 }
 0xf77   :  { %v716_v31 = vadd.f32 %v714_v30, %v627_v22 }
 0xf79   :  { %4598 = vtanh.f32 %v716_v31 }
 0xf83   :  { %v4599_v32 = vpop.eup %4598 }
 0xf84   :  { %720 = vrot.lane.b32.xlu0 %v4599_v32, %s4818_s6 }
 0xf88   :  { %732 = vperm.xlu0 %4554, %v4889_v9  }
 0xf8c   :  { %4555 = vset.pattern.permute.xlu0 %v4825_v56 }
 0xff6   :  { %v721_v35 = vpop.permute.xlu0 %720 }
 0xff7   :  { %v723_v37 = vmul.f32 %v721_v35, %v718_v34 }
 0xff9   :  { %v725_v38 = vadd.f32 %v724_v36, %v723_v37 }
 0xffb   :  { %727 = vrot.lane.b32.xlu1 %v725_v38, %s4818_s6 }
0x1007   :  { %v733_v43 = vpop.permute.xlu0 %732 }
0x1008   :  { %v735_v44 = vmul.f32 %v4913_v16, %v733_v43 }
0x100a   :  { %v736_v45 = vadd.f32 %v4916_v18, %v735_v44 }
0x106d   :  { %v728_v39 = vpop.permute.xlu1 %727 }
0x106e   :  { %730 = vst.msk [vmem:[#allocation2 + $0x28] sm:$0xff] %vm81_vm2, %v728_v39  ;;  %4013 = vmatmul.mubr.msk.f32.vlgmr.msra.gmra.mrb[6].mxu0 %vm81_vm2, %v728_v39 }
0x106f   :  { %4372 = vmatpush3.bf16.msra.mxu0 %v4887_v6  ;;  %4034 = vmatprep.mubr.msk.f32.mxu0 %vm4814_vm0, %v4815_v1 }
0x1070   :  { %4373 = vmatprep.subr.bf16.mxu0 %v4813_v0 }
0x1073   :  { %4375 = vmatpush3.bf16.msra.mxu0 %v4892_v10 }
0x1074   :  { %4382 = vmatprep.subr.bf16.mxu0 %v4813_v0 }
0x1141   :  { %v805_v40 = vpop.f32.mrb[6].mxu0 }
0x1142   :  { %v806_v41 = vadd.f32 %v4909_v11, %v805_v40  ;;  %v4014_v42 = vpop.f32.mrb[7].mxu0 }
0x1144   :  { %817 = vrot.lane.b32.xlu1 %v806_v41, %s4817_s1  ;;  %v809_v46 = vadd.f32 %v806_v41, %v736_v45 }
0x1146   :  { %v3690_v47 = vmul.f32 -1.442695, %v809_v46  ;;  %v4827_v46 = vmov 9  }
0x1148   :  { %4600 = vpow2.f32 %v3690_v47 }
0x1152   :  { %v4601_v48 = vpop.eup %4600 }
0x1153   :  { %v813_v49 = vadd.f32 1.0, %v4601_v48 }
0x1155   :  { %4602 = vrcp.f32 %v813_v49 }
0x115f   :  { %v4603_v50 = vpop.eup %4602 }
0x1160   :  { %v827_v57 = vsub.f32 1.0, %v4603_v50  ;;  %v833_v59 = vmul.f32 %v4603_v50, %v725_v38 }
0x11b6   :  { %v818_v51 = vpop.permute.xlu1 %817 }
0x11b7   :  { %v820_v52 = vmul.f32 %v4603_v50, %v818_v51 }
0x11b9   :  { %822 = vrot.lane.b32.xlu1 %v820_v52, %s4817_s1 }
0x122b   :  { %v823_v53 = vpop.permute.xlu1 %822 }
0x122c   :  { %v825_v54 = vadd.f32 %v823_v53, %v736_v45 }
0x122e   :  { %4604 = vtanh.f32 %v825_v54 }
0x1238   :  { %v4605_v55 = vpop.eup %4604 }
0x1239   :  { %829 = vrot.lane.b32.xlu0 %v4605_v55, %s4818_s6 }
0x123d   :  { %841 = vperm.xlu0 %4555, %v4889_v9  }
0x1241   :  { %4556 = vset.pattern.permute.xlu0 %v4826_v23 }
0x12ab   :  { %v830_v58 = vpop.permute.xlu0 %829 }
0x12ac   :  { %v832_v60 = vmul.f32 %v830_v58, %v827_v57 }
0x12ae   :  { %v834_v61 = vadd.f32 %v833_v59, %v832_v60 }
0x12b0   :  { %836 = vrot.lane.b32.xlu1 %v834_v61, %s4818_s6 }
0x12bc   :  { %v842_v4 = vpop.permute.xlu0 %841 }
0x12bd   :  { %v844_v5 = vmul.f32 %v4913_v16, %v842_v4 }
0x12bf   :  { %v845_v7 = vadd.f32 %v4916_v18, %v844_v5 }
0x1322   :  { %v837_v62 = vpop.permute.xlu1 %836 }
0x1323   :  { %839 = vst.msk [vmem:[#allocation2 + $0x30] sm:$0xff] %vm81_vm2, %v837_v62  ;;  %4024 = vmatmul.mubr.msk.f32.vlgmr.msra.gmra.mrb[6].mxu1 %vm81_vm2, %v837_v62 }
0x1324   :  { %4378 = vmatpush3.bf16.msra.mxu1 %v4887_v6  ;;  %4045 = vmatprep.mubr.msk.f32.mxu1 %vm4814_vm0, %v4815_v1 }
0x1325   :  { %4379 = vmatprep.subr.bf16.mxu1 %v4813_v0 }
0x1328   :  { %4381 = vmatpush3.bf16.msra.mxu1 %v4892_v10 }
0x1329   :  { %4388 = vmatprep.subr.bf16.mxu1 %v4813_v0 }
0x13f6   :  { %v914_v63 = vpop.f32.mrb[6].mxu1 }
0x13f7   :  { %v915_v2 = vadd.f32 %v4909_v11, %v914_v63  ;;  %v4025_v3 = vpop.f32.mrb[7].mxu1 }
0x13f9   :  { %926 = vrot.lane.b32.xlu1 %v915_v2, %s4817_s1  ;;  %v918_v8 = vadd.f32 %v915_v2, %v845_v7 }
0x13fb   :  { %v3692_v12 = vmul.f32 -1.442695, %v918_v8  ;;  %v4828_v8 = vmov 10  }
0x13fd   :  { %4606 = vpow2.f32 %v3692_v12 }
0x1407   :  { %v4607_v13 = vpop.eup %4606 }
0x1408   :  { %v922_v14 = vadd.f32 1.0, %v4607_v13 }
0x140a   :  { %4608 = vrcp.f32 %v922_v14 }
0x1414   :  { %v4609_v15 = vpop.eup %4608 }
0x1415   :  { %v936_v24 = vsub.f32 1.0, %v4609_v15  ;;  %v942_v26 = vmul.f32 %v4609_v15, %v834_v61 }
0x146b   :  { %v927_v17 = vpop.permute.xlu1 %926 }
0x146c   :  { %v929_v19 = vmul.f32 %v4609_v15, %v927_v17 }
0x146e   :  { %931 = vrot.lane.b32.xlu1 %v929_v19, %s4817_s1 }
0x14e0   :  { %v932_v20 = vpop.permute.xlu1 %931 }
0x14e1   :  { %v934_v21 = vadd.f32 %v932_v20, %v845_v7 }
0x14e3   :  { %4610 = vtanh.f32 %v934_v21 }
0x14ed   :  { %v4611_v22 = vpop.eup %4610 }
0x14ee   :  { %938 = vrot.lane.b32.xlu0 %v4611_v22, %s4818_s6 }
0x14f2   :  { %950 = vperm.xlu0 %4556, %v4889_v9  }
0x14f6   :  { %4557 = vset.pattern.permute.xlu0 %v4827_v46 }
0x1560   :  { %v939_v25 = vpop.permute.xlu0 %938 }
0x1561   :  { %v941_v27 = vmul.f32 %v939_v25, %v936_v24 }
0x1563   :  { %v943_v28 = vadd.f32 %v942_v26, %v941_v27 }
0x1565   :  { %945 = vrot.lane.b32.xlu1 %v943_v28, %s4818_s6 }
0x1571   :  { %v951_v33 = vpop.permute.xlu0 %950 }
0x1572   :  { %v953_v34 = vmul.f32 %v4913_v16, %v951_v33 }
0x1574   :  { %v954_v35 = vadd.f32 %v4916_v18, %v953_v34 }
0x15d7   :  { %v946_v29 = vpop.permute.xlu1 %945 }
0x15d8   :  { %948 = vst.msk [vmem:[#allocation2 + $0x38] sm:$0xff] %vm81_vm2, %v946_v29  ;;  %4035 = vmatmul.mubr.msk.f32.vlgmr.msra.gmra.mrb[8].mxu0 %vm81_vm2, %v946_v29 }
0x15d9   :  { %4384 = vmatpush3.bf16.msra.mxu0 %v4887_v6  ;;  %4056 = vmatprep.mubr.msk.f32.mxu0 %vm4814_vm0, %v4815_v1 }
0x15da   :  { %4385 = vmatprep.subr.bf16.mxu0 %v4813_v0 }
0x15dd   :  { %4387 = vmatpush3.bf16.msra.mxu0 %v4892_v10 }
0x15de   :  { %4394 = vmatprep.subr.bf16.mxu0 %v4813_v0 }
0x16ab   :  { %v1023_v30 = vpop.f32.mrb[8].mxu0 }
0x16ac   :  { %v1024_v31 = vadd.f32 %v4909_v11, %v1023_v30  ;;  %v4036_v32 = vpop.f32.mrb[9].mxu0 }
0x16ae   :  { %1035 = vrot.lane.b32.xlu1 %v1024_v31, %s4817_s1  ;;  %v1027_v36 = vadd.f32 %v1024_v31, %v954_v35 }
0x16b0   :  { %v3694_v37 = vmul.f32 -1.442695, %v1027_v36  ;;  %v4829_v36 = vmov 11  }
0x16b2   :  { %4612 = vpow2.f32 %v3694_v37 }
0x16bc   :  { %v4613_v38 = vpop.eup %4612 }
0x16bd   :  { %v1031_v39 = vadd.f32 1.0, %v4613_v38 }
0x16bf   :  { %4614 = vrcp.f32 %v1031_v39 }
0x16c9   :  { %v4615_v40 = vpop.eup %4614 }
0x16ca   :  { %v1045_v47 = vsub.f32 1.0, %v4615_v40  ;;  %v1051_v49 = vmul.f32 %v4615_v40, %v943_v28 }
0x1720   :  { %v1036_v41 = vpop.permute.xlu1 %1035 }
0x1721   :  { %v1038_v42 = vmul.f32 %v4615_v40, %v1036_v41 }
0x1723   :  { %1040 = vrot.lane.b32.xlu1 %v1038_v42, %s4817_s1 }
0x1795   :  { %v1041_v43 = vpop.permute.xlu1 %1040 }
0x1796   :  { %v1043_v44 = vadd.f32 %v1041_v43, %v954_v35 }
0x1798   :  { %4616 = vtanh.f32 %v1043_v44 }
0x17a2   :  { %v4617_v45 = vpop.eup %4616 }
0x17a3   :  { %1047 = vrot.lane.b32.xlu0 %v4617_v45, %s4818_s6 }
0x17a7   :  { %1059 = vperm.xlu0 %4557, %v4889_v9  }
0x17ab   :  { %4558 = vset.pattern.permute.xlu0 %v4828_v8 }
0x1815   :  { %v1048_v48 = vpop.permute.xlu0 %1047 }
0x1816   :  { %v1050_v50 = vmul.f32 %v1048_v48, %v1045_v47 }
0x1818   :  { %v1052_v51 = vadd.f32 %v1051_v49, %v1050_v50 }
0x181a   :  { %1054 = vrot.lane.b32.xlu1 %v1052_v51, %s4818_s6 }
0x1826   :  { %v1060_v56 = vpop.permute.xlu0 %1059 }
0x1827   :  { %v1062_v57 = vmul.f32 %v4913_v16, %v1060_v56 }
0x1829   :  { %v1063_v58 = vadd.f32 %v4916_v18, %v1062_v57 }
0x188c   :  { %v1055_v52 = vpop.permute.xlu1 %1054 }
0x188d   :  { %1057 = vst.msk [vmem:[#allocation2 + $0x40] sm:$0xff] %vm81_vm2, %v1055_v52  ;;  %4046 = vmatmul.mubr.msk.f32.vlgmr.msra.gmra.mrb[8].mxu1 %vm81_vm2, %v1055_v52 }
0x188e   :  { %4390 = vmatpush3.bf16.msra.mxu1 %v4887_v6  ;;  %4067 = vmatprep.mubr.msk.f32.mxu1 %vm4814_vm0, %v4815_v1 }
0x188f   :  { %4391 = vmatprep.subr.bf16.mxu1 %v4813_v0 }
0x1892   :  { %4393 = vmatpush3.bf16.msra.mxu1 %v4892_v10 }
0x1893   :  { %4400 = vmatprep.subr.bf16.mxu1 %v4813_v0 }
0x1960   :  { %v1132_v53 = vpop.f32.mrb[8].mxu1 }
0x1961   :  { %v1133_v54 = vadd.f32 %v4909_v11, %v1132_v53  ;;  %v4047_v55 = vpop.f32.mrb[9].mxu1 }
0x1963   :  { %1144 = vrot.lane.b32.xlu1 %v1133_v54, %s4817_s1  ;;  %v1136_v59 = vadd.f32 %v1133_v54, %v1063_v58 }
0x1965   :  { %v3696_v60 = vmul.f32 -1.442695, %v1136_v59  ;;  %v4830_v59 = vmov 12  }
0x1967   :  { %4618 = vpow2.f32 %v3696_v60 }
0x1971   :  { %v4619_v61 = vpop.eup %4618 }
0x1972   :  { %v1140_v62 = vadd.f32 1.0, %v4619_v61 }
0x1974   :  { %4620 = vrcp.f32 %v1140_v62 }
0x197e   :  { %v4621_v63 = vpop.eup %4620 }
0x197f   :  { %v1154_v12 = vsub.f32 1.0, %v4621_v63  ;;  %v1160_v14 = vmul.f32 %v4621_v63, %v1052_v51 }
0x19d5   :  { %v1145_v2 = vpop.permute.xlu1 %1144 }
0x19d6   :  { %v1147_v3 = vmul.f32 %v4621_v63, %v1145_v2 }
0x19d8   :  { %1149 = vrot.lane.b32.xlu1 %v1147_v3, %s4817_s1 }
0x1a4a   :  { %v1150_v4 = vpop.permute.xlu1 %1149 }
0x1a4b   :  { %v1152_v5 = vadd.f32 %v1150_v4, %v1063_v58 }
0x1a4d   :  { %4622 = vtanh.f32 %v1152_v5 }
0x1a57   :  { %v4623_v7 = vpop.eup %4622 }
0x1a58   :  { %1156 = vrot.lane.b32.xlu0 %v4623_v7, %s4818_s6 }
0x1a5c   :  { %1168 = vperm.xlu0 %4558, %v4889_v9  }
0x1a60   :  { %4559 = vset.pattern.permute.xlu0 %v4829_v36 }
0x1aca   :  { %v1157_v13 = vpop.permute.xlu0 %1156 }
0x1acb   :  { %v1159_v15 = vmul.f32 %v1157_v13, %v1154_v12 }
0x1acd   :  { %v1161_v17 = vadd.f32 %v1160_v14, %v1159_v15 }
0x1acf   :  { %1163 = vrot.lane.b32.xlu1 %v1161_v17, %s4818_s6 }
0x1adb   :  { %v1169_v23 = vpop.permute.xlu0 %1168 }
0x1adc   :  { %v1171_v24 = vmul.f32 %v4913_v16, %v1169_v23 }
0x1ade   :  { %v1172_v25 = vadd.f32 %v4916_v18, %v1171_v24 }
0x1b41   :  { %v1164_v19 = vpop.permute.xlu1 %1163 }
0x1b42   :  { %1166 = vst.msk [vmem:[#allocation2 + $0x48] sm:$0xff] %vm81_vm2, %v1164_v19  ;;  %4057 = vmatmul.mubr.msk.f32.vlgmr.msra.gmra.mrb[10].mxu0 %vm81_vm2, %v1164_v19 }
0x1b43   :  { %4396 = vmatpush3.bf16.msra.mxu0 %v4887_v6  ;;  %4078 = vmatprep.mubr.msk.f32.mxu0 %vm4814_vm0, %v4815_v1 }
0x1b44   :  { %4397 = vmatprep.subr.bf16.mxu0 %v4813_v0 }
0x1b47   :  { %4399 = vmatpush3.bf16.msra.mxu0 %v4892_v10 }
0x1b48   :  { %4406 = vmatprep.subr.bf16.mxu0 %v4813_v0 }
0x1c15   :  { %v1241_v20 = vpop.f32.mrb[10].mxu0 }
0x1c16   :  { %v1242_v21 = vadd.f32 %v4909_v11, %v1241_v20  ;;  %v4058_v22 = vpop.f32.mrb[11].mxu0 }
0x1c18   :  { %1253 = vrot.lane.b32.xlu1 %v1242_v21, %s4817_s1  ;;  %v1245_v26 = vadd.f32 %v1242_v21, %v1172_v25 }
0x1c1a   :  { %v3698_v27 = vmul.f32 -1.442695, %v1245_v26 }
0x1c1c   :  { %4624 = vpow2.f32 %v3698_v27 }
0x1c26   :  { %v4625_v28 = vpop.eup %4624 }
0x1c27   :  { %v1249_v29 = vadd.f32 1.0, %v4625_v28 }
0x1c29   :  { %4626 = vrcp.f32 %v1249_v29 }
0x1c33   :  { %v4627_v30 = vpop.eup %4626 }
0x1c34   :  { %v1263_v37 = vsub.f32 1.0, %v4627_v30  ;;  %v1269_v39 = vmul.f32 %v4627_v30, %v1161_v17 }
0x1c8a   :  { %v1254_v31 = vpop.permute.xlu1 %1253 }
0x1c8b   :  { %v1256_v32 = vmul.f32 %v4627_v30, %v1254_v31 }
0x1c8d   :  { %1258 = vrot.lane.b32.xlu1 %v1256_v32, %s4817_s1 }
0x1cff   :  { %v1259_v33 = vpop.permute.xlu1 %1258 }
0x1d00   :  { %v1261_v34 = vadd.f32 %v1259_v33, %v1172_v25  ;;  %v4831_v25 = vmov 13   ;;  %v5122_v33 = vld [vmem:[#allocation5 + $0x62] ss:$0 sm:$0xff] }
0x1d02   :  { %4628 = vtanh.f32 %v1261_v34 }
0x1d0c   :  { %v4629_v35 = vpop.eup %4628 }
0x1d0d   :  { %1265 = vrot.lane.b32.xlu0 %v4629_v35, %s4818_s6 }
0x1d11   :  { %1277 = vperm.xlu0 %4559, %v4889_v9  }
0x1d15   :  { %4560 = vset.pattern.permute.xlu0 %v4830_v59  ;;  %v1822_v59 = vld [vmem:[#allocation2 + $0x8] sm:$0xff] }
0x1d7f   :  { %v1266_v38 = vpop.permute.xlu0 %1265 }
0x1d80   :  { %v1268_v40 = vmul.f32 %v1266_v38, %v1263_v37 }
0x1d82   :  { %v1270_v41 = vadd.f32 %v1269_v39, %v1268_v40 }
0x1d84   :  { %1272 = vrot.lane.b32.xlu1 %v1270_v41, %s4818_s6 }
0x1d90   :  { %v1278_v46 = vpop.permute.xlu0 %1277 }
0x1d91   :  { %v1280_v47 = vmul.f32 %v4913_v16, %v1278_v46  ;;  %v41_v46 = vld [vmem:[#allocation5 + $0x20] sm:$0xff] }
0x1d93   :  { %v1281_v48 = vadd.f32 %v4916_v18, %v1280_v47  ;;  %v42_v47 = vld [vmem:[#allocation5 + $0x28] sm:$0xff] }
0x1df6   :  { %v1273_v42 = vpop.permute.xlu1 %1272 }
0x1df7   :  { %1275 = vst.msk [vmem:[#allocation2 + $0x50] sm:$0xff] %vm81_vm2, %v1273_v42  ;;  %4068 = vmatmul.mubr.msk.f32.vlgmr.msra.gmra.mrb[10].mxu1 %vm81_vm2, %v1273_v42 }
0x1df8   :  { %4402 = vmatpush3.bf16.msra.mxu1 %v4887_v6  ;;  %4089 = vmatprep.mubr.msk.f32.mxu1 %vm4814_vm0, %v4815_v1 }
0x1df9   :  { %4403 = vmatprep.subr.bf16.mxu1 %v4813_v0 }
0x1dfc   :  { %4405 = vmatpush3.bf16.msra.mxu1 %v4892_v10 }
0x1dfd   :  { %4412 = vmatprep.subr.bf16.mxu1 %v4813_v0 }
0x1eca   :  { %v1350_v43 = vpop.f32.mrb[10].mxu1 }
0x1ecb   :  { %v1351_v44 = vadd.f32 %v4909_v11, %v1350_v43  ;;  %v4069_v45 = vpop.f32.mrb[11].mxu1 }
0x1ecd   :  { %1362 = vrot.lane.b32.xlu1 %v1351_v44, %s4817_s1  ;;  %v1354_v49 = vadd.f32 %v1351_v44, %v1281_v48 }
0x1ecf   :  { %v3700_v50 = vmul.f32 -1.442695, %v1354_v49 }
0x1ed1   :  { %4630 = vpow2.f32 %v3700_v50 }
0x1edb   :  { %v4631_v51 = vpop.eup %4630 }
0x1edc   :  { %v1358_v52 = vadd.f32 1.0, %v4631_v51 }
0x1ede   :  { %4632 = vrcp.f32 %v1358_v52 }
0x1ee8   :  { %v4633_v53 = vpop.eup %4632 }
0x1ee9   :  { %v1372_v60 = vsub.f32 1.0, %v4633_v53  ;;  %v1378_v62 = vmul.f32 %v4633_v53, %v1270_v41 }
0x1f3f   :  { %v1363_v54 = vpop.permute.xlu1 %1362 }
0x1f40   :  { %v1365_v55 = vmul.f32 %v4633_v53, %v1363_v54  ;;  %v4832_v53 = vmov 14   ;;  %v43_v54 = vld [vmem:[#allocation5 + $0x30] sm:$0xff] }
0x1f42   :  { %1367 = vrot.lane.b32.xlu1 %v1365_v55, %s4817_s1  ;;  %v44_v55 = vld [vmem:[#allocation5 + $0x38] sm:$0xff] }
0x1fb4   :  { %v1368_v56 = vpop.permute.xlu1 %1367 }
0x1fb5   :  { %v1370_v57 = vadd.f32 %v1368_v56, %v1281_v48  ;;  %v4418_v48 = vpack.c.bf16 %v42_v47, %v41_v46  ;;  %v4422_v56 = vpack.c.bf16 %v44_v55, %v43_v54  ;;  %v45_v46 = vld [vmem:[#allocation5 + $0x40] sm:$0xff]  ;;  %v46_v47 = vld [vmem:[#allocation5 + $0x48] sm:$0xff] }
0x1fb7   :  { %4634 = vtanh.f32 %v1370_v57 }
0x1fc1   :  { %v4635_v58 = vpop.eup %4634 }
0x1fc2   :  { %1374 = vrot.lane.b32.xlu0 %v4635_v58, %s4818_s6  ;;  %v1821_v58 = vld [vmem:[#allocation2] sm:$0xff] }
0x1fc6   :  { %1386 = vperm.xlu0 %4560, %v4889_v9  }
0x1fca   :  { %4561 = vset.pattern.permute.xlu0 %v4831_v25 }
0x2034   :  { %v1375_v61 = vpop.permute.xlu0 %1374 }
0x2035   :  { %v1377_v63 = vmul.f32 %v1375_v61, %v1372_v60  ;;  %v1823_v60 = vld [vmem:[#allocation2 + $0x10] sm:$0xff]  ;;  %v1824_v61 = vld [vmem:[#allocation2 + $0x18] sm:$0xff] }
0x2037   :  { %v1379_v2 = vadd.f32 %v1378_v62, %v1377_v63  ;;  %v1825_v62 = vld [vmem:[#allocation2 + $0x20] sm:$0xff]  ;;  %v1826_v63 = vld [vmem:[#allocation2 + $0x28] sm:$0xff] }
0x2039   :  { %1381 = vrot.lane.b32.xlu1 %v1379_v2, %s4818_s6 }
0x2045   :  { %v1387_v8 = vpop.permute.xlu0 %1386 }
0x2046   :  { %v1389_v12 = vmul.f32 %v4913_v16, %v1387_v8 }
0x2048   :  { %v1390_v13 = vadd.f32 %v4916_v18, %v1389_v12 }
0x20ab   :  { %v1382_v3 = vpop.permute.xlu1 %1381 }
0x20ac   :  { %1384 = vst.msk [vmem:[#allocation2 + $0x58] sm:$0xff] %vm81_vm2, %v1382_v3  ;;  %4079 = vmatmul.mubr.msk.f32.vlgmr.msra.gmra.mrb[12].mxu0 %vm81_vm2, %v1382_v3  ;;  %v1828_v3 = vld [vmem:[#allocation2 + $0x38] sm:$0xff] }
0x20ad   :  { %4408 = vmatpush3.bf16.msra.mxu0 %v4887_v6  ;;  %4100 = vmatprep.mubr.msk.f32.mxu0 %vm4814_vm0, %v4815_v1 }
0x20ae   :  { %4409 = vmatprep.subr.bf16.mxu0 %v4813_v0 }
0x20b1   :  { %4411 = vmatpush3.bf16.msra.mxu0 %v4892_v10 }
0x20b2   :  { %4419 = vmatprep.subr.bf16.mxu0 %v4418_v48 }
0x20b3   :  { %v1832_v8 = vld [vmem:[#allocation2 + $0x58] sm:$0xff] }
0x217f   :  { %v1459_v4 = vpop.f32.mrb[12].mxu0 }
0x2180   :  { %v1460_v5 = vadd.f32 %v4909_v11, %v1459_v4  ;;  %v4080_v7 = vpop.f32.mrb[13].mxu0  ;;  %v1829_v4 = vld [vmem:[#allocation2 + $0x40] sm:$0xff] }
0x2181   :  { %v1831_v7 = vld [vmem:[#allocation2 + $0x50] sm:$0xff] }
0x2182   :  { %1471 = vrot.lane.b32.xlu1 %v1460_v5, %s4817_s1  ;;  %v1463_v14 = vadd.f32 %v1460_v5, %v1390_v13  ;;  %v1830_v5 = vld [vmem:[#allocation2 + $0x48] sm:$0xff] }
0x2184   :  { %v3702_v15 = vmul.f32 -1.442695, %v1463_v14 }
0x2186   :  { %4636 = vpow2.f32 %v3702_v15 }
0x2190   :  { %v4637_v17 = vpop.eup %4636 }
0x2191   :  { %v1467_v19 = vadd.f32 1.0, %v4637_v17 }
0x2193   :  { %4638 = vrcp.f32 %v1467_v19 }
0x219d   :  { %v4639_v20 = vpop.eup %4638 }
0x219e   :  { %v1481_v26 = vsub.f32 1.0, %v4639_v20  ;;  %v1487_v28 = vmul.f32 %v4639_v20, %v1379_v2  ;;  %v1827_v2 = vld [vmem:[#allocation2 + $0x30] sm:$0xff] }
0x21f4   :  { %v1472_v21 = vpop.permute.xlu1 %1471 }
0x21f5   :  { %v1474_v22 = vmul.f32 %v4639_v20, %v1472_v21 }
0x21f7   :  { %1476 = vrot.lane.b32.xlu1 %v1474_v22, %s4817_s1 }
0x2269   :  { %v1477_v11 = vpop.permute.xlu1 %1476 }
0x226a   :  { %v1479_v23 = vadd.f32 %v1477_v11, %v1390_v13 }
0x226c   :  { %4640 = vtanh.f32 %v1479_v23 }
0x2276   :  { %v4641_v24 = vpop.eup %4640 }
0x2277   :  { %1483 = vrot.lane.b32.xlu0 %v4641_v24, %s4818_s6 }
0x227b   :  { %1495 = vperm.xlu0 %4561, %v4889_v9  }
0x227f   :  { %4562 = vset.pattern.permute.xlu0 %v4832_v53 }
0x22e9   :  { %v1484_v27 = vpop.permute.xlu0 %1483 }
0x22ea   :  { %v1486_v29 = vmul.f32 %v1484_v27, %v1481_v26 }
0x22ec   :  { %v1488_v30 = vadd.f32 %v1487_v28, %v1486_v29 }
0x22ee   :  { %1490 = vrot.lane.b32.xlu1 %v1488_v30, %s4818_s6 }
0x22fa   :  { %v1496_v36 = vpop.permute.xlu0 %1495 }
0x2360   :  { %v1491_v31 = vpop.permute.xlu1 %1490 }
0x2361   :  { %1493 = vst.msk [vmem:[#allocation2 + $0x60] sm:$0xff] %vm81_vm2, %v1491_v31  ;;  %4090 = vmatmul.mubr.msk.f32.vlgmr.msra.gmra.mrb[12].mxu1 %vm81_vm2, %v1491_v31 }
0x2362   :  { %4414 = vmatpush3.bf16.msra.mxu1 %v4887_v6  ;;  %4111 = vmatprep.mubr.msk.f32.mxu1 %vm4814_vm0, %v4815_v1  ;;  %v1498_v6 = vmul.f32 %v4913_v16, %v1496_v36  ;;  %v5185_v36 = vld [vmem:[#allocation5 + $0x61] ss:$0 sm:$0xff] }
0x2363   :  { %4415 = vmatprep.subr.bf16.mxu1 %v4813_v0 }
0x2364   :  { %v1499_v37 = vadd.f32 %v4916_v18, %v1498_v6 }
0x2366   :  { %4417 = vmatpush3.bf16.msra.mxu1 %v4892_v10 }
0x2367   :  { %4426 = vmatprep.subr.bf16.mxu1 %v4813_v0 }
0x2368   :  { %v1833_v12 = vld [vmem:[#allocation2 + $0x60] sm:$0xff] }
0x2434   :  { %v1568_v32 = vpop.f32.mrb[12].mxu1 }
0x2435   :  { %v1569_v34 = vadd.f32 %v5122_v33, %v1568_v32  ;;  %v4091_v35 = vpop.f32.mrb[13].mxu1 }
0x2437   :  { %1580 = vrot.lane.b32.xlu1 %v1569_v34, %s4817_s1  ;;  %v1572_v38 = vadd.f32 %v1569_v34, %v1499_v37  ;;  %v5182_v34 = vld [vmem:[#allocation5 + $0x60] ss:$0 sm:$0xff] }
0x2439   :  { %v3704_v39 = vmul.f32 -1.442695, %v1572_v38 }
0x243b   :  { %4642 = vpow2.f32 %v3704_v39 }
0x2445   :  { %v4643_v40 = vpop.eup %4642 }
0x2446   :  { %v1576_v10 = vadd.f32 1.0, %v4643_v40 }
0x2448   :  { %4644 = vrcp.f32 %v1576_v10 }
0x2452   :  { %v4645_v41 = vpop.eup %4644 }
0x2453   :  { %v1590_v18 = vsub.f32 1.0, %v4645_v41  ;;  %v1596_v50 = vmul.f32 %v4645_v41, %v1488_v30 }
0x24a9   :  { %v1581_v42 = vpop.permute.xlu1 %1580 }
0x24aa   :  { %v1583_v43 = vmul.f32 %v4645_v41, %v1581_v42 }
0x24ac   :  { %1585 = vrot.lane.b32.xlu1 %v1583_v43, %s4817_s1 }
0x251e   :  { %v1586_v44 = vpop.permute.xlu1 %1585 }
0x251f   :  { %v1588_v45 = vadd.f32 %v1586_v44, %v1499_v37 }
0x2521   :  { %4646 = vtanh.f32 %v1588_v45 }
0x252b   :  { %v4647_v16 = vpop.eup %4646 }
0x252c   :  { %1592 = vrot.lane.b32.xlu0 %v4647_v16, %s4818_s6  ;;  %v47_v16 = vld [vmem:[#allocation5 + $0x50] sm:$0xff] }
0x2530   :  { %1604 = vperm.xlu0 %4562, %v4889_v9  }
0x259e   :  { %v1593_v49 = vpop.permute.xlu0 %1592 }
0x259f   :  { %v1595_v51 = vmul.f32 %v1593_v49, %v1590_v18  ;;  %v48_v18 = vld [vmem:[#allocation5 + $0x58] sm:$0xff] }
0x25a0   :  { %v5194_v49 = vpack.c.bf16 %v48_v18, %v47_v16 }
0x25a1   :  { %v5130_v52 = vadd.f32 %v1596_v50, %v1595_v51 }
0x25a3   :  { %1599 = vrot.lane.b32.xlu1 %v5130_v52, %s4818_s6 }
0x25af   :  { %v1605_v32 = vpop.permute.xlu0 %1604 }
0x25b0   :  { %v1607_v35 = vmul.f32 %v5182_v34, %v1605_v32 }
0x25b2   :  { %v1608_v6 = vadd.f32 %v5185_v36, %v1607_v35 }
0x2615   :  { %v1600_v57 = vpop.permute.xlu1 %1599 }
0x2616   :  { %1602 = vst.msk [vmem:[#allocation2 + $0x68] sm:$0xff] %vm81_vm2, %v1600_v57  ;;  %4101 = vmatmul.mubr.msk.f32.vlgmr.msra.gmra.mrb[14].mxu0 %vm81_vm2, %v1600_v57 }
0x2617   :  { %4421 = vmatpush3.bf16.msra.mxu0 %v4418_v48  ;;  %4122 = vmatprep.mubr.msk.f32.mxu0 %vm81_vm2, %v1821_v58  ;;  %v5190_v48 = vpack.c.bf16 %v46_v47, %v45_v46 }
0x2618   :  { %4423 = vmatprep.subr.bf16.mxu0 %v4422_v56 }
0x261b   :  { %4425 = vmatpush3.bf16.msra.mxu0 %v4422_v56 }
0x261c   :  { %4450 = vmatprep.subr.bf16.mxu0 %v4813_v0 }
0x261d   :  { %v1834_v13 = vld [vmem:[#allocation2 + $0x68] sm:$0xff] }
0x261e   :  { %4123 = vmatmul.mubr.msk.f32.vlgmr.msra.gmra.mrb[16].mxu0 %vm81_vm2, %v1822_v59  ;;  %v5221_v59 = vld [vmem:[#allocation5 + $0x64] ss:$0 sm:$0xff] }
0x261f   :  { %4125 = vmatprep.mubr.msk.f32.mxu0 %vm81_vm2, %v1823_v60  ;;  %4452 = vmatpush3.bf16.msra.mxu0 %v5190_v48 }
0x2620   :  { %4453 = vmatprep.subr.bf16.mxu0 %v4813_v0 }
0x2622   :  { %4126 = vmatmul.mubr.msk.f32.gmra.mrb[18].mxu0 %vm81_vm2, %v1824_v61 }
0x2623   :  { %4128 = vmatprep.mubr.msk.f32.mxu0 %vm81_vm2, %v1825_v62  ;;  %4455 = vmatpush3.bf16.msra.mxu0 %v5194_v49 }
0x2624   :  { %4462 = vmatprep.subr.bf16.mxu0 %v4813_v0 }
0x2626   :  { %4129 = vmatmul.mubr.msk.f32.gmra.mrb[20].mxu0 %vm81_vm2, %v1826_v63  ;;  %v5225_v63 = vld [vmem:[#allocation5 + $0x63] ss:$0 sm:$0xff] }
0x2627   :  { %4131 = vmatprep.mubr.msk.f32.mxu0 %vm81_vm2, %v1827_v2 }
0x262a   :  { %4132 = vmatmul.mubr.msk.f32.gmra.mrb[22].mxu0 %vm81_vm2, %v1828_v3 }
0x262b   :  { %4134 = vmatprep.mubr.msk.f32.mxu0 %vm81_vm2, %v1829_v4 }
0x262e   :  { %4135 = vmatmul.mubr.msk.f32.gmra.mrb[24].mxu0 %vm81_vm2, %v1830_v5 }
0x262f   :  { %4137 = vmatprep.mubr.msk.f32.mxu0 %vm81_vm2, %v1831_v7 }
0x2632   :  { %4138 = vmatmul.mubr.msk.f32.gmra.mrb[26].mxu0 %vm81_vm2, %v1832_v8 }
0x2633   :  { %4140 = vmatprep.mubr.msk.f32.mxu0 %vm81_vm2, %v1833_v12 }
0x2636   :  { %4141 = vmatmul.mubr.msk.f32.gmra.mrb[28].mxu0 %vm81_vm2, %v1834_v13 }
0x26e9   :  { %v1677_v14 = vpop.f32.mrb[14].mxu0 }
0x26ea   :  { %v1678_v15 = vadd.f32 %v5122_v33, %v1677_v14  ;;  %v4102_v17 = vpop.f32.mrb[15].mxu0 }
0x26ec   :  { %1689 = vrot.lane.b32.xlu1 %v1678_v15, %s4817_s1  ;;  %v1681_v37 = vadd.f32 %v1678_v15, %v1608_v6 }
0x26ee   :  { %v3706_v38 = vmul.f32 -1.442695, %v1681_v37 }
0x26f0   :  { %4648 = vpow2.f32 %v3706_v38 }
0x26f1   :  { %v5154_v19 = vpop.f32.mrb[16].mxu0 }
0x26f2   :  { %v5156_v20 = vpop.f32.mrb[17].mxu0 }
0x26f3   :  { %v1956_v2 = vadd.f32 %v5225_v63, %v5156_v20 }
0x26f5   :  { %v5158_v21 = vpop.f32.mrb[18].mxu0 }
0x26f6   :  { %v5160_v22 = vpop.f32.mrb[19].mxu0 }
0x26f9   :  { %v5162_v11 = vpop.f32.mrb[20].mxu0 }
0x26fa   :  { %v5164_v23 = vpop.f32.mrb[21].mxu0  ;;  %v4649_v39 = vpop.eup %4648 }
0x26fb   :  { %v1685_v40 = vadd.f32 1.0, %v4649_v39 }
0x26fd   :  { %v5166_v24 = vpop.f32.mrb[22].mxu0  ;;  %4650 = vrcp.f32 %v1685_v40 }
0x26fe   :  { %v5168_v25 = vpop.f32.mrb[23].mxu0 }
0x2701   :  { %v5170_v26 = vpop.f32.mrb[24].mxu0 }
0x2702   :  { %v5172_v27 = vpop.f32.mrb[25].mxu0 }
0x2705   :  { %v5174_v28 = vpop.f32.mrb[26].mxu0 }
0x2706   :  { %v5176_v29 = vpop.f32.mrb[27].mxu0 }
0x2707   :  { %v4651_v10 = vpop.eup %4650 }
0x2708   :  { %v1699_v50 = vsub.f32 1.0, %v4651_v10  ;;  %v1705_v53 = vmul.f32 %v4651_v10, %v5130_v52 }
0x2709   :  { %v5178_v30 = vpop.f32.mrb[28].mxu0 }
0x270a   :  { %v5180_v31 = vpop.f32.mrb[29].mxu0 }
0x275e   :  { %v1690_v41 = vpop.permute.xlu1 %1689 }
0x275f   :  { %v1692_v42 = vmul.f32 %v4651_v10, %v1690_v41  ;;  %v1961_v41 = vadd.f32 %v5154_v19, %v5225_v63 }
0x2761   :  { %1694 = vrot.lane.b32.xlu1 %v1692_v42, %s4817_s1 }
0x27d3   :  { %v1695_v43 = vpop.permute.xlu1 %1694 }
0x27d4   :  { %v1697_v44 = vadd.f32 %v1695_v43, %v1608_v6 }
0x27d6   :  { %4652 = vtanh.f32 %v1697_v44 }
0x27e0   :  { %v4653_v45 = vpop.eup %4652 }
0x27e1   :  { %1701 = vrot.lane.b32.xlu0 %v4653_v45, %s4818_s6 }
0x2853   :  { %v1702_v51 = vpop.permute.xlu0 %1701 }
0x2854   :  { %v1704_v54 = vmul.f32 %v1702_v51, %v1699_v50 }
0x2856   :  { %v5199_v55 = vadd.f32 %v1705_v53, %v1704_v54 }
0x2858   :  { %1708 = vrot.lane.b32.xlu1 %v5199_v55, %s4818_s6 }
0x28ca   :  { %v1709_v56 = vpop.permute.xlu1 %1708 }
0x28cb   :  { %1711 = vst.msk [vmem:[#allocation2 + $0x70] sm:$0xff] %vm81_vm2, %v1709_v56  ;;  %4112 = vmatmul.mubr.msk.f32.vlgmr.msra.gmra.mrb[14].mxu1 %vm81_vm2, %v1709_v56 }
0x28cc   :  { %4428 = vmatpush3.bf16.msra.mxu1 %v5190_v48  ;;  %4154 = vmatprep.mubr.msk.f32.mxu1 %vm4814_vm0, %v4815_v1 }
0x28cd   :  { %4429 = vmatprep.subr.bf16.mxu1 %v4813_v0 }
0x28d0   :  { %4431 = vmatpush3.bf16.msra.mxu1 %v5194_v49 }
0x28d1   :  { %4432 = vmatprep.subr.bf16.mxu1 %v4813_v0 }
0x28d2   :  { %v1835_v52 = vld [vmem:[#allocation2 + $0x70] sm:$0xff] }
0x28d3   :  { %4155 = vmatmul.mubr.f32.vlgmr.msra.gmra.mrb[16].mxu1 %v4815_v1  ;;  %4143 = vmatprep.mubr.msk.f32.mxu0 %vm81_vm2, %v1835_v52 }
0x28d4   :  { %4434 = vmatpush3.bf16.msra.mxu1 %v5190_v48  ;;  %4165 = vmatprep.mubr.msk.f32.mxu1 %vm4814_vm0, %v4815_v1 }
0x28d5   :  { %4435 = vmatprep.subr.bf16.mxu1 %v4813_v0 }
0x28d8   :  { %4437 = vmatpush3.bf16.msra.mxu1 %v5194_v49 }
0x28d9   :  { %4438 = vmatprep.subr.bf16.mxu1 %v4813_v0 }
0x299e   :  { %v5219_v57 = vpop.f32.mrb[14].mxu1 }
0x299f   :  { %v4113_v58 = vpop.f32.mrb[15].mxu1 }
0x29a6   :  { %v2100_v60 = vpop.f32.mrb[16].mxu1 }
0x29a7   :  { %v2101_v61 = vadd.f32 %v5221_v59, %v2100_v60  ;;  %v4156_v62 = vpop.f32.mrb[17].mxu1 }
0x29a9   :  { %2112 = vrot.lane.b32.xlu0 %v2101_v61, %s4817_s1  ;;  %v2104_v3 = vadd.f32 %v2101_v61, %v1956_v2 }
0x29ab   :  { %v3726_v4 = vmul.f32 -1.442695, %v2104_v3 }
0x29ad   :  { %4654 = vpow2.f32 %v3726_v4 }
0x29b7   :  { %v4655_v5 = vpop.eup %4654 }
0x29b8   :  { %v2108_v7 = vadd.f32 1.0, %v4655_v5 }
0x29ba   :  { %4656 = vrcp.f32 %v2108_v7 }
0x29c4   :  { %v4657_v8 = vpop.eup %4656 }
0x29c5   :  { %v2122_v32 = vsub.f32 1.0, %v4657_v8  ;;  %v2128_v20 = vmul.f32 0.0, %v4657_v8 }
0x2a1b   :  { %v2113_v12 = vpop.permute.xlu0 %2112 }
0x2a1c   :  { %v2115_v13 = vmul.f32 %v4657_v8, %v2113_v12 }
0x2a1e   :  { %2117 = vrot.lane.b32.xlu1 %v2115_v13, %s4817_s1 }
0x2a90   :  { %v2118_v14 = vpop.permute.xlu1 %2117 }
0x2a91   :  { %v2120_v15 = vadd.f32 %v2118_v14, %v1956_v2  ;;  %v1966_v2 = vadd.f32 %v5225_v63, %v5160_v22  ;;  %v4833_v14 = vmov 15  }
0x2a92   :  { %4563 = vset.pattern.permute.xlu0 %v4833_v14 }
0x2a93   :  { %4658 = vtanh.f32 %v2120_v15 }
0x2a9d   :  { %v4659_v17 = vpop.eup %4658 }
0x2a9e   :  { %2124 = vrot.lane.b32.xlu0 %v4659_v17, %s4818_s6 }
0x2b10   :  { %v2125_v35 = vpop.permute.xlu0 %2124 }
0x2b11   :  { %v2127_v6 = vmul.f32 %v2125_v35, %v2122_v32 }
0x2b13   :  { %v2129_v37 = vadd.f32 %v2128_v20, %v2127_v6 }
0x2b15   :  { %2131 = vrot.lane.b32.xlu1 %v2129_v37, %s4818_s6 }
0x2b87   :  { %v2132_v38 = vpop.permute.xlu1 %2131 }
0x2b88   :  { %4166 = vmatmul.mubr.msk.f32.vlgmr.msra.gmra.mrb[18].mxu1 %vm81_vm2, %v2132_v38  ;;  %v1787_v38 = vadd.f32 %v5122_v33, %v5219_v57 }
0x2b89   :  { %4440 = vmatpush3.bf16.msra.mxu1 %v5190_v48  ;;  %4176 = vmatprep.mubr.msk.f32.mxu1 %vm4814_vm0, %v4815_v1 }
0x2b8a   :  { %4441 = vmatprep.subr.bf16.mxu1 %v4813_v0 }
0x2b8d   :  { %4443 = vmatpush3.bf16.msra.mxu1 %v5194_v49 }
0x2b8e   :  { %4444 = vmatprep.subr.bf16.mxu1 %v4813_v0 }
0x2c5b   :  { %v2201_v39 = vpop.f32.mrb[18].mxu1 }
0x2c5c   :  { %v2202_v40 = vadd.f32 %v5221_v59, %v2201_v39  ;;  %v4167_v10 = vpop.f32.mrb[19].mxu1 }
0x2c5e   :  { %2213 = vrot.lane.b32.xlu0 %v2202_v40, %s4817_s1  ;;  %v2205_v42 = vadd.f32 %v2202_v40, %v1961_v41 }
0x2c60   :  { %v3728_v43 = vmul.f32 -1.442695, %v2205_v42 }
0x2c62   :  { %4660 = vpow2.f32 %v3728_v43 }
0x2c6c   :  { %v4661_v44 = vpop.eup %4660 }
0x2c6d   :  { %v2209_v45 = vadd.f32 1.0, %v4661_v44 }
0x2c6f   :  { %4662 = vrcp.f32 %v2209_v45 }
0x2c79   :  { %v4663_v46 = vpop.eup %4662 }
0x2c7a   :  { %v2223_v53 = vsub.f32 1.0, %v4663_v46  ;;  %v2229_v19 = vmul.f32 %v4663_v46, %v2129_v37 }
0x2cd0   :  { %v2214_v47 = vpop.permute.xlu0 %2213 }
0x2cd1   :  { %v2216_v16 = vmul.f32 %v4663_v46, %v2214_v47 }
0x2cd3   :  { %2218 = vrot.lane.b32.xlu1 %v2216_v16, %s4817_s1 }
0x2d45   :  { %v2219_v18 = vpop.permute.xlu1 %2218 }
0x2d46   :  { %v2221_v50 = vadd.f32 %v2219_v18, %v1961_v41 }
0x2d48   :  { %4664 = vtanh.f32 %v2221_v50 }
0x2d52   :  { %v4665_v51 = vpop.eup %4664 }
0x2d53   :  { %2225 = vrot.lane.b32.xlu0 %v4665_v51, %s4818_s6 }
0x2dc5   :  { %v2226_v54 = vpop.permute.xlu0 %2225 }
0x2dc6   :  { %v2228_v56 = vmul.f32 %v2226_v54, %v2223_v53 }
0x2dc8   :  { %v2230_v52 = vadd.f32 %v2229_v19, %v2228_v56  ;;  %v1971_v56 = vadd.f32 %v5158_v21, %v5225_v63 }
0x2dca   :  { %2232 = vrot.lane.b32.xlu1 %v2230_v52, %s4818_s6 }
0x2e3c   :  { %v2233_v58 = vpop.permute.xlu1 %2232 }
0x2e3d   :  { %4177 = vmatmul.mubr.msk.f32.vlgmr.msra.gmra.mrb[20].mxu1 %vm81_vm2, %v2233_v58 }
0x2e3e   :  { %4446 = vmatpush3.bf16.msra.mxu1 %v5190_v48  ;;  %4187 = vmatprep.mubr.msk.f32.mxu1 %vm4814_vm0, %v4815_v1 }
0x2e3f   :  { %4447 = vmatprep.subr.bf16.mxu1 %v4813_v0 }
0x2e42   :  { %4449 = vmatpush3.bf16.msra.mxu1 %v5194_v49 }
0x2e43   :  { %4456 = vmatprep.subr.bf16.mxu1 %v4813_v0 }
0x2f10   :  { %v2302_v60 = vpop.f32.mrb[20].mxu1 }
0x2f11   :  { %v2303_v61 = vadd.f32 %v5221_v59, %v2302_v60  ;;  %v4178_v62 = vpop.f32.mrb[21].mxu1 }
0x2f13   :  { %2314 = vrot.lane.b32.xlu0 %v2303_v61, %s4817_s1  ;;  %v2306_v3 = vadd.f32 %v2303_v61, %v1966_v2 }
0x2f15   :  { %v3730_v4 = vmul.f32 -1.442695, %v2306_v3 }
0x2f17   :  { %4666 = vpow2.f32 %v3730_v4 }
0x2f21   :  { %v4667_v5 = vpop.eup %4666 }
0x2f22   :  { %v2310_v7 = vadd.f32 1.0, %v4667_v5 }
0x2f24   :  { %4668 = vrcp.f32 %v2310_v7 }
0x2f2e   :  { %v4669_v8 = vpop.eup %4668 }
0x2f2f   :  { %v2324_v22 = vsub.f32 1.0, %v4669_v8  ;;  %v2330_v20 = vmul.f32 %v4669_v8, %v2230_v52 }
0x2f85   :  { %v2315_v12 = vpop.permute.xlu0 %2314 }
0x2f86   :  { %v2317_v13 = vmul.f32 %v4669_v8, %v2315_v12 }
0x2f88   :  { %2319 = vrot.lane.b32.xlu1 %v2317_v13, %s4817_s1 }
0x2ffa   :  { %v2320_v15 = vpop.permute.xlu1 %2319 }
0x2ffb   :  { %v2322_v17 = vadd.f32 %v2320_v15, %v1966_v2 }
0x2ffd   :  { %4670 = vtanh.f32 %v2322_v17 }
0x3007   :  { %v4671_v32 = vpop.eup %4670 }
0x3008   :  { %2326 = vrot.lane.b32.xlu0 %v4671_v32, %s4818_s6 }
0x300c   :  { %1713 = vperm.xlu0 %4563, %v4889_v9  }
0x307a   :  { %v2327_v35 = vpop.permute.xlu0 %2326 }
0x307b   :  { %v2329_v6 = vmul.f32 %v2327_v35, %v2324_v22 }
0x307d   :  { %v2331_v37 = vadd.f32 %v2330_v20, %v2329_v6 }
0x307f   :  { %2333 = vrot.lane.b32.xlu1 %v2331_v37, %s4818_s6 }
0x3083   :  { %1798 = vrot.lane.b32.xlu1 %v1787_v38, %s4817_s1 }
0x308b   :  { %v1714_v39 = vpop.permute.xlu0 %1713 }
0x308c   :  { %v1716_v40 = vmul.f32 %v5182_v34, %v1714_v39 }
0x308e   :  { %v1717_v10 = vadd.f32 %v5185_v36, %v1716_v40 }
0x3090   :  { %v1790_v41 = vadd.f32 %v1787_v38, %v1717_v10 }
0x3092   :  { %v3708_v42 = vmul.f32 -1.442695, %v1790_v41 }
0x3094   :  { %4672 = vpow2.f32 %v3708_v42 }
0x309e   :  { %v4673_v9 = vpop.eup %4672 }
0x309f   :  { %v1794_v43 = vadd.f32 1.0, %v4673_v9 }
0x30a1   :  { %4674 = vrcp.f32 %v1794_v43 }
0x30ab   :  { %v4675_v33 = vpop.eup %4674 }
0x30ac   :  { %v1808_v50 = vsub.f32 1.0, %v4675_v33  ;;  %v1814_v53 = vmul.f32 %v4675_v33, %v5199_v55 }
0x30f1   :  { %v2334_v44 = vpop.permute.xlu1 %2333 }
0x30f2   :  { %4188 = vmatmul.mubr.msk.f32.vlgmr.msra.gmra.mrb[22].mxu1 %vm81_vm2, %v2334_v44 }
0x30f3   :  { %4458 = vmatpush3.bf16.msra.mxu1 %v5190_v48  ;;  %4209 = vmatprep.mubr.msk.f32.mxu1 %vm4814_vm0, %v4815_v1 }
0x30f4   :  { %4459 = vmatprep.subr.bf16.mxu1 %v4813_v0 }
0x30f5   :  { %v1799_v34 = vpop.permute.xlu1 %1798 }
0x30f6   :  { %v1801_v57 = vmul.f32 %v4675_v33, %v1799_v34 }
0x30f7   :  { %4461 = vmatpush3.bf16.msra.mxu1 %v5194_v49 }
0x30f8   :  { %1803 = vrot.lane.b32.xlu0 %v1801_v57, %s4817_s1  ;;  %4468 = vmatprep.subr.bf16.mxu1 %v4813_v0 }
0x316a   :  { %v1804_v36 = vpop.permute.xlu0 %1803 }
0x316b   :  { %v1806_v45 = vadd.f32 %v1804_v36, %v1717_v10 }
0x316d   :  { %4676 = vtanh.f32 %v1806_v45 }
0x3177   :  { %v4677_v46 = vpop.eup %4676 }
0x3178   :  { %1810 = vrot.lane.b32.xlu0 %v4677_v46, %s4818_s6 }
0x31c5   :  { %v2403_v47 = vpop.f32.mrb[22].mxu1 }
0x31c6   :  { %v2404_v16 = vadd.f32 %v5221_v59, %v2403_v47  ;;  %v4189_v18 = vpop.f32.mrb[23].mxu1 }
0x31c8   :  { %2415 = vrot.lane.b32.xlu1 %v2404_v16, %s4817_s1  ;;  %v2407_v52 = vadd.f32 %v2404_v16, %v1971_v56 }
0x31ca   :  { %v3732_v58 = vmul.f32 -1.442695, %v2407_v52 }
0x31cc   :  { %4678 = vpow2.f32 %v3732_v58 }
0x31d6   :  { %v4679_v60 = vpop.eup %4678 }
0x31d7   :  { %v2411_v61 = vadd.f32 1.0, %v4679_v60 }
0x31d9   :  { %4680 = vrcp.f32 %v2411_v61 }
0x31e3   :  { %v4681_v62 = vpop.eup %4680 }
0x31e4   :  { %v2425_v8 = vsub.f32 1.0, %v4681_v62  ;;  %v2431_v13 = vmul.f32 %v4681_v62, %v2331_v37  ;;  %v1976_v37 = vadd.f32 %v5225_v63, %v5164_v23 }
0x31ea   :  { %v1811_v51 = vpop.permute.xlu0 %1810 }
0x31eb   :  { %v1813_v54 = vmul.f32 %v1811_v51, %v1808_v50  ;;  %v1981_v50 = vadd.f32 %v5162_v11, %v5225_v63 }
0x31ed   :  { %v1815_v19 = vadd.f32 %v1814_v53, %v1813_v54 }
0x31ef   :  { %1817 = vrot.lane.b32.xlu0 %v1815_v19, %s4818_s6 }
0x323a   :  { %v2416_v2 = vpop.permute.xlu1 %2415 }
0x323b   :  { %v2418_v3 = vmul.f32 %v4681_v62, %v2416_v2 }
0x323d   :  { %2420 = vrot.lane.b32.xlu1 %v2418_v3, %s4817_s1 }
0x3261   :  { %v1818_v4 = vpop.permute.xlu0 %1817 }
0x3262   :  { %1820 = vst.msk [vmem:[#allocation2 + $0x78] sm:$0xff] %vm81_vm2, %v1818_v4 }
0x3269   :  { %v1836_v55 = vld [vmem:[#allocation2 + $0x78] sm:$0xff] }
0x326a   :  { %4144 = vmatmul.mubr.msk.f32.gmra.mrb[30].mxu0 %vm81_vm2, %v1836_v55 }
0x326b   :  { %4198 = vmatprep.mubr.msk.f32.mxu0 %vm4814_vm0, %v4815_v1 }
0x32af   :  { %v2421_v21 = vpop.permute.xlu1 %2420 }
0x32b0   :  { %v2423_v5 = vadd.f32 %v2421_v21, %v1971_v56 }
0x32b2   :  { %4682 = vtanh.f32 %v2423_v5 }
0x32bc   :  { %v4683_v7 = vpop.eup %4682 }
0x32bd   :  { %2427 = vrot.lane.b32.xlu1 %v4683_v7, %s4818_s6 }
0x332f   :  { %v2428_v12 = vpop.permute.xlu1 %2427 }
0x3330   :  { %v2430_v14 = vmul.f32 %v2428_v12, %v2425_v8  ;;  %v1986_v12 = vadd.f32 %v5225_v63, %v5168_v25 }
0x3332   :  { %v2432_v15 = vadd.f32 %v2431_v13, %v2430_v14 }
0x3334   :  { %2434 = vrot.lane.b32.xlu1 %v2432_v15, %s4818_s6 }
0x333d   :  { %v5288_v17 = vpop.f32.mrb[30].mxu0 }
0x333e   :  { %v5290_v32 = vpop.f32.mrb[31].mxu0 }
0x33a6   :  { %v2435_v22 = vpop.permute.xlu1 %2434 }
0x33a7   :  { %4199 = vmatmul.mubr.msk.f32.vlgmr.msra.gmra.mrb[32].mxu0 %vm81_vm2, %v2435_v22 }
0x33a8   :  { %4464 = vmatpush3.bf16.msra.mxu0 %v5190_v48  ;;  %4220 = vmatprep.mubr.msk.f32.mxu0 %vm4814_vm0, %v4815_v1 }
0x33a9   :  { %4465 = vmatprep.subr.bf16.mxu0 %v4813_v0 }
0x33ac   :  { %4467 = vmatpush3.bf16.msra.mxu0 %v5194_v49 }
0x33ad   :  { %4474 = vmatprep.subr.bf16.mxu0 %v4813_v0 }
0x347a   :  { %v2504_v35 = vpop.f32.mrb[32].mxu0 }
0x347b   :  { %v2505_v20 = vadd.f32 %v5221_v59, %v2504_v35  ;;  %v4200_v6 = vpop.f32.mrb[33].mxu0 }
0x347d   :  { %2516 = vrot.lane.b32.xlu0 %v2505_v20, %s4817_s1  ;;  %v2508_v38 = vadd.f32 %v2505_v20, %v1976_v37 }
0x347f   :  { %v3734_v39 = vmul.f32 -1.442695, %v2508_v38 }
0x3481   :  { %4684 = vpow2.f32 %v3734_v39 }
0x348b   :  { %v4685_v40 = vpop.eup %4684 }
0x348c   :  { %v2512_v10 = vadd.f32 1.0, %v4685_v40 }
0x348e   :  { %4686 = vrcp.f32 %v2512_v10 }
0x3498   :  { %v4687_v41 = vpop.eup %4686 }
0x3499   :  { %v2526_v34 = vsub.f32 1.0, %v4687_v41  ;;  %v2532_v23 = vmul.f32 %v4687_v41, %v2432_v15 }
0x34ef   :  { %v2517_v42 = vpop.permute.xlu0 %2516 }
0x34f0   :  { %v2519_v9 = vmul.f32 %v4687_v41, %v2517_v42 }
0x34f2   :  { %2521 = vrot.lane.b32.xlu1 %v2519_v9, %s4817_s1 }
0x3564   :  { %v2522_v43 = vpop.permute.xlu1 %2521 }
0x3565   :  { %v2524_v44 = vadd.f32 %v2522_v43, %v1976_v37 }
0x3567   :  { %4688 = vtanh.f32 %v2524_v44 }
0x3571   :  { %v4689_v33 = vpop.eup %4688 }
0x3572   :  { %2528 = vrot.lane.b32.xlu0 %v4689_v33, %s4818_s6 }
0x35e4   :  { %v2529_v57 = vpop.permute.xlu0 %2528 }
0x35e5   :  { %v2531_v36 = vmul.f32 %v2529_v57, %v2526_v34  ;;  %v1991_v34 = vadd.f32 %v5166_v24, %v5225_v63 }
0x35e7   :  { %v2533_v45 = vadd.f32 %v2532_v23, %v2531_v36 }
0x35e9   :  { %2535 = vrot.lane.b32.xlu1 %v2533_v45, %s4818_s6 }
0x365b   :  { %v2536_v46 = vpop.permute.xlu1 %2535 }
0x365c   :  { %4210 = vmatmul.mubr.msk.f32.vlgmr.msra.gmra.mrb[24].mxu1 %vm81_vm2, %v2536_v46 }
0x365d   :  { %4470 = vmatpush3.bf16.msra.mxu1 %v5190_v48  ;;  %4231 = vmatprep.mubr.msk.f32.mxu1 %vm4814_vm0, %v4815_v1 }
0x365e   :  { %4471 = vmatprep.subr.bf16.mxu1 %v4813_v0 }
0x3661   :  { %4473 = vmatpush3.bf16.msra.mxu1 %v5194_v49 }
0x3662   :  { %4480 = vmatprep.subr.bf16.mxu1 %v4813_v0 }
0x372f   :  { %v2605_v47 = vpop.f32.mrb[24].mxu1 }
0x3730   :  { %v2606_v16 = vadd.f32 %v5221_v59, %v2605_v47  ;;  %v4211_v18 = vpop.f32.mrb[25].mxu1 }
0x3732   :  { %2617 = vrot.lane.b32.xlu0 %v2606_v16, %s4817_s1  ;;  %v2609_v51 = vadd.f32 %v2606_v16, %v1981_v50 }
0x3734   :  { %v3736_v53 = vmul.f32 -1.442695, %v2609_v51 }
0x3736   :  { %4690 = vpow2.f32 %v3736_v53 }
0x3740   :  { %v4691_v54 = vpop.eup %4690 }
0x3741   :  { %v2613_v19 = vadd.f32 1.0, %v4691_v54 }
0x3743   :  { %4692 = vrcp.f32 %v2613_v19 }
0x374d   :  { %v4693_v56 = vpop.eup %4692 }
0x374e   :  { %v2627_v2 = vsub.f32 1.0, %v4693_v56  ;;  %v2633_v11 = vmul.f32 %v4693_v56, %v2533_v45 }
0x37a4   :  { %v2618_v52 = vpop.permute.xlu0 %2617 }
0x37a5   :  { %v2620_v58 = vmul.f32 %v4693_v56, %v2618_v52 }
0x37a7   :  { %2622 = vrot.lane.b32.xlu1 %v2620_v58, %s4817_s1 }
0x3819   :  { %v2623_v60 = vpop.permute.xlu1 %2622 }
0x381a   :  { %v2625_v61 = vadd.f32 %v2623_v60, %v1981_v50 }
0x381c   :  { %4694 = vtanh.f32 %v2625_v61 }
0x3826   :  { %v4695_v62 = vpop.eup %4694 }
0x3827   :  { %2629 = vrot.lane.b32.xlu0 %v4695_v62, %s4818_s6  ;;  %v1996_v62 = vadd.f32 %v5225_v63, %v5172_v27 }
0x3899   :  { %v2630_v3 = vpop.permute.xlu0 %2629 }
0x389a   :  { %v2632_v4 = vmul.f32 %v2630_v3, %v2627_v2 }
0x389c   :  { %v2634_v55 = vadd.f32 %v2633_v11, %v2632_v4 }
0x389e   :  { %2636 = vrot.lane.b32.xlu1 %v2634_v55, %s4818_s6 }
0x3910   :  { %v2637_v21 = vpop.permute.xlu1 %2636 }
0x3911   :  { %4221 = vmatmul.mubr.msk.f32.vlgmr.msra.gmra.mrb[34].mxu0 %vm81_vm2, %v2637_v21 }
0x3912   :  { %4476 = vmatpush3.bf16.msra.mxu0 %v5190_v48  ;;  %4242 = vmatprep.mubr.msk.f32.mxu0 %vm4814_vm0, %v4815_v1 }
0x3913   :  { %4477 = vmatprep.subr.bf16.mxu0 %v4813_v0 }
0x3916   :  { %4479 = vmatpush3.bf16.msra.mxu0 %v5194_v49 }
0x3917   :  { %4486 = vmatprep.subr.bf16.mxu0 %v4813_v0 }
0x39e4   :  { %v2706_v5 = vpop.f32.mrb[34].mxu0 }
0x39e5   :  { %v2707_v7 = vadd.f32 %v5221_v59, %v2706_v5  ;;  %v4222_v8 = vpop.f32.mrb[35].mxu0 }
0x39e7   :  { %2718 = vrot.lane.b32.xlu0 %v2707_v7, %s4817_s1  ;;  %v2710_v13 = vadd.f32 %v2707_v7, %v1986_v12 }
0x39e9   :  { %v3738_v14 = vmul.f32 -1.442695, %v2710_v13 }
0x39eb   :  { %4696 = vpow2.f32 %v3738_v14 }
0x39f5   :  { %v4697_v15 = vpop.eup %4696 }
0x39f6   :  { %v2714_v22 = vadd.f32 1.0, %v4697_v15 }
0x39f8   :  { %4698 = vrcp.f32 %v2714_v22 }
0x3a02   :  { %v4699_v35 = vpop.eup %4698 }
0x3a03   :  { %v2728_v40 = vsub.f32 1.0, %v4699_v35  ;;  %v2734_v25 = vmul.f32 %v4699_v35, %v2634_v55 }
0x3a59   :  { %v2719_v20 = vpop.permute.xlu0 %2718 }
0x3a5a   :  { %v2721_v6 = vmul.f32 %v4699_v35, %v2719_v20 }
0x3a5c   :  { %2723 = vrot.lane.b32.xlu1 %v2721_v6, %s4817_s1 }
0x3ace   :  { %v2724_v37 = vpop.permute.xlu1 %2723 }
0x3acf   :  { %v2726_v38 = vadd.f32 %v2724_v37, %v1986_v12 }
0x3ad1   :  { %4700 = vtanh.f32 %v2726_v38  ;;  %v2001_v38 = vadd.f32 %v5170_v26, %v5225_v63 }
0x3adb   :  { %v4701_v39 = vpop.eup %4700 }
0x3adc   :  { %2730 = vrot.lane.b32.xlu0 %v4701_v39, %s4818_s6 }
0x3b4e   :  { %v2731_v10 = vpop.permute.xlu0 %2730 }
0x3b4f   :  { %v2733_v41 = vmul.f32 %v2731_v10, %v2728_v40 }
0x3b51   :  { %v2735_v42 = vadd.f32 %v2734_v25, %v2733_v41 }
0x3b53   :  { %2737 = vrot.lane.b32.xlu1 %v2735_v42, %s4818_s6 }
0x3bc5   :  { %v2738_v9 = vpop.permute.xlu1 %2737 }
0x3bc6   :  { %4232 = vmatmul.mubr.msk.f32.vlgmr.msra.gmra.mrb[26].mxu1 %vm81_vm2, %v2738_v9 }
0x3bc7   :  { %4482 = vmatpush3.bf16.msra.mxu1 %v5190_v48  ;;  %4253 = vmatprep.mubr.msk.f32.mxu1 %vm4814_vm0, %v4815_v1 }
0x3bc8   :  { %4483 = vmatprep.subr.bf16.mxu1 %v4813_v0 }
0x3bcb   :  { %4485 = vmatpush3.bf16.msra.mxu1 %v5194_v49 }
0x3bcc   :  { %4492 = vmatprep.subr.bf16.mxu1 %v4813_v0 }
0x3c99   :  { %v2807_v43 = vpop.f32.mrb[26].mxu1 }
0x3c9a   :  { %v2808_v44 = vadd.f32 %v5221_v59, %v2807_v43  ;;  %v4233_v33 = vpop.f32.mrb[27].mxu1 }
0x3c9c   :  { %2819 = vrot.lane.b32.xlu0 %v2808_v44, %s4817_s1  ;;  %v2811_v57 = vadd.f32 %v2808_v44, %v1991_v34 }
0x3c9e   :  { %v3740_v23 = vmul.f32 -1.442695, %v2811_v57 }
0x3ca0   :  { %4702 = vpow2.f32 %v3740_v23 }
0x3caa   :  { %v4703_v36 = vpop.eup %4702 }
0x3cab   :  { %v2815_v45 = vadd.f32 1.0, %v4703_v36 }
0x3cad   :  { %4704 = vrcp.f32 %v2815_v45 }
0x3cb7   :  { %v4705_v46 = vpop.eup %4704 }
0x3cb8   :  { %v2829_v53 = vsub.f32 1.0, %v4705_v46  ;;  %v2835_v24 = vmul.f32 %v4705_v46, %v2735_v42 }
0x3d0e   :  { %v2820_v47 = vpop.permute.xlu0 %2819 }
0x3d0f   :  { %v2822_v16 = vmul.f32 %v4705_v46, %v2820_v47 }
0x3d11   :  { %2824 = vrot.lane.b32.xlu1 %v2822_v16, %s4817_s1 }
0x3d83   :  { %v2825_v18 = vpop.permute.xlu1 %2824 }
0x3d84   :  { %v2827_v50 = vadd.f32 %v2825_v18, %v1991_v34  ;;  %v2006_v18 = vadd.f32 %v5225_v63, %v5176_v29 }
0x3d86   :  { %4706 = vtanh.f32 %v2827_v50 }
0x3d90   :  { %v4707_v51 = vpop.eup %4706 }
0x3d91   :  { %2831 = vrot.lane.b32.xlu0 %v4707_v51, %s4818_s6 }
0x3e03   :  { %v2832_v54 = vpop.permute.xlu0 %2831 }
0x3e04   :  { %v2834_v19 = vmul.f32 %v2832_v54, %v2829_v53 }
0x3e06   :  { %v2836_v56 = vadd.f32 %v2835_v24, %v2834_v19 }
0x3e08   :  { %2838 = vrot.lane.b32.xlu1 %v2836_v56, %s4818_s6 }
0x3e7a   :  { %v2839_v52 = vpop.permute.xlu1 %2838 }
0x3e7b   :  { %4243 = vmatmul.mubr.msk.f32.vlgmr.msra.gmra.mrb[36].mxu0 %vm81_vm2, %v2839_v52 }
0x3e7c   :  { %4488 = vmatpush3.bf16.msra.mxu0 %v5190_v48  ;;  %4264 = vmatprep.mubr.msk.f32.mxu0 %vm4814_vm0, %v4815_v1 }
0x3e7d   :  { %4489 = vmatprep.subr.bf16.mxu0 %v4813_v0 }
0x3e80   :  { %4491 = vmatpush3.bf16.msra.mxu0 %v5194_v49 }
0x3e81   :  { %4498 = vmatprep.subr.bf16.mxu0 %v4813_v0 }
0x3f4e   :  { %v2908_v58 = vpop.f32.mrb[36].mxu0 }
0x3f4f   :  { %v2909_v60 = vadd.f32 %v5221_v59, %v2908_v58  ;;  %v4244_v61 = vpop.f32.mrb[37].mxu0 }
0x3f51   :  { %2920 = vrot.lane.b32.xlu0 %v2909_v60, %s4817_s1  ;;  %v2912_v2 = vadd.f32 %v2909_v60, %v1996_v62 }
0x3f53   :  { %v3742_v3 = vmul.f32 -1.442695, %v2912_v2 }
0x3f55   :  { %4708 = vpow2.f32 %v3742_v3 }
0x3f5f   :  { %v4709_v11 = vpop.eup %4708 }
0x3f60   :  { %v2916_v4 = vadd.f32 1.0, %v4709_v11 }
0x3f62   :  { %4710 = vrcp.f32 %v2916_v4 }
0x3f6c   :  { %v4711_v55 = vpop.eup %4710 }
0x3f6d   :  { %v2930_v13 = vsub.f32 1.0, %v4711_v55  ;;  %v2936_v27 = vmul.f32 %v4711_v55, %v2836_v56 }
0x3fc3   :  { %v2921_v21 = vpop.permute.xlu0 %2920 }
0x3fc4   :  { %v2923_v5 = vmul.f32 %v4711_v55, %v2921_v21 }
0x3fc6   :  { %2925 = vrot.lane.b32.xlu1 %v2923_v5, %s4817_s1  ;;  %v2011_v5 = vadd.f32 %v5174_v28, %v5225_v63 }
0x4038   :  { %v2926_v7 = vpop.permute.xlu1 %2925 }
0x4039   :  { %v2928_v8 = vadd.f32 %v2926_v7, %v1996_v62 }
0x403b   :  { %4712 = vtanh.f32 %v2928_v8 }
0x4045   :  { %v4713_v12 = vpop.eup %4712 }
0x4046   :  { %2932 = vrot.lane.b32.xlu0 %v4713_v12, %s4818_s6 }
0x40b8   :  { %v2933_v14 = vpop.permute.xlu0 %2932 }
0x40b9   :  { %v2935_v15 = vmul.f32 %v2933_v14, %v2930_v13 }
0x40bb   :  { %v2937_v22 = vadd.f32 %v2936_v27, %v2935_v15 }
0x40bd   :  { %2939 = vrot.lane.b32.xlu1 %v2937_v22, %s4818_s6 }
0x412f   :  { %v2940_v35 = vpop.permute.xlu1 %2939 }
0x4130   :  { %4254 = vmatmul.mubr.msk.f32.vlgmr.msra.gmra.mrb[28].mxu1 %vm81_vm2, %v2940_v35 }
0x4131   :  { %4494 = vmatpush3.bf16.msra.mxu1 %v5190_v48  ;;  %4275 = vmatprep.mubr.msk.f32.mxu1 %vm4814_vm0, %v4815_v1 }
0x4132   :  { %4495 = vmatprep.subr.bf16.mxu1 %v4813_v0 }
0x4135   :  { %4497 = vmatpush3.bf16.msra.mxu1 %v5194_v49 }
0x4136   :  { %4504 = vmatprep.subr.bf16.mxu1 %v4813_v0 }
0x4203   :  { %v3009_v20 = vpop.f32.mrb[28].mxu1 }
0x4204   :  { %v3010_v6 = vadd.f32 %v5221_v59, %v3009_v20  ;;  %v4255_v37 = vpop.f32.mrb[29].mxu1 }
0x4206   :  { %3021 = vrot.lane.b32.xlu0 %v3010_v6, %s4817_s1  ;;  %v3013_v39 = vadd.f32 %v3010_v6, %v2001_v38 }
0x4208   :  { %v3744_v40 = vmul.f32 -1.442695, %v3013_v39 }
0x420a   :  { %4714 = vpow2.f32 %v3744_v40 }
0x4214   :  { %v4715_v10 = vpop.eup %4714 }
0x4215   :  { %v3017_v25 = vadd.f32 1.0, %v4715_v10 }
0x4217   :  { %4716 = vrcp.f32 %v3017_v25 }
0x4221   :  { %v4717_v41 = vpop.eup %4716 }
0x4222   :  { %v3031_v34 = vsub.f32 1.0, %v4717_v41  ;;  %v3037_v26 = vmul.f32 %v4717_v41, %v2937_v22 }
0x4278   :  { %v3022_v42 = vpop.permute.xlu0 %3021 }
0x4279   :  { %v3024_v9 = vmul.f32 %v4717_v41, %v3022_v42  ;;  %v2016_v42 = vadd.f32 %v5225_v63, %v5180_v31 }
0x427b   :  { %3026 = vrot.lane.b32.xlu1 %v3024_v9, %s4817_s1 }
0x42ed   :  { %v3027_v43 = vpop.permute.xlu1 %3026 }
0x42ee   :  { %v3029_v44 = vadd.f32 %v3027_v43, %v2001_v38 }
0x42f0   :  { %4718 = vtanh.f32 %v3029_v44 }
0x42fa   :  { %v4719_v33 = vpop.eup %4718 }
0x42fb   :  { %3033 = vrot.lane.b32.xlu0 %v4719_v33, %s4818_s6 }
0x436d   :  { %v3034_v57 = vpop.permute.xlu0 %3033 }
0x436e   :  { %v3036_v23 = vmul.f32 %v3034_v57, %v3031_v34 }
0x4370   :  { %v3038_v36 = vadd.f32 %v3037_v26, %v3036_v23 }
0x4372   :  { %3040 = vrot.lane.b32.xlu1 %v3038_v36, %s4818_s6 }
0x43e4   :  { %v3041_v45 = vpop.permute.xlu1 %3040 }
0x43e5   :  { %4265 = vmatmul.mubr.msk.f32.vlgmr.msra.gmra.mrb[38].mxu0 %vm81_vm2, %v3041_v45 }
0x43e6   :  { %4500 = vmatpush3.bf16.msra.mxu0 %v5190_v48  ;;  %4286 = vmatprep.mubr.msk.f32.mxu0 %vm4814_vm0, %v4815_v1 }
0x43e7   :  { %4501 = vmatprep.subr.bf16.mxu0 %v4813_v0 }
0x43ea   :  { %4503 = vmatpush3.bf16.msra.mxu0 %v5194_v49 }
0x43eb   :  { %4510 = vmatprep.subr.bf16.mxu0 %v4813_v0 }
0x44b8   :  { %v3110_v46 = vpop.f32.mrb[38].mxu0 }
0x44b9   :  { %v3111_v47 = vadd.f32 %v5221_v59, %v3110_v46  ;;  %v4266_v16 = vpop.f32.mrb[39].mxu0 }
0x44bb   :  { %3122 = vrot.lane.b32.xlu0 %v3111_v47, %s4817_s1  ;;  %v3114_v50 = vadd.f32 %v3111_v47, %v2006_v18 }
0x44bd   :  { %v3746_v51 = vmul.f32 -1.442695, %v3114_v50 }
0x44bf   :  { %4720 = vpow2.f32 %v3746_v51 }
0x44c9   :  { %v4721_v53 = vpop.eup %4720 }
0x44ca   :  { %v3118_v54 = vadd.f32 1.0, %v4721_v53 }
0x44cc   :  { %4722 = vrcp.f32 %v3118_v54 }
0x44d6   :  { %v4723_v24 = vpop.eup %4722 }
0x44d7   :  { %v3132_v61 = vsub.f32 1.0, %v4723_v24  ;;  %v3138_v29 = vmul.f32 %v4723_v24, %v3038_v36 }
0x452d   :  { %v3123_v19 = vpop.permute.xlu0 %3122 }
0x452e   :  { %v3125_v56 = vmul.f32 %v4723_v24, %v3123_v19  ;;  %v2021_v24 = vadd.f32 %v5178_v30, %v5225_v63 }
0x4530   :  { %3127 = vrot.lane.b32.xlu1 %v3125_v56, %s4817_s1 }
0x45a2   :  { %v3128_v52 = vpop.permute.xlu1 %3127 }
0x45a3   :  { %v3130_v58 = vadd.f32 %v3128_v52, %v2006_v18 }
0x45a5   :  { %4724 = vtanh.f32 %v3130_v58 }
0x45af   :  { %v4725_v60 = vpop.eup %4724 }
0x45b0   :  { %3134 = vrot.lane.b32.xlu0 %v4725_v60, %s4818_s6 }
0x4622   :  { %v3135_v62 = vpop.permute.xlu0 %3134 }
0x4623   :  { %v3137_v2 = vmul.f32 %v3135_v62, %v3132_v61 }
0x4625   :  { %v3139_v3 = vadd.f32 %v3138_v29, %v3137_v2 }
0x4627   :  { %3141 = vrot.lane.b32.xlu1 %v3139_v3, %s4818_s6 }
0x4699   :  { %v3142_v11 = vpop.permute.xlu1 %3141 }
0x469a   :  { %4276 = vmatmul.mubr.msk.f32.vlgmr.msra.gmra.mrb[30].mxu1 %vm81_vm2, %v3142_v11 }
0x469b   :  { %4506 = vmatpush3.bf16.msra.mxu1 %v5190_v48  ;;  %4297 = vmatprep.mubr.msk.f32.mxu1 %vm4814_vm0, %v4815_v1 }
0x469c   :  { %4507 = vmatprep.subr.bf16.mxu1 %v4813_v0 }
0x469f   :  { %4509 = vmatpush3.bf16.msra.mxu1 %v5194_v49 }
0x46a0   :  { %4516 = vmatprep.subr.bf16.mxu1 %v4813_v0 }
0x476d   :  { %v3211_v4 = vpop.f32.mrb[30].mxu1 }
0x476e   :  { %v3212_v55 = vadd.f32 %v5221_v59, %v3211_v4  ;;  %v4277_v21 = vpop.f32.mrb[31].mxu1 }
0x4770   :  { %3223 = vrot.lane.b32.xlu0 %v3212_v55, %s4817_s1  ;;  %v3215_v7 = vadd.f32 %v3212_v55, %v2011_v5 }
0x4772   :  { %v3748_v8 = vmul.f32 -1.442695, %v3215_v7 }
0x4774   :  { %4726 = vpow2.f32 %v3748_v8 }
0x477e   :  { %v4727_v12 = vpop.eup %4726 }
0x477f   :  { %v3219_v13 = vadd.f32 1.0, %v4727_v12 }
0x4781   :  { %4728 = vrcp.f32 %v3219_v13 }
0x478b   :  { %v4729_v14 = vpop.eup %4728 }
0x478c   :  { %v3233_v6 = vsub.f32 1.0, %v4729_v14  ;;  %v3239_v28 = vmul.f32 %v4729_v14, %v3139_v3 }
0x47e2   :  { %v3224_v27 = vpop.permute.xlu0 %3223 }
0x47e3   :  { %v3226_v15 = vmul.f32 %v4729_v14, %v3224_v27 }
0x47e5   :  { %3228 = vrot.lane.b32.xlu1 %v3226_v15, %s4817_s1 }
0x4857   :  { %v3229_v22 = vpop.permute.xlu1 %3228 }
0x4858   :  { %v3231_v35 = vadd.f32 %v3229_v22, %v2011_v5  ;;  %v2026_v5 = vadd.f32 %v5225_v63, %v5290_v32 }
0x485a   :  { %4730 = vtanh.f32 %v3231_v35 }
0x4864   :  { %v4731_v20 = vpop.eup %4730 }
0x4865   :  { %3235 = vrot.lane.b32.xlu0 %v4731_v20, %s4818_s6 }
0x48d7   :  { %v3236_v37 = vpop.permute.xlu0 %3235 }
0x48d8   :  { %v3238_v38 = vmul.f32 %v3236_v37, %v3233_v6 }
0x48da   :  { %v3240_v39 = vadd.f32 %v3239_v28, %v3238_v38 }
0x48dc   :  { %3242 = vrot.lane.b32.xlu1 %v3240_v39, %s4818_s6 }
0x494e   :  { %v3243_v40 = vpop.permute.xlu1 %3242 }
0x494f   :  { %4287 = vmatmul.mubr.msk.f32.vlgmr.msra.gmra.mrb[40].mxu0 %vm81_vm2, %v3243_v40 }
0x4950   :  { %4512 = vmatpush3.bf16.msra.mxu0 %v5190_v48  ;;  %4308 = vmatprep.mubr.msk.f32.mxu0 %vm4814_vm0, %v4815_v1 }
0x4951   :  { %4513 = vmatprep.subr.bf16.mxu0 %v4813_v0 }
0x4954   :  { %4515 = vmatpush3.bf16.msra.mxu0 %v5194_v49 }
0x4a22   :  { %v3312_v10 = vpop.f32.mrb[40].mxu0 }
0x4a23   :  { %v3313_v25 = vadd.f32 %v5221_v59, %v3312_v10  ;;  %v4288_v41 = vpop.f32.mrb[41].mxu0 }
0x4a25   :  { %3324 = vrot.lane.b32.xlu0 %v3313_v25, %s4817_s1  ;;  %v3316_v9 = vadd.f32 %v3313_v25, %v2016_v42  ;;  %v4760_v25 = vld [vmem:[#allocation5 + $0x63] ss:$0 sm:$0xff] }
0x4a26   :  { %v2031_v41 = vadd.f32 %v4760_v25, %v5288_v17 }
0x4a27   :  { %v3750_v43 = vmul.f32 -1.442695, %v3316_v9 }
0x4a29   :  { %4732 = vpow2.f32 %v3750_v43 }
0x4a33   :  { %v4733_v44 = vpop.eup %4732 }
0x4a34   :  { %v3320_v33 = vadd.f32 1.0, %v4733_v44 }
0x4a36   :  { %4734 = vrcp.f32 %v3320_v33 }
0x4a40   :  { %v4735_v34 = vpop.eup %4734 }
0x4a41   :  { %v3334_v46 = vsub.f32 1.0, %v4735_v34  ;;  %v3340_v31 = vmul.f32 %v4735_v34, %v3240_v39  ;;  %v4759_v39 = vld [vmem:[#allocation5 + $0x64] ss:$0 sm:$0xff] }
0x4a97   :  { %v3325_v57 = vpop.permute.xlu0 %3324 }
0x4a98   :  { %v3327_v26 = vmul.f32 %v4735_v34, %v3325_v57 }
0x4a9a   :  { %3329 = vrot.lane.b32.xlu1 %v3327_v26, %s4817_s1  ;;  %v3757_v26 = vld [vmem:[#allocation5 + $0x65] ss:$0 sm:$0xff] }
0x4b0c   :  { %v3330_v23 = vpop.permute.xlu1 %3329 }
0x4b0d   :  { %v3332_v36 = vadd.f32 %v3330_v23, %v2016_v42 }
0x4b0f   :  { %4736 = vtanh.f32 %v3332_v36 }
0x4b19   :  { %v4737_v45 = vpop.eup %4736 }
0x4b1a   :  { %3336 = vrot.lane.b32.xlu0 %v4737_v45, %s4818_s6 }
0x4b8c   :  { %v3337_v47 = vpop.permute.xlu0 %3336 }
0x4b8d   :  { %v3339_v16 = vmul.f32 %v3337_v47, %v3334_v46 }
0x4b8f   :  { %v3341_v18 = vadd.f32 %v3340_v31, %v3339_v16 }
0x4b91   :  { %3343 = vrot.lane.b32.xlu1 %v3341_v18, %s4818_s6 }
0x4c03   :  { %v3344_v50 = vpop.permute.xlu1 %3343 }
0x4c04   :  { %4298 = vmatmul.mubr.msk.f32.vlgmr.msra.gmra.mrb[32].mxu1 %vm81_vm2, %v3344_v50 }
0x4c05   :  { %4518 = vmatpush3.bf16.msra.mxu1 %v5190_v48  ;;  %4319 = vmatprep.mubr.msk.f32.mxu1 %vm4814_vm0, %v4815_v1 }
0x4c06   :  { %4519 = vmatprep.subr.bf16.mxu1 %v4813_v0 }
0x4c09   :  { %4521 = vmatpush3.bf16.msra.mxu1 %v5194_v49 }
0x4cd7   :  { %v3413_v51 = vpop.f32.mrb[32].mxu1 }
0x4cd8   :  { %v3414_v53 = vadd.f32 %v5221_v59, %v3413_v51  ;;  %v4299_v54 = vpop.f32.mrb[33].mxu1 }
0x4cda   :  { %3425 = vrot.lane.b32.xlu0 %v3414_v53, %s4817_s1  ;;  %v3417_v19 = vadd.f32 %v3414_v53, %v2021_v24 }
0x4cdc   :  { %v3752_v56 = vmul.f32 -1.442695, %v3417_v19 }
0x4cde   :  { %4738 = vpow2.f32 %v3752_v56 }
0x4ce8   :  { %v4739_v48 = vpop.eup %4738 }
0x4ce9   :  { %v3421_v52 = vadd.f32 1.0, %v4739_v48 }
0x4ceb   :  { %4740 = vrcp.f32 %v3421_v52 }
0x4cf5   :  { %v4741_v1 = vpop.eup %4740 }
0x4cf6   :  { %v3435_v62 = vsub.f32 1.0, %v4741_v1  ;;  %v3441_v30 = vmul.f32 %v4741_v1, %v3341_v18 }
0x4d4c   :  { %v3426_v58 = vpop.permute.xlu0 %3425 }
0x4d4d   :  { %v3428_v0 = vmul.f32 %v4741_v1, %v3426_v58 }
0x4d4f   :  { %3430 = vrot.lane.b32.xlu1 %v3428_v0, %s4817_s1 }
0x4dc1   :  { %v3431_v49 = vpop.permute.xlu1 %3430 }
0x4dc2   :  { %v3433_v60 = vadd.f32 %v3431_v49, %v2021_v24 }
0x4dc4   :  { %4742 = vtanh.f32 %v3433_v60 }
0x4dce   :  { %v4743_v61 = vpop.eup %4742 }
0x4dcf   :  { %3437 = vrot.lane.b32.xlu0 %v4743_v61, %s4818_s6 }
0x4e41   :  { %v3438_v29 = vpop.permute.xlu0 %3437 }
0x4e42   :  { %v3440_v2 = vmul.f32 %v3438_v29, %v3435_v62 }
0x4e44   :  { %v3442_v3 = vadd.f32 %v3441_v30, %v3440_v2 }
0x4e46   :  { %3444 = vrot.lane.b32.xlu1 %v3442_v3, %s4818_s6 }
0x4eb8   :  { %v3445_v11 = vpop.permute.xlu1 %3444 }
0x4eb9   :  { %4309 = vmatmul.mubr.msk.f32.vlgmr.msra.gmra.mrb[42].mxu0 %vm81_vm2, %v3445_v11 }
0x4f8c   :  { %v3514_v4 = vpop.f32.mrb[42].mxu0 }
0x4f8d   :  { %v3515_v55 = vadd.f32 %v5221_v59, %v3514_v4  ;;  %v4310_v21 = vpop.f32.mrb[43].mxu0 }
0x4f8f   :  { %3526 = vrot.lane.b32.xlu0 %v3515_v55, %s4817_s1  ;;  %v3518_v7 = vadd.f32 %v3515_v55, %v2026_v5 }
0x4f91   :  { %v3754_v8 = vmul.f32 -1.442695, %v3518_v7 }
0x4f93   :  { %4744 = vpow2.f32 %v3754_v8 }
0x4f9d   :  { %v4745_v12 = vpop.eup %4744 }
0x4f9e   :  { %v3522_v13 = vadd.f32 1.0, %v4745_v12 }
0x4fa0   :  { %4746 = vrcp.f32 %v3522_v13 }
0x4faa   :  { %v4747_v14 = vpop.eup %4746 }
0x4fab   :  { %v3536_v20 = vsub.f32 1.0, %v4747_v14  ;;  %v3542_v63 = vmul.f32 %v4747_v14, %v3442_v3 }
0x5001   :  { %v3527_v27 = vpop.permute.xlu0 %3526 }
0x5002   :  { %v3529_v15 = vmul.f32 %v4747_v14, %v3527_v27 }
0x5004   :  { %3531 = vrot.lane.b32.xlu1 %v3529_v15, %s4817_s1 }
0x5076   :  { %v3532_v22 = vpop.permute.xlu1 %3531 }
0x5077   :  { %v3534_v35 = vadd.f32 %v3532_v22, %v2026_v5 }
0x5079   :  { %4748 = vtanh.f32 %v3534_v35 }
0x5083   :  { %v4749_v59 = vpop.eup %4748 }
0x5084   :  { %3538 = vrot.lane.b32.xlu0 %v4749_v59, %s4818_s6 }
0x50f6   :  { %v3539_v6 = vpop.permute.xlu0 %3538 }
0x50f7   :  { %v3541_v32 = vmul.f32 %v3539_v6, %v3536_v20 }
0x50f9   :  { %v3543_v37 = vadd.f32 %v3542_v63, %v3541_v32 }
0x50fb   :  { %3545 = vrot.lane.b32.xlu1 %v3543_v37, %s4818_s6 }
0x516d   :  { %v3546_v28 = vpop.permute.xlu1 %3545 }
0x516e   :  { %4320 = vmatmul.mubr.msk.f32.vlgmr.msra.gmra.mrb[34].mxu1 %vm81_vm2, %v3546_v28 }
0x5241   :  { %v3615_v38 = vpop.f32.mrb[34].mxu1 }
0x5242   :  { %v3616_v40 = vadd.f32 %v4759_v39, %v3615_v38  ;;  %v4321_v10 = vpop.f32.mrb[35].mxu1 }
0x5244   :  { %3627 = vrot.lane.b32.xlu0 %v3616_v40, %s4817_s1  ;;  %v3619_v42 = vadd.f32 %v3616_v40, %v2031_v41 }
0x5246   :  { %v3756_v9 = vmul.f32 -1.442695, %v3619_v42 }
0x5248   :  { %4750 = vpow2.f32 %v3756_v9 }
0x5252   :  { %v4751_v43 = vpop.eup %4750 }
0x5253   :  { %v3623_v44 = vadd.f32 1.0, %v4751_v43 }
0x5255   :  { %4752 = vrcp.f32 %v3623_v44 }
0x525f   :  { %v4753_v33 = vpop.eup %4752 }
0x5260   :  { %v3637_v17 = vsub.f32 1.0, %v4753_v33  ;;  %v3643_v31 = vmul.f32 %v4753_v33, %v3543_v37 }
0x52b6   :  { %v3628_v34 = vpop.permute.xlu0 %3627 }
0x52b7   :  { %v3630_v57 = vmul.f32 %v4753_v33, %v3628_v34 }
0x52b9   :  { %3632 = vrot.lane.b32.xlu1 %v3630_v57, %s4817_s1 }
0x52bd   :  { %3650 = vrot.lane.b32.xlu1 %v3757_v26, %s4834_s7 }
0x532b   :  { %v3633_v23 = vpop.permute.xlu1 %3632 }
0x532c   :  { %v3635_v36 = vadd.f32 %v3633_v23, %v2031_v41 }
0x532e   :  { %4754 = vtanh.f32 %v3635_v36 }
0x532f   :  { %v3651_v16 = vpop.permute.xlu1 %3650 }
0x5338   :  { %v4755_v45 = vpop.eup %4754 }
0x5339   :  { %3639 = vrot.lane.b32.xlu0 %v4755_v45, %s4818_s6 }
0x53ab   :  { %v3640_v46 = vpop.permute.xlu0 %3639 }
0x53ac   :  { %v3642_v47 = vmul.f32 %v3640_v46, %v3637_v17 }
0x53ae   :  { %v3644_v18 = vadd.f32 %v3643_v31, %v3642_v47 }
0x53b0   :  { %v3653_v50 = vmul.f32 %v3651_v16, %v3644_v18 }
0x53b2   :  { %3655 = vrot.lane.b32.xlu0 %v3653_v50, %s4818_s6 }
0x5424   :  { %v3656_v51 = vpop.permute.xlu0 %3655 }
0x5425   :  { %v3658_v53 = vsel %vm81_vm2, %v3656_v51, 0.0 }
0x5426   :  { %3659 = vadd.xlane.f32.xlu1 %v3658_v53 }
0x54b3   :  { %v3660_v54 = vpop.xlane.xlu1 %3659 }
0x54b4   :  { %v3661_v24 = vadd.f32 %v3757_v26, %v3660_v54 }
0x54b6   :  { %3663 = vrot.lane.b32.xlu0 %v3661_v24, %s4818_s6 }
0x5528   :  { %v3664_v19 = vpop.permute.xlu0 %3663 }
0x5529   :  { %3667 = vst.msk [vmem:[%s5451_s2] sm:$0xf] %vm3666_vm3, %v3664_v19 }
0x552a   :  { %3672 = vsyncpa [#allocation4], 1 }
0x552b   :  { %3673 = vsyncpa [#allocation6], 1 }

</bundles_post_ra>
